<compile_context>
chip_gen: v7x
topology: tpu7x:2x2x1
jax: 0.10.0
libtpu: 0.0.40
codegen_flags: <defaults>
</compile_context>

<pallas_src>
import functools

import jax
import jax.numpy as jnp
from jax.experimental import pallas as pl
from jax.experimental.pallas import tpu as pltpu


# ---------------------------------------------------------------------------
# Kernel (channel-major)
# ---------------------------------------------------------------------------
def _bn_add_conv1x1_kernel(x_ref, res_ref, sb_ref, w_ref, o_ref):
    # x_ref, res_ref : (Cin, HW)    f32   (Cin on sublanes, HW on lanes)
    # sb_ref         : (Cin, 2)     f32   col 0 = folded BN scale, col 1 = bias
    # w_ref          : (TCout, Cin) bf16  (native PyTorch layout, maybe row-padded)
    # o_ref          : (TCout, HW)  f32
    scale = sb_ref[:, 0:1]
    bias = sb_ref[:, 1:2]
    s = x_ref[...] * scale + bias + res_ref[...]           # BN(eval) + residual add
    o_ref[...] = jnp.dot(
        w_ref[...], s.astype(jnp.bfloat16),
        preferred_element_type=jnp.float32,
    ).astype(o_ref.dtype)                                   # 1x1 conv == matmul


# ---------------------------------------------------------------------------
# Tiling / device helpers
# ---------------------------------------------------------------------------
def _num_tensorcores_per_chip():
    """Best-effort: 2 TCs on v7x, 1 otherwise (safe fallback = 1)."""
    try:
        kind = jax.devices()[0].device_kind.lower()
    except Exception:
        return 1
    if "v7" in kind or "7x" in kind:
        return 2
    return 1


# Device-independent Cout alignment: 8-sublane alignment x max 2-way TC split.
_COUT_ALIGN = 16


# ---------------------------------------------------------------------------
# One-time parameter preprocessing (hoisted off the hot path)
# ---------------------------------------------------------------------------
def prepare_params(gamma, beta, running_mean, running_var, weight, eps=1e-5):
    """Fold BN and row-pad / bf16-cast the 1x1 conv weight.

    Returns (scale_bias (Cin, 2) f32, w_mat (Cout_padded, Cin) bf16, cout).
    Padding is device-independent (multiple of 16 rows), so params prepared on
    any host/device work on any TPU generation.
    """
    cout, cin = weight.shape[0], weight.shape[1]
    scale = gamma / jnp.sqrt(running_var + eps)             # (Cin,)
    bias = beta - running_mean * scale                      # (Cin,)
    scale_bias = jnp.stack([scale, bias], axis=1)           # (Cin, 2) f32

    cout_pad = pl.cdiv(cout, _COUT_ALIGN) * _COUT_ALIGN
    w_mat = weight.reshape(cout, cin)                       # (Cout, Cin) -- no transpose
    if cout_pad != cout:
        w_mat = jnp.pad(w_mat, ((0, cout_pad - cout), (0, 0)))
    w_mat = w_mat.astype(jnp.bfloat16)                      # halve weight DMA
    return scale_bias, w_mat, cout


# ---------------------------------------------------------------------------
# Per-call wrapper
# ---------------------------------------------------------------------------
@functools.partial(jax.jit, static_argnames=("out_channels",))
def bn_add_conv1x1(x529, x516, scale_bias, w_mat, out_channels):
    """x529, x516: NCHW (N, Cin, H, W). Returns NCHW (N, Cout, H, W)."""
    N, Cin, H, W = x529.shape
    HW = H * W
    Cout = out_channels
    cout_pad = w_mat.shape[0]

    # Dual-TC split on v7x (Cout tile per core); single block elsewhere.
    n_tiles = _num_tensorcores_per_chip()
    if cout_pad % (8 * n_tiles) != 0:
        n_tiles = 1
    tn = cout_pad // n_tiles

    # Pure reshapes (no transpose): NCHW -> (N, Cin, HW) channel-major.
    x_cm = x529.reshape(N, Cin, HW)
    r_cm = x516.reshape(N, Cin, HW)

    cost = pl.CostEstimate(
        flops=2 * N * HW * Cin * cout_pad,
        transcendentals=0,
        bytes_accessed=(2 * N * Cin * HW * 4       # x, residual (f32)
                        + Cin * 2 * 4              # scale/bias
                        + Cin * cout_pad * 2       # weight (bf16)
                        + N * cout_pad * HW * 4),  # output (f32)
    )

    out_cm = pl.pallas_call(
        _bn_add_conv1x1_kernel,
        out_shape=jax.ShapeDtypeStruct((N, cout_pad, HW), x529.dtype),
        grid=(n_tiles, N),
        in_specs=[
            pl.BlockSpec((None, Cin, HW), lambda j, n: (n, 0, 0)),   # x
            pl.BlockSpec((None, Cin, HW), lambda j, n: (n, 0, 0)),   # residual
            pl.BlockSpec((Cin, 2), lambda j, n: (0, 0)),             # scale/bias
            pl.BlockSpec((tn, Cin), lambda j, n: (j, 0)),            # weight row tile
        ],
        out_specs=pl.BlockSpec((None, tn, HW), lambda j, n: (n, j, 0)),
        compiler_params=pltpu.CompilerParams(
            dimension_semantics=("parallel", "parallel")),
        cost_estimate=cost,
    )(x_cm, r_cm, scale_bias, w_mat)

    # Drop Cout row padding (no-op when cout_pad == Cout), pure reshape to NCHW.
    out_cm = out_cm[:, :Cout, :]
    return out_cm.reshape(N, Cout, H, W)


# ---------------------------------------------------------------------------
# Self-test
# ---------------------------------------------------------------------------
if __name__ == "__main__":
    key = jax.random.PRNGKey(0)
    k1, k2, k3, k4, k5, k6, k7 = jax.random.split(key, 7)

    N, Cin, H, W = 1, 304, 7, 7
    Cout = 1824

    # Inputs (match the module's shapes).
    x529 = jax.random.normal(k1, (N, Cin, H, W), dtype=jnp.float32)
    x516 = jax.random.normal(k2, (N, Cin, H, W), dtype=jnp.float32)

    # Deterministic parameter init.
    gamma = jax.random.normal(k3, (Cin,), dtype=jnp.float32) * 0.1 + 1.0
    beta = jax.random.normal(k4, (Cin,), dtype=jnp.float32) * 0.1
    running_mean = jax.random.normal(k5, (Cin,), dtype=jnp.float32) * 0.1
    running_var = jax.nn.softplus(
        jax.random.normal(k6, (Cin,), dtype=jnp.float32)) + 0.5
    conv_w = jax.random.normal(k7, (Cout, Cin, 1, 1), dtype=jnp.float32) * 0.05

    # One-time parameter prep (hoisted off the hot path).
    scale_bias, w_mat, cout = prepare_params(
        gamma, beta, running_mean, running_var, conv_w, eps=1e-5)
    scale_bias = jax.block_until_ready(scale_bias)
    w_mat = jax.block_until_ready(w_mat)

    out = bn_add_conv1x1(x529, x516, scale_bias, w_mat, out_channels=cout)
    out = jax.block_until_ready(out)

    # Reference check in plain JAX (f32).
    scale = gamma / jnp.sqrt(running_var + 1e-5)
    bias = beta - running_mean * scale
    x_bn = x529 * scale[None, :, None, None] + bias[None, :, None, None]
    s = x_bn + x516
    ref = jnp.einsum("nchw,oc->nohw", s, conv_w.reshape(Cout, Cin))

    assert out.shape == (N, Cout, H, W), out.shape
    # bf16 MXU operands (f32 accumulate) -> loosened tolerance.
    assert jnp.allclose(out, ref, atol=2e-2, rtol=2e-2), (
        float(jnp.max(jnp.abs(out - ref))))

    print("KERNEL_OK")
</pallas_src>

<mosaic_0001>
module attributes {stable_mosaic.version = 11 : i64} {
  func.func @_bn_add_conv1x1_kernel(%arg0: i32, %arg1: i32, %arg2: memref<1x304x49xf32, #tpu.memory_space<vmem>>, %arg3: memref<1x304x49xf32, #tpu.memory_space<vmem>>, %arg4: memref<304x2xf32, #tpu.memory_space<vmem>>, %arg5: memref<1824x304xbf16, #tpu.memory_space<vmem>>, %arg6: memref<1x1824x49xf32, #tpu.memory_space<vmem>>) attributes {dimension_semantics = [#tpu.dimension_semantics<parallel>, #tpu.dimension_semantics<parallel>], iteration_bounds = array<i64: 1, 1>, scalar_prefetch = 0 : i64, scratch_operands = 0 : i64, tpu.core_type = #tpu.core_type<tc>, window_params = [{transform_indices = @transform_0, window_bounds = array<i64: 1, 304, 49>}, {transform_indices = @transform_1, window_bounds = array<i64: 1, 304, 49>}, {pipeline_mode = #tpu.pipeline_mode<synchronous>, transform_indices = @transform_2, window_bounds = array<i64: 304, 2>}, {transform_indices = @transform_3, window_bounds = array<i64: 1824, 304>}, {transform_indices = @transform_4, window_bounds = array<i64: 1, 1824, 49>}]} {
    %c0 = arith.constant 0 : index
    %c0_0 = arith.constant 0 : index
    %0 = vector.load %arg4[%c0, %c0_0] : memref<304x2xf32, #tpu.memory_space<vmem>>, vector<304x1xf32>
    %c0_1 = arith.constant 0 : index
    %c1 = arith.constant 1 : index
    %1 = vector.load %arg4[%c0_1, %c1] : memref<304x2xf32, #tpu.memory_space<vmem>>, vector<304x1xf32>
    %c0_2 = arith.constant 0 : index
    %c0_3 = arith.constant 0 : index
    %c0_4 = arith.constant 0 : index
    %2 = vector.load %arg2[%c0_2, %c0_3, %c0_4] : memref<1x304x49xf32, #tpu.memory_space<vmem>>, vector<1x304x49xf32>
    %3 = vector.shape_cast %2 : vector<1x304x49xf32> to vector<304x49xf32>
    %4 = vector.broadcast %0 : vector<304x1xf32> to vector<304x49xf32>
    %5 = arith.mulf %3, %4 : vector<304x49xf32>
    %6 = vector.broadcast %1 : vector<304x1xf32> to vector<304x49xf32>
    %7 = arith.addf %5, %6 : vector<304x49xf32>
    %c0_5 = arith.constant 0 : index
    %c0_6 = arith.constant 0 : index
    %c0_7 = arith.constant 0 : index
    %8 = vector.load %arg3[%c0_5, %c0_6, %c0_7] : memref<1x304x49xf32, #tpu.memory_space<vmem>>, vector<1x304x49xf32>
    %9 = vector.shape_cast %8 : vector<1x304x49xf32> to vector<304x49xf32>
    %10 = arith.addf %7, %9 : vector<304x49xf32>
    %c0_8 = arith.constant 0 : index
    %c0_9 = arith.constant 0 : index
    %11 = vector.load %arg5[%c0_8, %c0_9] : memref<1824x304xbf16, #tpu.memory_space<vmem>>, vector<1824x304xbf16>
    %12 = arith.truncf %10 : vector<304x49xf32> to vector<304x49xbf16>
    %cst = arith.constant dense<0.000000e+00> : vector<1824x49xf32>
    %13 = tpu.matmul %11, %12, %cst {dimension_numbers = #tpu.dot_dimension_numbers<[1], [0], [0], [1], [0, 0, 1, 1], [], []>} : vector<1824x304xbf16>, vector<304x49xbf16>, vector<1824x49xf32> -> vector<1824x49xf32>
    %c0_10 = arith.constant 0 : index
    %c0_11 = arith.constant 0 : index
    %c0_12 = arith.constant 0 : index
    %14 = vector.load %arg6[%c0_10, %c0_11, %c0_12] : memref<1x1824x49xf32, #tpu.memory_space<vmem>>, vector<1x1824x49xf32>
    %15 = vector.shape_cast %14 : vector<1x1824x49xf32> to vector<1824x49xf32>
    %16 = vector.shape_cast %13 : vector<1824x49xf32> to vector<1x1824x49xf32>
    tpu.vector_store %arg6[%c0_10, %c0_11, %c0_12], %16 {strides = array<i32>} : memref<1x1824x49xf32, #tpu.memory_space<vmem>>, vector<1x1824x49xf32>,
    return
  }
  func.func @transform_0(%arg0: i32, %arg1: i32) -> (i32, i32, i32) {
    %c0_i32 = arith.constant 0 : i32
    %c0_i32_0 = arith.constant 0 : i32
    %c0_i32_1 = arith.constant 0 : i32
    return %arg1, %c0_i32, %c0_i32_0 : i32, i32, i32
  }
  func.func @transform_1(%arg0: i32, %arg1: i32) -> (i32, i32, i32) {
    %c0_i32 = arith.constant 0 : i32
    %c0_i32_0 = arith.constant 0 : i32
    %c0_i32_1 = arith.constant 0 : i32
    return %arg1, %c0_i32, %c0_i32_0 : i32, i32, i32
  }
  func.func @transform_2(%arg0: i32, %arg1: i32) -> (i32, i32) {
    %c0_i32 = arith.constant 0 : i32
    %c0_i32_0 = arith.constant 0 : i32
    %c0_i32_1 = arith.constant 0 : i32
    return %c0_i32, %c0_i32_0 : i32, i32
  }
  func.func @transform_3(%arg0: i32, %arg1: i32) -> (i32, i32) {
    %c0_i32 = arith.constant 0 : i32
    %c0_i32_0 = arith.constant 0 : i32
    return %arg0, %c0_i32 : i32, i32
  }
  func.func @transform_4(%arg0: i32, %arg1: i32) -> (i32, i32, i32) {
    %c0_i32 = arith.constant 0 : i32
    %c0_i32_0 = arith.constant 0 : i32
    return %arg1, %arg0, %c0_i32 : i32, i32, i32
  }
}

</mosaic_0001>

<bundles_post_ra>
// kernel: bn_add_conv1x1.1
= control target key start
LH: loop header
LB: loop body
LE: loop exit
PB: predicated region body
PF: predicated region fallthrough
CT: control target
= control target key end

     0   :  { %v6578_v0 = vmov 1   ;;  %v6579_v5 = vmov 0   ;;  %vm2773_vm0 = vcmask 392192   ;;  %vm5006_vm1 = vcmask 400384   ;;  %s9691_s2 = inlined_call_operand.vmem [shape: f32[304,2], index: 2, kind: input, shape index: {}]   ;;  %s9692_s0 = inlined_call_operand.vmem [shape: f32[1,304,49], index: 0, kind: input, shape index: {}]   ;;  %s9693_s1 = inlined_call_operand.vmem [shape: f32[1,304,49], index: 1, kind: input, shape index: {}]   ;;  %s9694_s3 = inlined_call_operand.vmem [shape: bf16[1824,304], index: 3, kind: input, shape index: {}]   ;;  %s9695_s4 = inlined_call_operand.vmem [shape: f32[1,1824,49], index: 4, kind: output, shape index: {}]  }
   0x1   :  { %6082 = vset.pattern.permute.xlu0 %v6578_v0  ;;  %6080 = vset.pattern.permute.xlu1 %v6578_v0  ;;  %v20_v1 = vld [vmem:[%s9691_s2 + $0x10] sm:$0xff]  ;;  %v18_v2 = vld [vmem:[%s9691_s2] sm:$0xff]  ;;  %v19_v4 = vld [vmem:[%s9691_s2 + $0x8] sm:$0xff] }
   0x2   :  { %331 = vperm.xlu0 %6082, %v20_v1   ;;  %323 = vperm.xlu1 %6080, %v18_v2   ;;  %v24_v3 = vld [vmem:[%s9691_s2 + $0x30] sm:$0xff]  ;;  %v21_v7 = vld [vmem:[%s9691_s2 + $0x18] sm:$0xff]  ;;  %v22_v10 = vld [vmem:[%s9691_s2 + $0x20] sm:$0xff] }
   0x3   :  { %3116 = vmatprep.subr.bf16.mxu0 %v6579_v5  ;;  %6046 = vmatprep.subr.bf16.mxu1 %v6579_v5  ;;  %v28_v6 = vld [vmem:[%s9691_s2 + $0x50] sm:$0xff]  ;;  %v23_v13 = vld [vmem:[%s9691_s2 + $0x28] sm:$0xff]  ;;  %v25_v14 = vld [vmem:[%s9691_s2 + $0x38] sm:$0xff] }
   0x4   :  { %v32_v8 = vld [vmem:[%s9691_s2 + $0x70] sm:$0xff]  ;;  %v26_v15 = vld [vmem:[%s9691_s2 + $0x40] sm:$0xff]  ;;  %v27_v16 = vld [vmem:[%s9691_s2 + $0x48] sm:$0xff] }
   0x5   :  { %v36_v9 = vld [vmem:[%s9691_s2 + $0x90] sm:$0xff]  ;;  %v31_v17 = vld [vmem:[%s9691_s2 + $0x68] sm:$0xff]  ;;  %v29_v18 = vld [vmem:[%s9691_s2 + $0x58] sm:$0xff] }
   0x6   :  { %347 = vperm.xlu0 %6082, %v24_v3   ;;  %327 = vperm.xlu1 %6080, %v19_v4   ;;  %v40_v11 = vld [vmem:[%s9691_s2 + $0xb0] sm:$0xff]  ;;  %v35_v19 = vld [vmem:[%s9691_s2 + $0x88] sm:$0xff]  ;;  %v30_v20 = vld [vmem:[%s9691_s2 + $0x60] sm:$0xff] }
   0x7   :  { %v44_v12 = vld [vmem:[%s9691_s2 + $0xd0] sm:$0xff]  ;;  %v39_v21 = vld [vmem:[%s9691_s2 + $0xa8] sm:$0xff]  ;;  %v33_v23 = vld [vmem:[%s9691_s2 + $0x78] sm:$0xff] }
   0x8   :  { %v43_v22 = vld [vmem:[%s9691_s2 + $0xc8] sm:$0xff]  ;;  %v34_v25 = vld [vmem:[%s9691_s2 + $0x80] sm:$0xff]  ;;  %v48_v26 = vld [vmem:[%s9691_s2 + $0xf0] sm:$0xff] }
   0x9   :  { %v6693_v24 = vld [vmem:[%s9691_s2 + $0xe8] sm:$0xff]  ;;  %v52_v27 = vld [vmem:[%s9691_s2 + $0x110] sm:$0xff]  ;;  %v37_v28 = vld [vmem:[%s9691_s2 + $0x98] sm:$0xff] }
   0xa   :  { %363 = vperm.xlu0 %6082, %v28_v6   ;;  %6081 = vset.pattern.permute.xlu1 %v6579_v5  ;;  %v6715_v29 = vld [vmem:[%s9691_s2 + $0x108] sm:$0xff]  ;;  %v38_v30 = vld [vmem:[%s9691_s2 + $0xa0] sm:$0xff]  ;;  %v41_v32 = vld [vmem:[%s9691_s2 + $0xb8] sm:$0xff] }
   0xb   :  { %111 = vperm.xlu1 %6081, %v21_v7   ;;  %v6726_v31 = vld [vmem:[%s9691_s2 + $0x128] sm:$0xff]  ;;  %v42_v39 = vld [vmem:[%s9691_s2 + $0xc0] sm:$0xff]  ;;  %v45_v45 = vld [vmem:[%s9691_s2 + $0xd8] sm:$0xff] }
   0xc   :  { %v56_v48 = vld [vmem:[%s9692_s0] sm:$0xff]  ;;  %v57_v52 = vld [vmem:[%s9692_s0 + $0x8] sm:$0xff]  ;;  %v59_v53 = vld [vmem:[%s9692_s0 + $0x18] sm:$0xff] }
   0xd   :  { %v46_v56 = vld [vmem:[%s9691_s2 + $0xe0] sm:$0xff]  ;;  %v58_v59 = vld [vmem:[%s9692_s0 + $0x10] sm:$0xff]  ;;  %v513_v61 = vld [vmem:[%s9693_s1 + $0x8] sm:$0xff] }
   0xe   :  { %379 = vperm.xlu0 %6082, %v32_v8   ;;  %v512_v60 = vld [vmem:[%s9693_s1] sm:$0xff] }
   0xf   :  { %6083 = vset.pattern.permute.xlu1 %v6578_v0  ;;  %v60_v63 = vld [vmem:[%s9692_s0 + $0x20] sm:$0xff] }
  0x10   :  { %335 = vperm.xlu1 %6083, %v21_v7  }
  0x12   :  { %395 = vperm.xlu0 %6082, %v36_v9  }
  0x14   :  { %6084 = vset.pattern.permute.xlu1 %v6579_v5 }
  0x15   :  { %116 = vperm.xlu1 %6084, %v22_v10  }
  0x16   :  { %411 = vperm.xlu0 %6082, %v40_v11  }
  0x19   :  { %6085 = vset.pattern.permute.xlu1 %v6578_v0 }
  0x1a   :  { %427 = vperm.xlu0 %6082, %v44_v12   ;;  %339 = vperm.xlu1 %6085, %v22_v10  }
  0x1e   :  { %6107 = vset.pattern.permute.xlu0 %v6579_v5  ;;  %343 = vperm.xlu1 %6085, %v23_v13  }
  0x1f   :  { %96 = vperm.xlu0 %6107, %v18_v2  }
  0x22   :  { %6086 = vset.pattern.permute.xlu1 %v6579_v5 }
  0x23   :  { %101 = vperm.xlu0 %6107, %v19_v4   ;;  %131 = vperm.xlu1 %6086, %v25_v14  }
  0x27   :  { %106 = vperm.xlu0 %6107, %v20_v1   ;;  %6087 = vset.pattern.permute.xlu1 %v6578_v0 }
  0x28   :  { %351 = vperm.xlu1 %6087, %v25_v14  }
  0x2b   :  { %121 = vperm.xlu0 %6107, %v23_v13  }
  0x2c   :  { %6088 = vset.pattern.permute.xlu1 %v6579_v5 }
  0x2d   :  { %136 = vperm.xlu1 %6088, %v26_v15  }
  0x2f   :  { %126 = vperm.xlu0 %6107, %v24_v3  }
  0x31   :  { %6089 = vset.pattern.permute.xlu1 %v6578_v0 }
  0x32   :  { %355 = vperm.xlu1 %6089, %v26_v15  }
  0x33   :  { %141 = vperm.xlu0 %6107, %v27_v16  }
  0x36   :  { %359 = vperm.xlu1 %6089, %v27_v16   ;;  %v63_v16 = vld [vmem:[%s9692_s0 + $0x38] sm:$0xff] }
  0x37   :  { %146 = vperm.xlu0 %6107, %v28_v6  }
  0x3a   :  { %6090 = vset.pattern.permute.xlu1 %v6579_v5 }
  0x3b   :  { %161 = vperm.xlu0 %6107, %v31_v17   ;;  %151 = vperm.xlu1 %6090, %v29_v18  }
  0x3f   :  { %166 = vperm.xlu0 %6107, %v32_v8   ;;  %6091 = vset.pattern.permute.xlu1 %v6578_v0 }
  0x40   :  { %367 = vperm.xlu1 %6091, %v29_v18  }
  0x43   :  { %181 = vperm.xlu0 %6107, %v35_v19  }
  0x44   :  { %6092 = vset.pattern.permute.xlu1 %v6579_v5 }
  0x45   :  { %156 = vperm.xlu1 %6092, %v30_v20  }
  0x47   :  { %186 = vperm.xlu0 %6107, %v36_v9   ;;  %v515_v9 = vld [vmem:[%s9693_s1 + $0x18] sm:$0xff] }
  0x49   :  { %6093 = vset.pattern.permute.xlu1 %v6578_v0 }
  0x4a   :  { %371 = vperm.xlu1 %6093, %v30_v20  }
  0x4b   :  { %201 = vperm.xlu0 %6107, %v39_v21  }
  0x4e   :  { %375 = vperm.xlu1 %6093, %v31_v17  }
  0x4f   :  { %206 = vperm.xlu0 %6107, %v40_v11   ;;  %v514_v11 = vld [vmem:[%s9693_s1 + $0x10] sm:$0xff] }
  0x52   :  { %6094 = vset.pattern.permute.xlu1 %v6579_v5 }
  0x53   :  { %221 = vperm.xlu0 %6107, %v43_v22   ;;  %171 = vperm.xlu1 %6094, %v33_v23  }
  0x57   :  { %226 = vperm.xlu0 %6107, %v44_v12   ;;  %6095 = vset.pattern.permute.xlu1 %v6578_v0  ;;  %v61_v12 = vld [vmem:[%s9692_s0 + $0x28] sm:$0xff] }
  0x58   :  { %383 = vperm.xlu1 %6095, %v33_v23  }
  0x5b   :  { %241 = vperm.xlu0 %6107, %v6693_v24  }
  0x5c   :  { %6096 = vset.pattern.permute.xlu1 %v6579_v5 }
  0x5d   :  { %176 = vperm.xlu1 %6096, %v34_v25  }
  0x5f   :  { %246 = vperm.xlu0 %6107, %v48_v26  }
  0x61   :  { %6097 = vset.pattern.permute.xlu1 %v6578_v0 }
  0x62   :  { %387 = vperm.xlu1 %6097, %v34_v25   ;;  %v62_v25 = vld [vmem:[%s9692_s0 + $0x30] sm:$0xff] }
  0x63   :  { %6112 = vset.pattern.permute.xlu0 %v6578_v0 }
  0x64   :  { %443 = vperm.xlu0 %6112, %v48_v26  }
  0x66   :  { %391 = vperm.xlu1 %6097, %v35_v19   ;;  %v516_v19 = vld [vmem:[%s9693_s1 + $0x20] sm:$0xff] }
  0x68   :  { %459 = vperm.xlu0 %6112, %v52_v27  }
  0x6a   :  { %6098 = vset.pattern.permute.xlu1 %v6579_v5 }
  0x6b   :  { %191 = vperm.xlu1 %6098, %v37_v28  }
  0x6c   :  { %6117 = vset.pattern.permute.xlu0 %v6579_v5 }
  0x6d   :  { %261 = vperm.xlu0 %6117, %v6715_v29  }
  0x6f   :  { %6099 = vset.pattern.permute.xlu1 %v6578_v0 }
  0x70   :  { %399 = vperm.xlu1 %6099, %v37_v28  }
  0x71   :  { %266 = vperm.xlu0 %6117, %v52_v27  }
  0x74   :  { %6100 = vset.pattern.permute.xlu1 %v6579_v5 }
  0x75   :  { %196 = vperm.xlu1 %6100, %v38_v30   ;;  %281 = vperm.xlu0 %6117, %v6726_v31  }
  0x79   :  { %6101 = vset.pattern.permute.xlu1 %v6578_v0  ;;  %6121 = vset.pattern.permute.xlu0 %v6578_v0 }
  0x7a   :  { %403 = vperm.xlu1 %6101, %v38_v30  }
  0x7e   :  { %407 = vperm.xlu1 %6101, %v39_v21  }
  0x81   :  { %v324_v33 = vpop.permute.xlu1 %323  ;;  %v332_v34 = vpop.permute.xlu0 %331 }
  0x82   :  { %6102 = vset.pattern.permute.xlu1 %v6579_v5 }
  0x83   :  { %211 = vperm.xlu1 %6102, %v41_v32  }
  0x85   :  { %v328_v35 = vpop.permute.xlu1 %327  ;;  %v6736_v36 = vpop.permute.xlu0 %347 }
  0x87   :  { %6103 = vset.pattern.permute.xlu1 %v6578_v0 }
  0x88   :  { %415 = vperm.xlu1 %6103, %v41_v32  }
  0x89   :  { %v6739_v37 = vpop.permute.xlu0 %363 }
  0x8a   :  { %v112_v38 = vpop.permute.xlu1 %111 }
  0x8b   :  { %v287_v62 = vmul.f32 %v112_v38, %v59_v53  ;;  %v64_v38 = vld [vmem:[%s9692_s0 + $0x40] sm:$0xff] }
  0x8c   :  { %6104 = vset.pattern.permute.xlu1 %v6579_v5 }
  0x8d   :  { %216 = vperm.xlu1 %6104, %v42_v39   ;;  %v6745_v40 = vpop.permute.xlu0 %379 }
  0x8f   :  { %v336_v41 = vpop.permute.xlu1 %335 }
  0x90   :  { %v477_v3 = vadd.f32 %v336_v41, %v287_v62  ;;  %v518_v41 = vld [vmem:[%s9693_s1 + $0x30] sm:$0xff] }
  0x91   :  { %6105 = vset.pattern.permute.xlu1 %v6578_v0  ;;  %v6748_v42 = vpop.permute.xlu0 %395 }
  0x92   :  { %419 = vperm.xlu1 %6105, %v42_v39   ;;  %v553_v18 = vadd.f32 %v515_v9, %v477_v3  ;;  %v50_v3 = vld [vmem:[%s9691_s2 + $0x100] sm:$0xff] }
  0x94   :  { %v117_v43 = vpop.permute.xlu1 %116 }
  0x95   :  { %v6750_v44 = vpop.permute.xlu0 %411  ;;  %v288_v10 = vmul.f32 %v117_v43, %v60_v63  ;;  %v49_v43 = vld [vmem:[%s9691_s2 + $0xf8] sm:$0xff] }
  0x96   :  { %423 = vperm.xlu1 %6105, %v43_v22   ;;  %v517_v22 = vld [vmem:[%s9693_s1 + $0x28] sm:$0xff] }
  0x99   :  { %v340_v46 = vpop.permute.xlu1 %339  ;;  %v6755_v47 = vpop.permute.xlu0 %427 }
  0x9a   :  { %6106 = vset.pattern.permute.xlu1 %v6579_v5  ;;  %v478_v15 = vadd.f32 %v340_v46, %v288_v10  ;;  %v523_v10 = vld [vmem:[%s9693_s1 + $0x58] sm:$0xff] }
  0x9b   :  { %231 = vperm.xlu1 %6106, %v45_v45  }
  0x9c   :  { %v554_v30 = vadd.f32 %v516_v19, %v478_v15  ;;  %v53_v19 = vld [vmem:[%s9691_s2 + $0x118] sm:$0xff] }
  0x9d   :  { %v344_v49 = vpop.permute.xlu1 %343 }
  0x9e   :  { %v97_v50 = vpop.permute.xlu0 %96 }
  0x9f   :  { %v284_v51 = vmul.f32 %v97_v50, %v56_v48  ;;  %6108 = vset.pattern.permute.xlu1 %v6578_v0 }
  0xa0   :  { %431 = vperm.xlu1 %6108, %v45_v45  }
  0xa1   :  { %v474_v57 = vadd.f32 %v324_v33, %v284_v51 }
  0xa2   :  { %v102_v54 = vpop.permute.xlu0 %101  ;;  %v132_v55 = vpop.permute.xlu1 %131 }
  0xa3   :  { %v285_v58 = vmul.f32 %v102_v54, %v57_v52  ;;  %v550_v7 = vadd.f32 %v512_v60, %v474_v57  ;;  %v291_v26 = vmul.f32 %v132_v55, %v63_v16  ;;  %v520_v55 = vld [vmem:[%s9693_s1 + $0x40] sm:$0xff]  ;;  %v66_v57 = vld [vmem:[%s9692_s0 + $0x50] sm:$0xff] }
  0xa4   :  { %6109 = vset.pattern.permute.xlu1 %v6579_v5 }
  0xa5   :  { %v475_v1 = vadd.f32 %v328_v35, %v285_v58  ;;  %236 = vperm.xlu1 %6109, %v46_v56  }
  0xa6   :  { %v107_v2 = vpop.permute.xlu0 %106 }
  0xa7   :  { %v286_v4 = vmul.f32 %v107_v2, %v58_v59  ;;  %v352_v6 = vpop.permute.xlu1 %351  ;;  %v551_v8 = vadd.f32 %v513_v61, %v475_v1 }
  0xa8   :  { %v481_v33 = vadd.f32 %v352_v6, %v291_v26 }
  0xa9   :  { %v476_v13 = vadd.f32 %v332_v34, %v286_v4  ;;  %6110 = vset.pattern.permute.xlu1 %v6578_v0  ;;  %v1044_v14 = vpack.c.bf16 %v551_v8, %v550_v7  ;;  %v519_v34 = vld [vmem:[%s9693_s1 + $0x38] sm:$0xff]  ;;  %v522_v7 = vld [vmem:[%s9693_s1 + $0x50] sm:$0xff] }
  0xaa   :  { %v122_v17 = vpop.permute.xlu0 %121  ;;  %435 = vperm.xlu1 %6110, %v46_v56   ;;  %v557_v51 = vadd.f32 %v519_v34, %v481_v33  ;;  %v521_v56 = vld [vmem:[%s9693_s1 + $0x48] sm:$0xff]  ;;  %v67_v4 = vld [vmem:[%s9692_s0 + $0x58] sm:$0xff]  ;;  %v54_v34 = vld [vmem:[%s9691_s2 + $0x120] sm:$0xff] }
  0xab   :  { %v552_v20 = vadd.f32 %v514_v11, %v476_v13  ;;  %v289_v21 = vmul.f32 %v122_v17, %v61_v12  ;;  %3117 = vmatpush1.bf16.msra.mxu0 %v1044_v14  ;;  %6062 = vmatpush1.bf16.msra.mxu1 %v1044_v14  ;;  %v6124_v12 = vld [vmem:[%s9694_s3 + $0x4] ss:$12 sps:$4 sm:$0xff]   ;;  %v6127_v13 = vld [vmem:[%s9694_s3 + $0x814] ss:$12 sps:$4 sm:$0xff]   ;;  %v69_v17 = vld [vmem:[%s9692_s0 + $0x68] sm:$0xff] }
  0xac   :  { %v137_v23 = vpop.permute.xlu1 %136  ;;  %3118 = vmatprep.subr.bf16.mxu0 %v6579_v5  ;;  %6047 = vmatprep.subr.bf16.mxu1 %v6579_v5 }
  0xad   :  { %v479_v27 = vadd.f32 %v344_v49, %v289_v21  ;;  %v1045_v28 = vpack.c.bf16 %v553_v18, %v552_v20  ;;  %v292_v49 = vmul.f32 %v137_v23, %v64_v38  ;;  %3148 = vmatprep.mubr.bf16.mxu0 %v6124_v12  ;;  %3836 = vmatprep.mubr.bf16.mxu1 %v6127_v13  ;;  %v68_v18 = vld [vmem:[%s9692_s0 + $0x60] sm:$0xff]  ;;  %v71_v38 = vld [vmem:[%s9692_s0 + $0x78] sm:$0xff] }
  0xae   :  { %v127_v32 = vpop.permute.xlu0 %126  ;;  %439 = vperm.xlu1 %6110, %v6693_v24   ;;  %v65_v24 = vld [vmem:[%s9692_s0 + $0x48] sm:$0xff]  ;;  %v524_v23 = vld [vmem:[%s9693_s1 + $0x60] sm:$0xff] }
  0xaf   :  { %v555_v35 = vadd.f32 %v517_v22, %v479_v27  ;;  %v290_v39 = vmul.f32 %v127_v32, %v62_v25  ;;  %3119 = vmatpush1.bf16.msra.mxu0 %v1045_v28  ;;  %6063 = vmatpush1.bf16.msra.mxu1 %v1045_v28  ;;  %v525_v25 = vld [vmem:[%s9693_s1 + $0x68] sm:$0xff] }
  0xb0   :  { %3120 = vmatprep.subr.bf16.mxu0 %v6579_v5  ;;  %6048 = vmatprep.subr.bf16.mxu1 %v6579_v5 }
  0xb1   :  { %v480_v45 = vadd.f32 %v6736_v36, %v290_v39  ;;  %v356_v46 = vpop.permute.xlu1 %355  ;;  %v1046_v48 = vpack.c.bf16 %v555_v35, %v554_v30  ;;  %v70_v30 = vld [vmem:[%s9692_s0 + $0x70] sm:$0xff] }
  0xb2   :  { %v142_v50 = vpop.permute.xlu0 %141  ;;  %6111 = vset.pattern.permute.xlu1 %v6579_v5  ;;  %v482_v54 = vadd.f32 %v356_v46, %v292_v49  ;;  %v526_v46 = vld [vmem:[%s9693_s1 + $0x70] sm:$0xff]  ;;  %v527_v49 = vld [vmem:[%s9693_s1 + $0x78] sm:$0xff] }
  0xb3   :  { %v556_v52 = vadd.f32 %v518_v41, %v480_v45  ;;  %v293_v53 = vmul.f32 %v142_v50, %v65_v24  ;;  %251 = vperm.xlu1 %6111, %v49_v43   ;;  %3121 = vmatpush1.bf16.msra.mxu0 %v1046_v48 }
  0xb4   :  { %6064 = vmatpush1.bf16.msra.mxu1 %v1046_v48  ;;  %3122 = vmatprep.subr.bf16.mxu0 %v6579_v5  ;;  %v558_v61 = vadd.f32 %v520_v55, %v482_v54  ;;  %v73_v54 = vld [vmem:[%s9692_s0 + $0x88] sm:$0xff]  ;;  %v72_v55 = vld [vmem:[%s9692_s0 + $0x80] sm:$0xff] }
  0xb5   :  { %v360_v36 = vpop.permute.xlu1 %359  ;;  %6049 = vmatprep.subr.bf16.mxu1 %v6579_v5  ;;  %v1047_v58 = vpack.c.bf16 %v557_v51, %v556_v52 }
  0xb6   :  { %v483_v59 = vadd.f32 %v360_v36, %v293_v53  ;;  %v147_v60 = vpop.permute.xlu0 %146 }
  0xb7   :  { %6113 = vset.pattern.permute.xlu1 %v6578_v0  ;;  %3123 = vmatpush1.bf16.msra.mxu0 %v1047_v58  ;;  %v294_v63 = vmul.f32 %v147_v60, %v66_v57 }
  0xb8   :  { %v559_v62 = vadd.f32 %v521_v56, %v483_v59  ;;  %6065 = vmatpush1.bf16.msra.mxu1 %v1047_v58  ;;  %447 = vperm.xlu1 %6113, %v49_v43   ;;  %v528_v59 = vld [vmem:[%s9693_s1 + $0x80] sm:$0xff] }
  0xb9   :  { %3124 = vmatprep.subr.bf16.mxu0 %v6579_v5  ;;  %6050 = vmatprep.subr.bf16.mxu1 %v6579_v5  ;;  %v484_v6 = vadd.f32 %v6739_v37, %v294_v63 }
  0xba   :  { %v152_v1 = vpop.permute.xlu1 %151  ;;  %v1048_v2 = vpack.c.bf16 %v559_v62, %v558_v61  ;;  %v162_v20 = vpop.permute.xlu0 %161  ;;  %v529_v61 = vld [vmem:[%s9693_s1 + $0x88] sm:$0xff] }
  0xbb   :  { %v295_v8 = vmul.f32 %v152_v1, %v67_v4  ;;  %v560_v37 = vadd.f32 %v522_v7, %v484_v6  ;;  %v297_v21 = vmul.f32 %v162_v20, %v69_v17  ;;  %v75_v6 = vld [vmem:[%s9692_s0 + $0x98] sm:$0xff]  ;;  %v76_v17 = vld [vmem:[%s9692_s0 + $0xa0] sm:$0xff] }
  0xbc   :  { %6114 = vset.pattern.permute.xlu1 %v6579_v5  ;;  %3125 = vmatpush1.bf16.msra.mxu0 %v1048_v2 }
  0xbd   :  { %6066 = vmatpush1.bf16.msra.mxu1 %v1048_v2  ;;  %256 = vperm.xlu1 %6114, %v50_v3  }
  0xbe   :  { %3126 = vmatprep.subr.bf16.mxu0 %v6579_v5  ;;  %6051 = vmatprep.subr.bf16.mxu1 %v6579_v5  ;;  %v167_v35 = vpop.permute.xlu0 %166 }
  0xbf   :  { %v368_v9 = vpop.permute.xlu1 %367  ;;  %v298_v39 = vmul.f32 %v167_v35, %v70_v30  ;;  %v79_v35 = vld [vmem:[%s9692_s0 + $0xb8] sm:$0xff] }
  0xc0   :  { %v485_v11 = vadd.f32 %v368_v9, %v295_v8  ;;  %v530_v8 = vld [vmem:[%s9693_s1 + $0x90] sm:$0xff]  ;;  %v531_v9 = vld [vmem:[%s9693_s1 + $0x98] sm:$0xff] }
  0xc1   :  { %6115 = vset.pattern.permute.xlu1 %v6578_v0  ;;  %v488_v43 = vadd.f32 %v6745_v40, %v298_v39  ;;  %v534_v39 = vld [vmem:[%s9693_s1 + $0xb0] sm:$0xff] }
  0xc2   :  { %v561_v14 = vadd.f32 %v523_v10, %v485_v11  ;;  %451 = vperm.xlu1 %6115, %v50_v3  }
  0xc3   :  { %v564_v51 = vadd.f32 %v526_v46, %v488_v43 }
  0xc4   :  { %v157_v15 = vpop.permute.xlu1 %156  ;;  %v1049_v16 = vpack.c.bf16 %v561_v14, %v560_v37 }
  0xc5   :  { %v296_v22 = vmul.f32 %v157_v15, %v68_v18 }
  0xc6   :  { %455 = vperm.xlu1 %6115, %v6715_v29   ;;  %3127 = vmatpush1.bf16.msra.mxu0 %v1049_v16 }
  0xc7   :  { %6067 = vmatpush1.bf16.msra.mxu1 %v1049_v16  ;;  %3128 = vmatprep.subr.bf16.mxu0 %v6579_v5 }
  0xc8   :  { %6052 = vmatprep.subr.bf16.mxu1 %v6579_v5 }
  0xc9   :  { %v372_v29 = vpop.permute.xlu1 %371 }
  0xca   :  { %6116 = vset.pattern.permute.xlu1 %v6579_v5  ;;  %v486_v26 = vadd.f32 %v372_v29, %v296_v22  ;;  %v532_v29 = vld [vmem:[%s9693_s1 + $0xa0] sm:$0xff] }
  0xcb   :  { %271 = vperm.xlu1 %6116, %v53_v19  }
  0xcc   :  { %v562_v32 = vadd.f32 %v524_v23, %v486_v26 }
  0xcd   :  { %v376_v27 = vpop.permute.xlu1 %375 }
  0xce   :  { %v487_v28 = vadd.f32 %v376_v27, %v297_v21  ;;  %v533_v21 = vld [vmem:[%s9693_s1 + $0xa8] sm:$0xff] }
  0xcf   :  { %6118 = vset.pattern.permute.xlu1 %v6578_v0 }
  0xd0   :  { %v563_v33 = vadd.f32 %v525_v25, %v487_v28  ;;  %463 = vperm.xlu1 %6118, %v53_v19   ;;  %v78_v25 = vld [vmem:[%s9692_s0 + $0xb0] sm:$0xff] }
  0xd2   :  { %v172_v41 = vpop.permute.xlu1 %171  ;;  %v1050_v24 = vpack.c.bf16 %v563_v33, %v562_v32 }
  0xd3   :  { %v299_v45 = vmul.f32 %v172_v41, %v71_v38  ;;  %v535_v41 = vld [vmem:[%s9693_s1 + $0xb8] sm:$0xff] }
  0xd4   :  { %6119 = vset.pattern.permute.xlu1 %v6579_v5  ;;  %3129 = vmatpush1.bf16.msra.mxu0 %v1050_v24 }
  0xd5   :  { %6068 = vmatpush1.bf16.msra.mxu1 %v1050_v24  ;;  %276 = vperm.xlu1 %6119, %v54_v34  }
  0xd6   :  { %3130 = vmatprep.subr.bf16.mxu0 %v6579_v5  ;;  %6053 = vmatprep.subr.bf16.mxu1 %v6579_v5 }
  0xd7   :  { %v384_v48 = vpop.permute.xlu1 %383 }
  0xd8   :  { %v489_v50 = vadd.f32 %v384_v48, %v299_v45 }
  0xd9   :  { %6120 = vset.pattern.permute.xlu1 %v6578_v0  ;;  %v182_v0 = vpop.permute.xlu0 %181 }
  0xda   :  { %v565_v52 = vadd.f32 %v527_v49, %v489_v50  ;;  %467 = vperm.xlu1 %6120, %v54_v34   ;;  %v301_v56 = vmul.f32 %v182_v0, %v73_v54  ;;  %v537_v0 = vld [vmem:[%s9693_s1 + $0xc8] sm:$0xff] }
  0xdc   :  { %v177_v40 = vpop.permute.xlu1 %176  ;;  %v1051_v53 = vpack.c.bf16 %v565_v52, %v564_v51  ;;  %v80_v52 = vld [vmem:[%s9692_s0 + $0xc0] sm:$0xff] }
  0xdd   :  { %v300_v57 = vmul.f32 %v177_v40, %v72_v55  ;;  %v187_v2 = vpop.permute.xlu0 %186  ;;  %v536_v55 = vld [vmem:[%s9693_s1 + $0xc0] sm:$0xff] }
  0xde   :  { %471 = vperm.xlu1 %6120, %v6726_v31   ;;  %3131 = vmatpush1.bf16.msra.mxu0 %v1051_v53  ;;  %v74_v31 = vld [vmem:[%s9692_s0 + $0x90] sm:$0xff] }
  0xdf   :  { %6069 = vmatpush1.bf16.msra.mxu1 %v1051_v53  ;;  %3132 = vmatprep.subr.bf16.mxu0 %v6579_v5  ;;  %v302_v3 = vmul.f32 %v187_v2, %v74_v31 }
  0xe0   :  { %6054 = vmatprep.subr.bf16.mxu1 %v6579_v5 }
  0xe1   :  { %v388_v36 = vpop.permute.xlu1 %387  ;;  %v492_v10 = vadd.f32 %v6748_v42, %v302_v3  ;;  %v77_v42 = vld [vmem:[%s9692_s0 + $0xa8] sm:$0xff]  ;;  %v202_v20 = vpop.permute.xlu0 %201  ;;  %v538_v3 = vld [vmem:[%s9693_s1 + $0xd0] sm:$0xff] }
  0xe2   :  { %v490_v58 = vadd.f32 %v388_v36, %v300_v57  ;;  %v305_v22 = vmul.f32 %v202_v20, %v77_v42  ;;  %v82_v57 = vld [vmem:[%s9692_s0 + $0xd0] sm:$0xff]  ;;  %v541_v42 = vld [vmem:[%s9693_s1 + $0xe8] sm:$0xff] }
  0xe3   :  { %v568_v13 = vadd.f32 %v530_v8, %v492_v10 }
  0xe4   :  { %v566_v63 = vadd.f32 %v528_v59, %v490_v58 }
  0xe5   :  { %v392_v60 = vpop.permute.xlu1 %391  ;;  %v207_v32 = vpop.permute.xlu0 %206 }
  0xe6   :  { %v491_v62 = vadd.f32 %v392_v60, %v301_v56  ;;  %v306_v33 = vmul.f32 %v207_v32, %v78_v25 }
  0xe8   :  { %v567_v1 = vadd.f32 %v529_v61, %v491_v62  ;;  %v496_v24 = vadd.f32 %v6750_v44, %v306_v33  ;;  %v81_v44 = vld [vmem:[%s9692_s0 + $0xc8] sm:$0xff]  ;;  %v542_v33 = vld [vmem:[%s9693_s1 + $0xf0] sm:$0xff] }
  0xe9   :  { %v222_v40 = vpop.permute.xlu0 %221 }
  0xea   :  { %v192_v4 = vpop.permute.xlu1 %191  ;;  %v1052_v7 = vpack.c.bf16 %v567_v1, %v566_v63  ;;  %v572_v48 = vadd.f32 %v534_v39, %v496_v24  ;;  %v309_v36 = vmul.f32 %v222_v40, %v81_v44  ;;  %v83_v1 = vld [vmem:[%s9692_s0 + $0xd8] sm:$0xff]  ;;  %v89_v40 = vld [vmem:[%s9692_s0 + $0x108] sm:$0xff] }
  0xeb   :  { %v303_v37 = vmul.f32 %v192_v4, %v75_v6  ;;  %v539_v4 = vld [vmem:[%s9693_s1 + $0xd8] sm:$0xff] }
  0xec   :  { %3133 = vmatpush1.bf16.msra.mxu0 %v1052_v7  ;;  %6070 = vmatpush1.bf16.msra.mxu1 %v1052_v7 }
  0xed   :  { %3134 = vmatprep.subr.bf16.mxu0 %v6579_v5  ;;  %6055 = vmatprep.subr.bf16.mxu1 %v6579_v5  ;;  %v227_v59 = vpop.permute.xlu0 %226 }
  0xee   :  { %v310_v62 = vmul.f32 %v227_v59, %v82_v57  ;;  %v6132_v57 = vld [vmem:[%s9694_s3 + $0x18] ss:$12 sps:$4 sm:$0xff]  }
  0xef   :  { %v400_v11 = vpop.permute.xlu1 %399  ;;  %v6136_v59 = vld [vmem:[%s9694_s3 + $0x844] ss:$12 sps:$4 sm:$0xff]  }
  0xf0   :  { %v493_v12 = vadd.f32 %v400_v11, %v303_v37  ;;  %v500_v6 = vadd.f32 %v6755_v47, %v310_v62  ;;  %v85_v47 = vld [vmem:[%s9692_s0 + $0xe8] sm:$0xff] }
  0xf2   :  { %v569_v14 = vadd.f32 %v531_v9, %v493_v12  ;;  %v576_v10 = vadd.f32 %v538_v3, %v500_v6  ;;  %v91_v3 = vld [vmem:[%s9692_s0 + $0x118] sm:$0xff] }
  0xf4   :  { %v197_v15 = vpop.permute.xlu1 %196  ;;  %v1053_v16 = vpack.c.bf16 %v569_v14, %v568_v13  ;;  %v84_v13 = vld [vmem:[%s9692_s0 + $0xe0] sm:$0xff]  ;;  %v242_v14 = vpop.permute.xlu0 %241 }
  0xf5   :  { %v304_v19 = vmul.f32 %v197_v15, %v76_v17  ;;  %v540_v17 = vld [vmem:[%s9693_s1 + $0xe0] sm:$0xff] }
  0xf6   :  { %3135 = vmatpush1.bf16.msra.mxu0 %v1053_v16  ;;  %6071 = vmatpush1.bf16.msra.mxu1 %v1053_v16 }
  0xf7   :  { %3136 = vmatprep.subr.bf16.mxu0 %v6579_v5  ;;  %6056 = vmatprep.subr.bf16.mxu1 %v6579_v5 }
  0xf8   :  { %v247_v20 = vpop.permute.xlu0 %246 }
  0xf9   :  { %v404_v18 = vpop.permute.xlu1 %403 }
  0xfa   :  { %v494_v23 = vadd.f32 %v404_v18, %v304_v19  ;;  %v313_v18 = vmul.f32 %v242_v14, %v85_v47 }
  0xfc   :  { %v570_v28 = vadd.f32 %v532_v29, %v494_v23  ;;  %v86_v29 = vld [vmem:[%s9692_s0 + $0xf0] sm:$0xff]  ;;  %v444_v32 = vpop.permute.xlu0 %443 }
  0xfd   :  { %v408_v26 = vpop.permute.xlu1 %407 }
  0xfe   :  { %v495_v27 = vadd.f32 %v408_v26, %v305_v22  ;;  %v314_v26 = vmul.f32 %v247_v20, %v86_v29 }
 0x100   :  { %v571_v30 = vadd.f32 %v533_v21, %v495_v27 }
 0x102   :  { %v212_v34 = vpop.permute.xlu1 %211  ;;  %v1054_v38 = vpack.c.bf16 %v571_v30, %v570_v28  ;;  %v87_v28 = vld [vmem:[%s9692_s0 + $0xf8] sm:$0xff] }
 0x103   :  { %v307_v43 = vmul.f32 %v212_v34, %v79_v35  ;;  %v543_v34 = vld [vmem:[%s9693_s1 + $0xf8] sm:$0xff]  ;;  %v504_v35 = vadd.f32 %v444_v32, %v314_v26  ;;  %v548_v32 = vld [vmem:[%s9693_s1 + $0x120] sm:$0xff] }
 0x104   :  { %3137 = vmatpush1.bf16.msra.mxu0 %v1054_v38  ;;  %6072 = vmatpush1.bf16.msra.mxu1 %v1054_v38 }
 0x105   :  { %3138 = vmatprep.subr.bf16.mxu0 %v6579_v5  ;;  %6057 = vmatprep.subr.bf16.mxu1 %v6579_v5  ;;  %v580_v24 = vadd.f32 %v542_v33, %v504_v35  ;;  %v549_v33 = vld [vmem:[%s9693_s1 + $0x128] sm:$0xff]  ;;  %v6151_v35 = vld [vmem:[%s9694_s3 + $0x870] ss:$12 sps:$4 sm:$0xff]  }
 0x107   :  { %v416_v45 = vpop.permute.xlu1 %415 }
 0x108   :  { %v497_v46 = vadd.f32 %v416_v45, %v307_v43  ;;  %v88_v45 = vld [vmem:[%s9692_s0 + $0x100] sm:$0xff] }
 0x10a   :  { %v573_v49 = vadd.f32 %v535_v41, %v497_v46  ;;  %v460_v46 = vpop.permute.xlu0 %459 }
 0x10c   :  { %v217_v50 = vpop.permute.xlu1 %216  ;;  %v1055_v51 = vpack.c.bf16 %v573_v49, %v572_v48  ;;  %v6122_v48 = vld [vmem:[%s9694_s3] ss:$12 sps:$4 sm:$0xff]   ;;  %v6125_v49 = vld [vmem:[%s9694_s3 + $0x810] ss:$12 sps:$4 sm:$0xff]  }
 0x10d   :  { %v308_v54 = vmul.f32 %v217_v50, %v80_v52  ;;  %v6130_v52 = vld [vmem:[%s9694_s3 + $0x82c] ss:$12 sps:$4 sm:$0xff]  }
 0x10e   :  { %3139 = vmatpush1.bf16.msra.mxu0 %v1055_v51  ;;  %6073 = vmatpush1.bf16.msra.mxu1 %v1055_v51  ;;  %v6128_v51 = vld [vmem:[%s9694_s3 + $0x1c] ss:$12 sps:$4 sm:$0xff]  }
 0x10f   :  { %3140 = vmatprep.subr.bf16.mxu0 %v6579_v5  ;;  %6058 = vmatprep.subr.bf16.mxu1 %v6579_v5 }
 0x111   :  { %v420_v53 = vpop.permute.xlu1 %419 }
 0x112   :  { %v498_v56 = vadd.f32 %v420_v53, %v308_v54  ;;  %v262_v53 = vpop.permute.xlu0 %261 }
 0x114   :  { %v574_v60 = vadd.f32 %v536_v55, %v498_v56  ;;  %v317_v55 = vmul.f32 %v262_v53, %v89_v40  ;;  %v545_v56 = vld [vmem:[%s9693_s1 + $0x108] sm:$0xff] }
 0x115   :  { %v424_v58 = vpop.permute.xlu1 %423  ;;  %v6164_v40 = vld [vmem:[%s9694_s3 + $0xac] ss:$12 sps:$4 sm:$0xff]   ;;  %v6168_v53 = vld [vmem:[%s9694_s3 + $0xa8] ss:$12 sps:$4 sm:$0xff]  }
 0x116   :  { %v499_v31 = vadd.f32 %v424_v58, %v309_v36  ;;  %v544_v36 = vld [vmem:[%s9693_s1 + $0x100] sm:$0xff]  ;;  %v6133_v58 = vld [vmem:[%s9694_s3 + $0x828] ss:$12 sps:$4 sm:$0xff]  }
 0x118   :  { %v575_v61 = vadd.f32 %v537_v0, %v499_v31  ;;  %v6134_v31 = vld [vmem:[%s9694_s3 + $0x34] ss:$12 sps:$4 sm:$0xff]  }
 0x11a   :  { %v232_v63 = vpop.permute.xlu1 %231  ;;  %v1056_v2 = vpack.c.bf16 %v575_v61, %v574_v60  ;;  %v90_v60 = vld [vmem:[%s9692_s0 + $0x110] sm:$0xff] }
 0x11b   :  { %v311_v7 = vmul.f32 %v232_v63, %v83_v1  ;;  %v267_v1 = vpop.permute.xlu0 %266 }
 0x11c   :  { %3141 = vmatpush1.bf16.msra.mxu0 %v1056_v2  ;;  %6074 = vmatpush1.bf16.msra.mxu1 %v1056_v2 }
 0x11d   :  { %3142 = vmatprep.subr.bf16.mxu0 %v6579_v5  ;;  %6059 = vmatprep.subr.bf16.mxu1 %v6579_v5 }
 0x11f   :  { %v432_v8 = vpop.permute.xlu1 %431  ;;  %v282_v26 = vpop.permute.xlu0 %281 }
 0x120   :  { %v501_v9 = vadd.f32 %v432_v8, %v311_v7  ;;  %v6138_v8 = vld [vmem:[%s9694_s3 + $0x30] ss:$12 sps:$4 sm:$0xff]  }
 0x122   :  { %v577_v37 = vadd.f32 %v539_v4, %v501_v9  ;;  %v318_v4 = vmul.f32 %v267_v1, %v90_v60  ;;  %v6139_v9 = vld [vmem:[%s9694_s3 + $0x840] ss:$12 sps:$4 sm:$0xff]  }
 0x123   :  { %v6182_v60 = vld [vmem:[%s9694_s3 + $0xf4] ss:$12 sps:$4 sm:$0xff]   ;;  %v6188_v1 = vld [vmem:[%s9694_s3 + $0x10c] ss:$12 sps:$4 sm:$0xff]  }
 0x124   :  { %v237_v11 = vpop.permute.xlu1 %236  ;;  %v1057_v12 = vpack.c.bf16 %v577_v37, %v576_v10  ;;  %v6140_v37 = vld [vmem:[%s9694_s3 + $0x4c] ss:$12 sps:$4 sm:$0xff]   ;;  %v508_v14 = vadd.f32 %v460_v46, %v318_v4 }
 0x125   :  { %v312_v16 = vmul.f32 %v237_v11, %v84_v13  ;;  %v6142_v11 = vld [vmem:[%s9694_s3 + $0x85c] ss:$12 sps:$4 sm:$0xff]   ;;  %v6193_v4 = vld [vmem:[%s9694_s3 + $0x918] ss:$12 sps:$4 sm:$0xff]  }
 0x126   :  { %3143 = vmatpush1.bf16.msra.mxu0 %v1057_v12  ;;  %6075 = vmatpush1.bf16.msra.mxu1 %v1057_v12  ;;  %v546_v12 = vld [vmem:[%s9693_s1 + $0x110] sm:$0xff]  ;;  %v547_v13 = vld [vmem:[%s9693_s1 + $0x118] sm:$0xff] }
 0x127   :  { %3144 = vmatprep.subr.bf16.mxu0 %v6579_v5  ;;  %6060 = vmatprep.subr.bf16.mxu1 %v6579_v5 }
 0x129   :  { %v436_v15 = vpop.permute.xlu1 %435 }
 0x12a   :  { %v502_v19 = vadd.f32 %v436_v15, %v312_v16  ;;  %v584_v16 = vadd.f32 %v546_v12, %v508_v14  ;;  %v6205_v12 = vld [vmem:[%s9694_s3 + $0x948] ss:$12 sps:$4 sm:$0xff]   ;;  %v6208_v14 = vld [vmem:[%s9694_s3 + $0x964] ss:$12 sps:$4 sm:$0xff]  }
 0x12c   :  { %v578_v23 = vadd.f32 %v540_v17, %v502_v19  ;;  %v6145_v19 = vld [vmem:[%s9694_s3 + $0x858] ss:$12 sps:$4 sm:$0xff]  }
 0x12d   :  { %v440_v21 = vpop.permute.xlu1 %439 }
 0x12e   :  { %v503_v22 = vadd.f32 %v440_v21, %v313_v18  ;;  %v6144_v18 = vld [vmem:[%s9694_s3 + $0x48] ss:$12 sps:$4 sm:$0xff]   ;;  %v6146_v21 = vld [vmem:[%s9694_s3 + $0x64] ss:$12 sps:$4 sm:$0xff]  }
 0x130   :  { %v579_v25 = vadd.f32 %v541_v42, %v503_v22  ;;  %v92_v42 = vld [vmem:[%s9692_s0 + $0x120] sm:$0xff] }
 0x131   :  { %v6148_v22 = vld [vmem:[%s9694_s3 + $0x874] ss:$12 sps:$4 sm:$0xff]  }
 0x132   :  { %v252_v27 = vpop.permute.xlu1 %251  ;;  %v1058_v30 = vpack.c.bf16 %v579_v25, %v578_v23  ;;  %v93_v23 = vld [vmem:[%s9692_s0 + $0x128] sm:$0xff] }
 0x133   :  { %v315_v38 = vmul.f32 %v252_v27, %v87_v28  ;;  %v321_v28 = vmul.f32 %v282_v26, %v93_v23  ;;  %v6226_v23 = vld [vmem:[%s9694_s3 + $0x9ac] ss:$12 sps:$4 sm:$0xff]   ;;  %v6229_v26 = vld [vmem:[%s9694_s3 + $0x9a8] ss:$12 sps:$4 sm:$0xff]  }
 0x134   :  { %3145 = vmatpush1.bf16.msra.mxu0 %v1058_v30  ;;  %6076 = vmatpush1.bf16.msra.mxu1 %v1058_v30 }
 0x135   :  { %3146 = vmatprep.subr.bf16.mxu0 %v6579_v5  ;;  %6061 = vmatprep.subr.bf16.mxu1 %v6579_v5 }
 0x137   :  { %v448_v39 = vpop.permute.xlu1 %447 }
 0x138   :  { %v505_v41 = vadd.f32 %v448_v39, %v315_v38  ;;  %v6152_v38 = vld [vmem:[%s9694_s3 + $0x7c] ss:$12 sps:$4 sm:$0xff]   ;;  %v6154_v39 = vld [vmem:[%s9694_s3 + $0x88c] ss:$12 sps:$4 sm:$0xff]  }
 0x13a   :  { %v581_v43 = vadd.f32 %v543_v34, %v505_v41  ;;  %v6150_v34 = vld [vmem:[%s9694_s3 + $0x60] ss:$12 sps:$4 sm:$0xff]  }
 0x13c   :  { %v257_v5 = vpop.permute.xlu1 %256  ;;  %v1059_v50 = vpack.c.bf16 %v581_v43, %v580_v24 }
 0x13d   :  { %v316_v44 = vmul.f32 %v257_v5, %v88_v45  ;;  %v6158_v5 = vld [vmem:[%s9694_s3 + $0x94] ss:$12 sps:$4 sm:$0xff]  }
 0x13e   :  { %3147 = vmatpush1.bf16.msra.mxu0 %v1059_v50  ;;  %6077 = vmatpush1.bf16.msra.mxu1 %v1059_v50  ;;  %v6160_v50 = vld [vmem:[%s9694_s3 + $0x8a4] ss:$12 sps:$4 sm:$0xff]  }
 0x141   :  { %v452_v54 = vpop.permute.xlu1 %451  ;;  %3149 = vmatmul.mubr.bf16.vlgmr.msra.gmra.mrb[0].mxu0 %v6122_v48  ;;  %3837 = vmatmul.mubr.bf16.vlgmr.msra.gmra.mrb[0].mxu1 %v6125_v49  ;;  %v6156_v48 = vld [vmem:[%s9694_s3 + $0x78] ss:$12 sps:$4 sm:$0xff]   ;;  %v6157_v49 = vld [vmem:[%s9694_s3 + $0x888] ss:$12 sps:$4 sm:$0xff]  }
 0x142   :  { %v506_v0 = vadd.f32 %v452_v54, %v316_v44  ;;  %3156 = vmatprep.mubr.bf16.mxu0 %v6128_v51  ;;  %3844 = vmatprep.mubr.bf16.mxu1 %v6130_v52  ;;  %v6162_v51 = vld [vmem:[%s9694_s3 + $0x90] ss:$12 sps:$4 sm:$0xff]   ;;  %v6163_v52 = vld [vmem:[%s9694_s3 + $0x8a0] ss:$12 sps:$4 sm:$0xff]   ;;  %v6169_v54 = vld [vmem:[%s9694_s3 + $0x8b8] ss:$12 sps:$4 sm:$0xff]  }
 0x143   :  { %v6166_v44 = vld [vmem:[%s9694_s3 + $0x8bc] ss:$12 sps:$4 sm:$0xff]  }
 0x144   :  { %v582_v62 = vadd.f32 %v544_v36, %v506_v0  ;;  %v6172_v0 = vld [vmem:[%s9694_s3 + $0x8d4] ss:$12 sps:$4 sm:$0xff]  }
 0x145   :  { %v456_v61 = vpop.permute.xlu1 %455  ;;  %v6174_v36 = vld [vmem:[%s9694_s3 + $0xc0] ss:$12 sps:$4 sm:$0xff]  }
 0x146   :  { %v507_v63 = vadd.f32 %v456_v61, %v317_v55  ;;  %v6170_v55 = vld [vmem:[%s9694_s3 + $0xc4] ss:$12 sps:$4 sm:$0xff]  }
 0x147   :  { %v6184_v61 = vld [vmem:[%s9694_s3 + $0x904] ss:$12 sps:$4 sm:$0xff]  }
 0x148   :  { %v583_v2 = vadd.f32 %v545_v56, %v507_v63  ;;  %v6175_v56 = vld [vmem:[%s9694_s3 + $0x8d0] ss:$12 sps:$4 sm:$0xff]   ;;  %v6187_v63 = vld [vmem:[%s9694_s3 + $0x900] ss:$12 sps:$4 sm:$0xff]  }
 0x149   :  { %3157 = vmatmul.mubr.bf16.gmra.mrb[4].mxu0 %v6132_v57  ;;  %3845 = vmatmul.mubr.bf16.gmra.mrb[4].mxu1 %v6133_v58  ;;  %v6176_v57 = vld [vmem:[%s9694_s3 + $0xdc] ss:$12 sps:$4 sm:$0xff]   ;;  %v6178_v58 = vld [vmem:[%s9694_s3 + $0x8ec] ss:$12 sps:$4 sm:$0xff]  }
 0x14a   :  { %v272_v6 = vpop.permute.xlu1 %271  ;;  %v1060_v7 = vpack.c.bf16 %v583_v2, %v582_v62  ;;  %3164 = vmatprep.mubr.bf16.mxu0 %v6134_v31  ;;  %3852 = vmatprep.mubr.bf16.mxu1 %v6136_v59  ;;  %v6180_v31 = vld [vmem:[%s9694_s3 + $0xd8] ss:$12 sps:$4 sm:$0xff]   ;;  %v6181_v59 = vld [vmem:[%s9694_s3 + $0x8e8] ss:$12 sps:$4 sm:$0xff]   ;;  %v6186_v62 = vld [vmem:[%s9694_s3 + $0xf0] ss:$12 sps:$4 sm:$0xff]  }
 0x14b   :  { %v319_v10 = vmul.f32 %v272_v6, %v91_v3  ;;  %v6190_v2 = vld [vmem:[%s9694_s3 + $0x91c] ss:$12 sps:$4 sm:$0xff]   ;;  %v6194_v6 = vld [vmem:[%s9694_s3 + $0x124] ss:$12 sps:$4 sm:$0xff]  }
 0x14c   :  { %5812 = vmatprep.subr.bf16.mxu1 %v1060_v7  ;;  %v6192_v3 = vld [vmem:[%s9694_s3 + $0x108] ss:$12 sps:$4 sm:$0xff]  }
 0x14d   :  { %5813 = vmatpush3.bf16.msra.mxu1 %v1060_v7  ;;  %v6196_v7 = vld [vmem:[%s9694_s3 + $0x934] ss:$12 sps:$4 sm:$0xff]  }
 0x14f   :  { %v464_v47 = vpop.permute.xlu1 %463 }
 0x150   :  { %v509_v15 = vadd.f32 %v464_v47, %v319_v10  ;;  %v6200_v10 = vld [vmem:[%s9694_s3 + $0x13c] ss:$12 sps:$4 sm:$0xff]  }
 0x151   :  { %3165 = vmatmul.mubr.bf16.gmra.mrb[8].mxu0 %v6138_v8  ;;  %3853 = vmatmul.mubr.bf16.gmra.mrb[8].mxu1 %v6139_v9  ;;  %v6198_v8 = vld [vmem:[%s9694_s3 + $0x120] ss:$12 sps:$4 sm:$0xff]   ;;  %v6199_v9 = vld [vmem:[%s9694_s3 + $0x930] ss:$12 sps:$4 sm:$0xff]  }
 0x152   :  { %v585_v17 = vadd.f32 %v547_v13, %v509_v15  ;;  %3172 = vmatprep.mubr.bf16.mxu0 %v6140_v37  ;;  %3860 = vmatprep.mubr.bf16.mxu1 %v6142_v11  ;;  %v6202_v37 = vld [vmem:[%s9694_s3 + $0x94c] ss:$12 sps:$4 sm:$0xff]   ;;  %v6206_v13 = vld [vmem:[%s9694_s3 + $0x154] ss:$12 sps:$4 sm:$0xff]   ;;  %v6210_v47 = vld [vmem:[%s9694_s3 + $0x150] ss:$12 sps:$4 sm:$0xff]  }
 0x153   :  { %v6204_v11 = vld [vmem:[%s9694_s3 + $0x138] ss:$12 sps:$4 sm:$0xff]   ;;  %v6211_v15 = vld [vmem:[%s9694_s3 + $0x960] ss:$12 sps:$4 sm:$0xff]  }
 0x154   :  { %v277_v20 = vpop.permute.xlu1 %276  ;;  %v1061_v29 = vpack.c.bf16 %v585_v17, %v584_v16  ;;  %v6212_v16 = vld [vmem:[%s9694_s3 + $0x16c] ss:$12 sps:$4 sm:$0xff]   ;;  %v6214_v17 = vld [vmem:[%s9694_s3 + $0x97c] ss:$12 sps:$4 sm:$0xff]  }
 0x155   :  { %v320_v25 = vmul.f32 %v277_v20, %v92_v42  ;;  %v6216_v42 = vld [vmem:[%s9694_s3 + $0x168] ss:$12 sps:$4 sm:$0xff]  }
 0x156   :  { %5814 = vmatprep.subr.bf16.mxu1 %v1061_v29  ;;  %v6220_v20 = vld [vmem:[%s9694_s3 + $0x994] ss:$12 sps:$4 sm:$0xff]  }
 0x157   :  { %5815 = vmatpush3.bf16.msra.mxu1 %v1061_v29  ;;  %v6222_v29 = vld [vmem:[%s9694_s3 + $0x180] ss:$12 sps:$4 sm:$0xff]  }
 0x159   :  { %v468_v27 = vpop.permute.xlu1 %467  ;;  %3173 = vmatmul.mubr.bf16.gmra.mrb[12].mxu0 %v6144_v18  ;;  %3861 = vmatmul.mubr.bf16.gmra.mrb[12].mxu1 %v6145_v19  ;;  %v6217_v18 = vld [vmem:[%s9694_s3 + $0x978] ss:$12 sps:$4 sm:$0xff]  }
 0x15a   :  { %v510_v30 = vadd.f32 %v468_v27, %v320_v25  ;;  %3180 = vmatprep.mubr.bf16.mxu0 %v6146_v21  ;;  %3868 = vmatprep.mubr.bf16.mxu1 %v6148_v22  ;;  %v6218_v19 = vld [vmem:[%s9694_s3 + $0x184] ss:$12 sps:$4 sm:$0xff]   ;;  %v6224_v22 = vld [vmem:[%s9694_s3 + $0x19c] ss:$12 sps:$4 sm:$0xff]   ;;  %v6230_v27 = vld [vmem:[%s9694_s3 + $0x1b4] ss:$12 sps:$4 sm:$0xff]  }
 0x15b   :  { %v6223_v21 = vld [vmem:[%s9694_s3 + $0x990] ss:$12 sps:$4 sm:$0xff]   ;;  %v6228_v25 = vld [vmem:[%s9694_s3 + $0x198] ss:$12 sps:$4 sm:$0xff]  }
 0x15c   :  { %v586_v24 = vadd.f32 %v548_v32, %v510_v30  ;;  %v6234_v30 = vld [vmem:[%s9694_s3 + $0x1b0] ss:$12 sps:$4 sm:$0xff]   ;;  %v6235_v32 = vld [vmem:[%s9694_s3 + $0x9c0] ss:$12 sps:$4 sm:$0xff]  }
 0x15d   :  { %v472_v41 = vpop.permute.xlu1 %471 }
 0x15e   :  { %v511_v43 = vadd.f32 %v472_v41, %v321_v28  ;;  %v6232_v28 = vld [vmem:[%s9694_s3 + $0x9c4] ss:$12 sps:$4 sm:$0xff]   ;;  %v6244_v41 = vld [vmem:[%s9694_s3 + $0x9f4] ss:$12 sps:$4 sm:$0xff]  }
 0x160   :  { %v587_v45 = vadd.f32 %v549_v33, %v511_v43  ;;  %v6236_v33 = vld [vmem:[%s9694_s3 + $0x1cc] ss:$12 sps:$4 sm:$0xff]   ;;  %v6247_v43 = vld [vmem:[%s9694_s3 + $0x9f0] ss:$12 sps:$4 sm:$0xff]  }
 0x161   :  { %3181 = vmatmul.mubr.bf16.gmra.mrb[16].mxu0 %v6150_v34  ;;  %3869 = vmatmul.mubr.bf16.gmra.mrb[16].mxu1 %v6151_v35  ;;  %v6238_v34 = vld [vmem:[%s9694_s3 + $0x9dc] ss:$12 sps:$4 sm:$0xff]  }
 0x162   :  { %v1062_v46 = vpack.c.bf16 %v587_v45, %v586_v24  ;;  %3188 = vmatprep.mubr.bf16.mxu0 %v6152_v38  ;;  %3876 = vmatprep.mubr.bf16.mxu1 %v6154_v39  ;;  %v6240_v35 = vld [vmem:[%s9694_s3 + $0x1c8] ss:$12 sps:$4 sm:$0xff]   ;;  %v6241_v38 = vld [vmem:[%s9694_s3 + $0x9d8] ss:$12 sps:$4 sm:$0xff]   ;;  %v6246_v24 = vld [vmem:[%s9694_s3 + $0x1e0] ss:$12 sps:$4 sm:$0xff]  }
 0x163   :  { %v6242_v39 = vld [vmem:[%s9694_s3 + $0x1e4] ss:$12 sps:$4 sm:$0xff]   ;;  %v6248_v45 = vld [vmem:[%s9694_s3 + $0x1fc] ss:$12 sps:$4 sm:$0xff]  }
 0x164   :  { %5816 = vmatprep.subr.bf16.mxu1 %v1062_v46 }
 0x165   :  { %5817 = vmatpush3.bf16.msra.mxu1 %v1062_v46  ;;  %v6250_v46 = vld [vmem:[%s9694_s3 + $0xa0c] ss:$12 sps:$4 sm:$0xff]  }
 0x169   :  { %3189 = vmatmul.mubr.bf16.gmra.mrb[20].mxu0 %v6156_v48  ;;  %3877 = vmatmul.mubr.bf16.gmra.mrb[20].mxu1 %v6157_v49  ;;  %v6252_v48 = vld [vmem:[%s9694_s3 + $0x1f8] ss:$12 sps:$4 sm:$0xff]   ;;  %v6253_v49 = vld [vmem:[%s9694_s3 + $0xa08] ss:$12 sps:$4 sm:$0xff]  }
 0x16a   :  { %3196 = vmatprep.mubr.bf16.mxu0 %v6158_v5  ;;  %3884 = vmatprep.mubr.bf16.mxu1 %v6160_v50  ;;  %v6254_v5 = vld [vmem:[%s9694_s3 + $0x214] ss:$12 sps:$4 sm:$0xff]   ;;  %v6256_v50 = vld [vmem:[%s9694_s3 + $0xa24] ss:$12 sps:$4 sm:$0xff]  }
 0x171   :  { %3197 = vmatmul.mubr.bf16.gmra.mrb[24].mxu0 %v6162_v51  ;;  %3885 = vmatmul.mubr.bf16.gmra.mrb[24].mxu1 %v6163_v52  ;;  %v6258_v51 = vld [vmem:[%s9694_s3 + $0x210] ss:$12 sps:$4 sm:$0xff]   ;;  %v6259_v52 = vld [vmem:[%s9694_s3 + $0xa20] ss:$12 sps:$4 sm:$0xff]  }
 0x172   :  { %3204 = vmatprep.mubr.bf16.mxu0 %v6164_v40  ;;  %3892 = vmatprep.mubr.bf16.mxu1 %v6166_v44  ;;  %v6260_v40 = vld [vmem:[%s9694_s3 + $0x22c] ss:$12 sps:$4 sm:$0xff]   ;;  %v6262_v44 = vld [vmem:[%s9694_s3 + $0xa3c] ss:$12 sps:$4 sm:$0xff]  }
 0x179   :  { %3205 = vmatmul.mubr.bf16.gmra.mrb[28].mxu0 %v6168_v53  ;;  %3893 = vmatmul.mubr.bf16.gmra.mrb[28].mxu1 %v6169_v54  ;;  %v6264_v53 = vld [vmem:[%s9694_s3 + $0x228] ss:$12 sps:$4 sm:$0xff]   ;;  %v6265_v54 = vld [vmem:[%s9694_s3 + $0xa38] ss:$12 sps:$4 sm:$0xff]  }
 0x17a   :  { %3212 = vmatprep.mubr.bf16.mxu0 %v6170_v55  ;;  %3900 = vmatprep.mubr.bf16.mxu1 %v6172_v0  ;;  %v6266_v55 = vld [vmem:[%s9694_s3 + $0x244] ss:$12 sps:$4 sm:$0xff]   ;;  %v6268_v0 = vld [vmem:[%s9694_s3 + $0xa54] ss:$12 sps:$4 sm:$0xff]  }
 0x181   :  { %3213 = vmatmul.mubr.bf16.gmra.mrb[32].mxu0 %v6174_v36  ;;  %3901 = vmatmul.mubr.bf16.gmra.mrb[32].mxu1 %v6175_v56  ;;  %v6270_v36 = vld [vmem:[%s9694_s3 + $0x240] ss:$12 sps:$4 sm:$0xff]   ;;  %v6271_v56 = vld [vmem:[%s9694_s3 + $0xa50] ss:$12 sps:$4 sm:$0xff]  }
 0x182   :  { %3220 = vmatprep.mubr.bf16.mxu0 %v6176_v57  ;;  %3908 = vmatprep.mubr.bf16.mxu1 %v6178_v58  ;;  %v6272_v57 = vld [vmem:[%s9694_s3 + $0x25c] ss:$12 sps:$4 sm:$0xff]   ;;  %v6274_v58 = vld [vmem:[%s9694_s3 + $0xa6c] ss:$12 sps:$4 sm:$0xff]  }
 0x189   :  { %3221 = vmatmul.mubr.bf16.gmra.mrb[36].mxu0 %v6180_v31  ;;  %3909 = vmatmul.mubr.bf16.gmra.mrb[36].mxu1 %v6181_v59  ;;  %v6276_v31 = vld [vmem:[%s9694_s3 + $0x258] ss:$12 sps:$4 sm:$0xff]   ;;  %v6277_v59 = vld [vmem:[%s9694_s3 + $0xa68] ss:$12 sps:$4 sm:$0xff]  }
 0x18a   :  { %3228 = vmatprep.mubr.bf16.mxu0 %v6182_v60  ;;  %3916 = vmatprep.mubr.bf16.mxu1 %v6184_v61  ;;  %v6278_v60 = vld [vmem:[%s9694_s3 + $0x274] ss:$12 sps:$4 sm:$0xff]   ;;  %v6280_v61 = vld [vmem:[%s9694_s3 + $0xa84] ss:$12 sps:$4 sm:$0xff]  }
 0x191   :  { %3229 = vmatmul.mubr.bf16.gmra.mrb[40].mxu0 %v6186_v62  ;;  %3917 = vmatmul.mubr.bf16.gmra.mrb[40].mxu1 %v6187_v63  ;;  %v6282_v62 = vld [vmem:[%s9694_s3 + $0x270] ss:$12 sps:$4 sm:$0xff]   ;;  %v6283_v63 = vld [vmem:[%s9694_s3 + $0xa80] ss:$12 sps:$4 sm:$0xff]  }
 0x192   :  { %3236 = vmatprep.mubr.bf16.mxu0 %v6188_v1  ;;  %3924 = vmatprep.mubr.bf16.mxu1 %v6190_v2  ;;  %v6284_v1 = vld [vmem:[%s9694_s3 + $0x28c] ss:$12 sps:$4 sm:$0xff]   ;;  %v6286_v2 = vld [vmem:[%s9694_s3 + $0xa9c] ss:$12 sps:$4 sm:$0xff]  }
 0x199   :  { %3237 = vmatmul.mubr.bf16.gmra.mrb[44].mxu0 %v6192_v3  ;;  %3925 = vmatmul.mubr.bf16.gmra.mrb[44].mxu1 %v6193_v4 }
 0x19a   :  { %3244 = vmatprep.mubr.bf16.mxu0 %v6194_v6  ;;  %3932 = vmatprep.mubr.bf16.mxu1 %v6196_v7  ;;  %v6288_v7 = vld [vmem:[%s9694_s3 + $0x288] ss:$12 sps:$4 sm:$0xff]  }
 0x1a1   :  { %3245 = vmatmul.mubr.bf16.gmra.mrb[48].mxu0 %v6198_v8  ;;  %3933 = vmatmul.mubr.bf16.gmra.mrb[48].mxu1 %v6199_v9  ;;  %v6289_v8 = vld [vmem:[%s9694_s3 + $0xa98] ss:$12 sps:$4 sm:$0xff]  }
 0x1a2   :  { %3252 = vmatprep.mubr.bf16.mxu0 %v6200_v10  ;;  %3940 = vmatprep.mubr.bf16.mxu1 %v6202_v37 }
 0x1a9   :  { %3253 = vmatmul.mubr.bf16.gmra.mrb[52].mxu0 %v6204_v11  ;;  %3941 = vmatmul.mubr.bf16.gmra.mrb[52].mxu1 %v6205_v12  ;;  %v6290_v11 = vld [vmem:[%s9694_s3 + $0x2a4] ss:$12 sps:$4 sm:$0xff]   ;;  %v6292_v12 = vld [vmem:[%s9694_s3 + $0x8] ss:$12 sps:$4 sm:$0xff]  }
 0x1aa   :  { %3260 = vmatprep.mubr.bf16.mxu0 %v6206_v13  ;;  %3948 = vmatprep.mubr.bf16.mxu1 %v6208_v14 }
 0x1b1   :  { %3261 = vmatmul.mubr.bf16.gmra.mrb[56].mxu0 %v6210_v47  ;;  %3949 = vmatmul.mubr.bf16.gmra.mrb[56].mxu1 %v6211_v15 }
 0x1b2   :  { %3268 = vmatprep.mubr.bf16.mxu0 %v6212_v16  ;;  %3956 = vmatprep.mubr.bf16.mxu1 %v6214_v17  ;;  %v6293_v17 = vld [vmem:[%s9694_s3 + $0x2a0] ss:$12 sps:$4 sm:$0xff]  }
 0x1b9   :  { %3269 = vmatmul.mubr.bf16.gmra.mrb[60].mxu0 %v6216_v42  ;;  %3957 = vmatmul.mubr.bf16.gmra.mrb[60].mxu1 %v6217_v18  ;;  %v6294_v42 = vld [vmem:[%s9694_s3 + $0x20] ss:$12 sps:$4 sm:$0xff]  }
 0x1ba   :  { %3276 = vmatprep.mubr.bf16.mxu0 %v6218_v19  ;;  %3964 = vmatprep.mubr.bf16.mxu1 %v6220_v20 }
 0x1c1   :  { %3277 = vmatmul.mubr.bf16.gmra.mrb[64].mxu0 %v6222_v29  ;;  %3965 = vmatmul.mubr.bf16.gmra.mrb[64].mxu1 %v6223_v21  ;;  %v6295_v29 = vld [vmem:[%s9694_s3 + $0x2bc] ss:$12 sps:$4 sm:$0xff]   ;;  %v6297_v21 = vld [vmem:[%s9694_s3 + $0x38] ss:$12 sps:$4 sm:$0xff]  }
 0x1c2   :  { %3284 = vmatprep.mubr.bf16.mxu0 %v6224_v22  ;;  %3972 = vmatprep.mubr.bf16.mxu1 %v6226_v23 }
 0x1c9   :  { %3285 = vmatmul.mubr.bf16.gmra.mrb[68].mxu0 %v6228_v25  ;;  %3973 = vmatmul.mubr.bf16.gmra.mrb[68].mxu1 %v6229_v26 }
 0x1ca   :  { %3292 = vmatprep.mubr.bf16.mxu0 %v6230_v27  ;;  %3980 = vmatprep.mubr.bf16.mxu1 %v6232_v28  ;;  %v6298_v28 = vld [vmem:[%s9694_s3 + $0x2b8] ss:$12 sps:$4 sm:$0xff]  }
 0x1d1   :  { %3293 = vmatmul.mubr.bf16.gmra.mrb[72].mxu0 %v6234_v30  ;;  %3981 = vmatmul.mubr.bf16.gmra.mrb[72].mxu1 %v6235_v32  ;;  %v6299_v30 = vld [vmem:[%s9694_s3 + $0x50] ss:$12 sps:$4 sm:$0xff]  }
 0x1d2   :  { %3300 = vmatprep.mubr.bf16.mxu0 %v6236_v33  ;;  %3988 = vmatprep.mubr.bf16.mxu1 %v6238_v34 }
 0x1d9   :  { %3301 = vmatmul.mubr.bf16.gmra.mrb[76].mxu0 %v6240_v35  ;;  %3989 = vmatmul.mubr.bf16.gmra.mrb[76].mxu1 %v6241_v38  ;;  %v6300_v35 = vld [vmem:[%s9694_s3 + $0x2d4] ss:$12 sps:$4 sm:$0xff]  }
 0x1da   :  { %3308 = vmatprep.mubr.bf16.mxu0 %v6242_v39  ;;  %3996 = vmatprep.mubr.bf16.mxu1 %v6244_v41  ;;  %v6302_v38 = vld [vmem:[%s9694_s3 + $0x68] ss:$12 sps:$4 sm:$0xff]  }
 0x1e1   :  { %3309 = vmatmul.mubr.bf16.gmra.mrb[80].mxu0 %v6246_v24  ;;  %3997 = vmatmul.mubr.bf16.gmra.mrb[80].mxu1 %v6247_v43 }
 0x1e2   :  { %3316 = vmatprep.mubr.bf16.mxu0 %v6248_v45  ;;  %4004 = vmatprep.mubr.bf16.mxu1 %v6250_v46  ;;  %v6303_v46 = vld [vmem:[%s9694_s3 + $0x2d0] ss:$12 sps:$4 sm:$0xff]  }
 0x1e9   :  { %3317 = vmatmul.mubr.bf16.gmra.mrb[84].mxu0 %v6252_v48  ;;  %4005 = vmatmul.mubr.bf16.gmra.mrb[84].mxu1 %v6253_v49  ;;  %v6304_v48 = vld [vmem:[%s9694_s3 + $0x80] ss:$12 sps:$4 sm:$0xff]  }
 0x1ea   :  { %3324 = vmatprep.mubr.bf16.mxu0 %v6254_v5  ;;  %4012 = vmatprep.mubr.bf16.mxu1 %v6256_v50 }
 0x1f1   :  { %3325 = vmatmul.mubr.bf16.gmra.mrb[88].mxu0 %v6258_v51  ;;  %4013 = vmatmul.mubr.bf16.gmra.mrb[88].mxu1 %v6259_v52  ;;  %v6305_v51 = vld [vmem:[%s9694_s3 + $0x2ec] ss:$12 sps:$4 sm:$0xff]  }
 0x1f2   :  { %3332 = vmatprep.mubr.bf16.mxu0 %v6260_v40  ;;  %4020 = vmatprep.mubr.bf16.mxu1 %v6262_v44  ;;  %v6307_v52 = vld [vmem:[%s9694_s3 + $0x98] ss:$12 sps:$4 sm:$0xff]  }
 0x1f9   :  { %3333 = vmatmul.mubr.bf16.gmra.mrb[92].mxu0 %v6264_v53  ;;  %4021 = vmatmul.mubr.bf16.gmra.mrb[92].mxu1 %v6265_v54 }
 0x1fa   :  { %3340 = vmatprep.mubr.bf16.mxu0 %v6266_v55  ;;  %4028 = vmatprep.mubr.bf16.mxu1 %v6268_v0  ;;  %v6308_v0 = vld [vmem:[%s9694_s3 + $0x2e8] ss:$12 sps:$4 sm:$0xff]  }
 0x201   :  { %3341 = vmatmul.mubr.bf16.gmra.mrb[96].mxu0 %v6270_v36  ;;  %4029 = vmatmul.mubr.bf16.gmra.mrb[96].mxu1 %v6271_v56  ;;  %v6309_v36 = vld [vmem:[%s9694_s3 + $0xb0] ss:$12 sps:$4 sm:$0xff]  }
 0x202   :  { %3348 = vmatprep.mubr.bf16.mxu0 %v6272_v57  ;;  %4036 = vmatprep.mubr.bf16.mxu1 %v6274_v58 }
 0x209   :  { %3349 = vmatmul.mubr.bf16.gmra.mrb[100].mxu0 %v6276_v31  ;;  %4037 = vmatmul.mubr.bf16.gmra.mrb[100].mxu1 %v6277_v59  ;;  %v6310_v31 = vld [vmem:[%s9694_s3 + $0x304] ss:$12 sps:$4 sm:$0xff]   ;;  %v6312_v59 = vld [vmem:[%s9694_s3 + $0xc8] ss:$12 sps:$4 sm:$0xff]  }
 0x20a   :  { %3356 = vmatprep.mubr.bf16.mxu0 %v6278_v60  ;;  %4044 = vmatprep.mubr.bf16.mxu1 %v6280_v61 }
 0x211   :  { %3357 = vmatmul.mubr.bf16.gmra.mrb[104].mxu0 %v6282_v62  ;;  %4045 = vmatmul.mubr.bf16.gmra.mrb[104].mxu1 %v6283_v63 }
 0x212   :  { %3364 = vmatprep.mubr.bf16.mxu0 %v6284_v1  ;;  %4052 = vmatprep.mubr.bf16.mxu1 %v6286_v2  ;;  %v6313_v2 = vld [vmem:[%s9694_s3 + $0x300] ss:$12 sps:$4 sm:$0xff]  }
 0x214   :  { %v7381_v3 = vpop.f32.mrb[0].mxu0  ;;  %v7383_v4 = vpop.f32.mrb[0].mxu1 }
 0x215   :  { %9696 = vst [vmem:[#allocation2_spill] sm:$0xff] %v7383_v4  ;;  %v3152_v6 = vpop.f32.mrb[1].mxu0  ;;  %v3840_v9 = vpop.f32.mrb[1].mxu1 }
 0x216   :  { %v7391_v10 = vpop.f32.mrb[2].mxu0  ;;  %v7393_v37 = vpop.f32.mrb[2].mxu1  ;;  %v6314_v6 = vld [vmem:[%s9694_s3 + $0xe0] ss:$12 sps:$4 sm:$0xff]  }
 0x217   :  { %9697 = vst [vmem:[#allocation3_spill] sm:$0xff] %v7393_v37  ;;  %v3155_v13 = vpop.f32.mrb[3].mxu0  ;;  %v3843_v14 = vpop.f32.mrb[3].mxu1 }
 0x219   :  { %3365 = vmatmul.mubr.bf16.gmra.mrb[108].mxu0 %v6288_v7  ;;  %4053 = vmatmul.mubr.bf16.gmra.mrb[108].mxu1 %v6289_v8 }
 0x21a   :  { %3372 = vmatprep.mubr.bf16.mxu0 %v6290_v11  ;;  %5818 = vmatprep.mubr.msk.bf16.mxu1 %vm2773_vm0, %v6292_v12  ;;  %v6315_v11 = vld [vmem:[%s9694_s3 + $0x31c] ss:$12 sps:$4 sm:$0xff]   ;;  %v6317_v12 = vld [vmem:[%s9694_s3 + $0xf8] ss:$12 sps:$4 sm:$0xff]  }
 0x21c   :  { %v7402_v47 = vpop.f32.mrb[4].mxu0  ;;  %v7404_v15 = vpop.f32.mrb[4].mxu1 }
 0x21d   :  { %9698 = vst [vmem:[#allocation4_spill] sm:$0xff] %v7404_v15  ;;  %v3160_v16 = vpop.f32.mrb[5].mxu0  ;;  %v3848_v18 = vpop.f32.mrb[5].mxu1  ;;  %v6423_v15 = vld [vmem:[%s9694_s3 + $0x510] ss:$12 sps:$4 sm:$0xff]  }
 0x21e   :  { %v7412_v19 = vpop.f32.mrb[6].mxu0  ;;  %v7414_v20 = vpop.f32.mrb[6].mxu1  ;;  %v6318_v18 = vld [vmem:[%s9694_s3 + $0x318] ss:$12 sps:$4 sm:$0xff]  }
 0x21f   :  { %9699 = vst [vmem:[#allocation5_spill] sm:$0xff] %v7414_v20  ;;  %v3163_v22 = vpop.f32.mrb[7].mxu0  ;;  %v3851_v23 = vpop.f32.mrb[7].mxu1  ;;  %v6418_v20 = vld [vmem:[%s9694_s3 + $0x4f8] ss:$12 sps:$4 sm:$0xff]  }
 0x221   :  { %3373 = vmatmul.mubr.bf16.gmra.mrb[112].mxu0 %v6293_v17  ;;  %5819 = vmatmul.mubr.msk.bf16.vlgmr.msra.gmra.mrb[112].mxu1 %vm2773_vm0, %v6294_v42 }
 0x222   :  { %3380 = vmatprep.mubr.bf16.mxu0 %v6295_v29  ;;  %5822 = vmatprep.mubr.msk.bf16.mxu1 %vm2773_vm0, %v6297_v21  ;;  %v6319_v29 = vld [vmem:[%s9694_s3 + $0x110] ss:$12 sps:$4 sm:$0xff]  }
 0x224   :  { %v7424_v25 = vpop.f32.mrb[8].mxu0  ;;  %v7426_v26 = vpop.f32.mrb[8].mxu1 }
 0x225   :  { %9700 = vst [vmem:[#allocation6_spill] sm:$0xff] %v7426_v26  ;;  %v3168_v27 = vpop.f32.mrb[9].mxu0  ;;  %v3856_v32 = vpop.f32.mrb[9].mxu1 }
 0x226   :  { %v7434_v33 = vpop.f32.mrb[10].mxu0  ;;  %v7436_v34 = vpop.f32.mrb[10].mxu1  ;;  %v6320_v27 = vld [vmem:[%s9694_s3 + $0x334] ss:$12 sps:$4 sm:$0xff]  }
 0x227   :  { %9701 = vst [vmem:[#allocation7_spill] sm:$0xff] %v7436_v34  ;;  %v3171_v39 = vpop.f32.mrb[11].mxu0  ;;  %v3859_v41 = vpop.f32.mrb[11].mxu1 }
 0x228   :  { %v6323_v41 = vld [vmem:[%s9694_s3 + $0x330] ss:$12 sps:$4 sm:$0xff]  }
 0x229   :  { %3381 = vmatmul.mubr.bf16.gmra.mrb[116].mxu0 %v6298_v28  ;;  %5823 = vmatmul.mubr.msk.bf16.gmra.mrb[116].mxu1 %vm2773_vm0, %v6299_v30  ;;  %v6322_v28 = vld [vmem:[%s9694_s3 + $0x128] ss:$12 sps:$4 sm:$0xff]  }
 0x22a   :  { %3388 = vmatprep.mubr.bf16.mxu0 %v6300_v35  ;;  %5826 = vmatprep.mubr.msk.bf16.mxu1 %vm2773_vm0, %v6302_v38 }
 0x22c   :  { %v7446_v24 = vpop.f32.mrb[12].mxu0  ;;  %v7448_v43 = vpop.f32.mrb[12].mxu1 }
 0x22d   :  { %9702 = vst [vmem:[#allocation8_spill] sm:$0xff] %v7448_v43  ;;  %v3176_v45 = vpop.f32.mrb[13].mxu0  ;;  %v3864_v49 = vpop.f32.mrb[13].mxu1  ;;  %v6413_v43 = vld [vmem:[%s9694_s3 + $0x4e0] ss:$12 sps:$4 sm:$0xff]  }
 0x22e   :  { %v7456_v5 = vpop.f32.mrb[14].mxu0  ;;  %v7458_v50 = vpop.f32.mrb[14].mxu1  ;;  %v6324_v45 = vld [vmem:[%s9694_s3 + $0x140] ss:$12 sps:$4 sm:$0xff]  }
 0x22f   :  { %9703 = vst [vmem:[#allocation9_spill] sm:$0xff] %v7458_v50  ;;  %v3179_v40 = vpop.f32.mrb[15].mxu0  ;;  %v3867_v44 = vpop.f32.mrb[15].mxu1  ;;  %v6408_v50 = vld [vmem:[%s9694_s3 + $0x4c8] ss:$12 sps:$4 sm:$0xff]  }
 0x231   :  { %3389 = vmatmul.mubr.bf16.gmra.mrb[120].mxu0 %v6303_v46  ;;  %5827 = vmatmul.mubr.msk.bf16.gmra.mrb[120].mxu1 %vm2773_vm0, %v6304_v48 }
 0x232   :  { %3396 = vmatprep.mubr.bf16.mxu0 %v6305_v51  ;;  %5830 = vmatprep.mubr.msk.bf16.mxu1 %vm2773_vm0, %v6307_v52  ;;  %v6325_v51 = vld [vmem:[%s9694_s3 + $0x34c] ss:$12 sps:$4 sm:$0xff]  }
 0x233   :  { %v6327_v52 = vld [vmem:[%s9694_s3 + $0x158] ss:$12 sps:$4 sm:$0xff]  }
 0x234   :  { %v7468_v53 = vpop.f32.mrb[16].mxu0  ;;  %v7470_v54 = vpop.f32.mrb[16].mxu1 }
 0x235   :  { %9704 = vst [vmem:[#allocation10_spill] sm:$0xff] %v7470_v54  ;;  %v3184_v55 = vpop.f32.mrb[17].mxu0  ;;  %v3872_v56 = vpop.f32.mrb[17].mxu1 }
 0x236   :  { %v7478_v57 = vpop.f32.mrb[18].mxu0  ;;  %v7480_v58 = vpop.f32.mrb[18].mxu1  ;;  %v6328_v56 = vld [vmem:[%s9694_s3 + $0x348] ss:$12 sps:$4 sm:$0xff]  }
 0x237   :  { %9705 = vst [vmem:[#allocation11_spill] sm:$0xff] %v7480_v58  ;;  %v3187_v60 = vpop.f32.mrb[19].mxu0  ;;  %v3875_v61 = vpop.f32.mrb[19].mxu1 }
 0x239   :  { %3397 = vmatmul.mubr.bf16.gmra.mrb[124].mxu0 %v6308_v0  ;;  %5831 = vmatmul.mubr.msk.bf16.gmra.mrb[124].mxu1 %vm2773_vm0, %v6309_v36 }
 0x23a   :  { %3404 = vmatprep.mubr.bf16.mxu0 %v6310_v31  ;;  %5834 = vmatprep.mubr.msk.bf16.mxu1 %vm2773_vm0, %v6312_v59  ;;  %v6329_v31 = vld [vmem:[%s9694_s3 + $0x170] ss:$12 sps:$4 sm:$0xff]  }
 0x23c   :  { %v7490_v62 = vpop.f32.mrb[20].mxu0  ;;  %v7492_v63 = vpop.f32.mrb[20].mxu1 }
 0x23d   :  { %9706 = vst [vmem:[#allocation12_spill] sm:$0xff] %v7492_v63  ;;  %v3192_v1 = vpop.f32.mrb[21].mxu0  ;;  %v3880_v7 = vpop.f32.mrb[21].mxu1  ;;  %v6403_v63 = vld [vmem:[%s9694_s3 + $0x4b0] ss:$12 sps:$4 sm:$0xff]  }
 0x23e   :  { %v7500_v8 = vpop.f32.mrb[22].mxu0  ;;  %v7502_v9 = vpop.f32.mrb[22].mxu1  ;;  %v6330_v1 = vld [vmem:[%s9694_s3 + $0x364] ss:$12 sps:$4 sm:$0xff]  }
 0x23f   :  { %9707 = vst [vmem:[#allocation13_spill] sm:$0xff] %v7502_v9  ;;  %v3195_v13 = vpop.f32.mrb[23].mxu0  ;;  %v3883_v14 = vpop.f32.mrb[23].mxu1  ;;  %v6398_v9 = vld [vmem:[%s9694_s3 + $0x498] ss:$12 sps:$4 sm:$0xff]  }
 0x240   :  { %v6333_v14 = vld [vmem:[%s9694_s3 + $0x360] ss:$12 sps:$4 sm:$0xff]  }
 0x241   :  { %3405 = vmatmul.mubr.bf16.gmra.mrb[128].mxu0 %v6313_v2  ;;  %5835 = vmatmul.mubr.msk.bf16.gmra.mrb[128].mxu1 %vm2773_vm0, %v6314_v6  ;;  %v6332_v2 = vld [vmem:[%s9694_s3 + $0x188] ss:$12 sps:$4 sm:$0xff]  }
 0x242   :  { %3412 = vmatprep.mubr.bf16.mxu0 %v6315_v11  ;;  %5838 = vmatprep.mubr.msk.bf16.mxu1 %vm2773_vm0, %v6317_v12 }
 0x244   :  { %v7512_v16 = vpop.f32.mrb[24].mxu0  ;;  %v7514_v17 = vpop.f32.mrb[24].mxu1 }
 0x245   :  { %9708 = vst [vmem:[#allocation14_spill] sm:$0xff] %v7514_v17  ;;  %v3200_v42 = vpop.f32.mrb[25].mxu0  ;;  %v3888_v21 = vpop.f32.mrb[25].mxu1 }
 0x246   :  { %v7522_v22 = vpop.f32.mrb[26].mxu0  ;;  %v7524_v23 = vpop.f32.mrb[26].mxu1  ;;  %v6334_v42 = vld [vmem:[%s9694_s3 + $0x1a0] ss:$12 sps:$4 sm:$0xff]  }
 0x247   :  { %9709 = vst [vmem:[#allocation15_spill] sm:$0xff] %v7524_v23  ;;  %v3203_v30 = vpop.f32.mrb[27].mxu0  ;;  %v3891_v32 = vpop.f32.mrb[27].mxu1 }
 0x249   :  { %3413 = vmatmul.mubr.bf16.gmra.mrb[132].mxu0 %v6318_v18  ;;  %5839 = vmatmul.mubr.msk.bf16.gmra.mrb[132].mxu1 %vm2773_vm0, %v6319_v29 }
 0x24a   :  { %3420 = vmatprep.mubr.bf16.mxu0 %v6320_v27  ;;  %5842 = vmatprep.mubr.msk.bf16.mxu1 %vm2773_vm0, %v6322_v28  ;;  %v6335_v27 = vld [vmem:[%s9694_s3 + $0x37c] ss:$12 sps:$4 sm:$0xff]   ;;  %v6337_v28 = vld [vmem:[%s9694_s3 + $0x1b8] ss:$12 sps:$4 sm:$0xff]  }
 0x24c   :  { %v7534_v35 = vpop.f32.mrb[28].mxu0  ;;  %v7536_v38 = vpop.f32.mrb[28].mxu1 }
 0x24d   :  { %9710 = vst [vmem:[#allocation16_spill] sm:$0xff] %v7536_v38  ;;  %v3208_v39 = vpop.f32.mrb[29].mxu0  ;;  %v3896_v46 = vpop.f32.mrb[29].mxu1  ;;  %v6393_v38 = vld [vmem:[%s9694_s3 + $0x480] ss:$12 sps:$4 sm:$0xff]  }
 0x24e   :  { %v7544_v48 = vpop.f32.mrb[30].mxu0  ;;  %v7546_v49 = vpop.f32.mrb[30].mxu1  ;;  %v6338_v46 = vld [vmem:[%s9694_s3 + $0x378] ss:$12 sps:$4 sm:$0xff]  }
 0x24f   :  { %9711 = vst [vmem:[#allocation17_spill] sm:$0xff] %v7546_v49  ;;  %v3211_v40 = vpop.f32.mrb[31].mxu0  ;;  %v3899_v44 = vpop.f32.mrb[31].mxu1  ;;  %v6388_v49 = vld [vmem:[%s9694_s3 + $0x468] ss:$12 sps:$4 sm:$0xff]  }
 0x251   :  { %3421 = vmatmul.mubr.bf16.gmra.mrb[136].mxu0 %v6323_v41  ;;  %5843 = vmatmul.mubr.msk.bf16.gmra.mrb[136].mxu1 %vm2773_vm0, %v6324_v45 }
 0x252   :  { %3428 = vmatprep.mubr.bf16.mxu0 %v6325_v51  ;;  %5846 = vmatprep.mubr.msk.bf16.mxu1 %vm2773_vm0, %v6327_v52  ;;  %v6339_v51 = vld [vmem:[%s9694_s3 + $0x1d0] ss:$12 sps:$4 sm:$0xff]  }
 0x254   :  { %v7556_v55 = vpop.f32.mrb[32].mxu0  ;;  %v7558_v0 = vpop.f32.mrb[32].mxu1 }
 0x255   :  { %9712 = vst [vmem:[#allocation18_spill] sm:$0xff] %v7558_v0  ;;  %v3216_v36 = vpop.f32.mrb[33].mxu0  ;;  %v3904_v59 = vpop.f32.mrb[33].mxu1 }
 0x256   :  { %v7566_v60 = vpop.f32.mrb[34].mxu0  ;;  %v7568_v61 = vpop.f32.mrb[34].mxu1  ;;  %v6340_v36 = vld [vmem:[%s9694_s3 + $0x394] ss:$12 sps:$4 sm:$0xff]  }
 0x257   :  { %9713 = vst [vmem:[#allocation19_spill] sm:$0xff] %v7568_v61  ;;  %v3219_v6 = vpop.f32.mrb[35].mxu0  ;;  %v3907_v7 = vpop.f32.mrb[35].mxu1 }
 0x258   :  { %v6343_v7 = vld [vmem:[%s9694_s3 + $0x390] ss:$12 sps:$4 sm:$0xff]  }
 0x259   :  { %3429 = vmatmul.mubr.bf16.gmra.mrb[140].mxu0 %v6328_v56  ;;  %5847 = vmatmul.mubr.msk.bf16.gmra.mrb[140].mxu1 %vm2773_vm0, %v6329_v31  ;;  %v6342_v56 = vld [vmem:[%s9694_s3 + $0x1e8] ss:$12 sps:$4 sm:$0xff]  }
 0x25a   :  { %3436 = vmatprep.mubr.bf16.mxu0 %v6330_v1  ;;  %5850 = vmatprep.mubr.msk.bf16.mxu1 %vm2773_vm0, %v6332_v2 }
 0x25c   :  { %v7578_v11 = vpop.f32.mrb[36].mxu0  ;;  %v7580_v12 = vpop.f32.mrb[36].mxu1 }
 0x25d   :  { %9714 = vst [vmem:[#allocation20_spill] sm:$0xff] %v7580_v12  ;;  %v3224_v13 = vpop.f32.mrb[37].mxu0  ;;  %v3912_v18 = vpop.f32.mrb[37].mxu1  ;;  %v6383_v12 = vld [vmem:[%s9694_s3 + $0x450] ss:$12 sps:$4 sm:$0xff]  }
 0x25e   :  { %v7588_v29 = vpop.f32.mrb[38].mxu0  ;;  %v7590_v21 = vpop.f32.mrb[38].mxu1  ;;  %v6344_v13 = vld [vmem:[%s9694_s3 + $0x200] ss:$12 sps:$4 sm:$0xff]  }
 0x25f   :  { %9715 = vst [vmem:[#allocation21_spill] sm:$0xff] %v7590_v21  ;;  %v3227_v30 = vpop.f32.mrb[39].mxu0  ;;  %v3915_v32 = vpop.f32.mrb[39].mxu1  ;;  %v6378_v21 = vld [vmem:[%s9694_s3 + $0x438] ss:$12 sps:$4 sm:$0xff]  }
 0x261   :  { %3437 = vmatmul.mubr.bf16.gmra.mrb[144].mxu0 %v6333_v14  ;;  %5851 = vmatmul.mubr.msk.bf16.gmra.mrb[144].mxu1 %vm2773_vm0, %v6334_v42 }
 0x262   :  { %3444 = vmatprep.mubr.bf16.mxu0 %v6335_v27  ;;  %5854 = vmatprep.mubr.msk.bf16.mxu1 %vm2773_vm0, %v6337_v28  ;;  %v6345_v27 = vld [vmem:[%s9694_s3 + $0x3ac] ss:$12 sps:$4 sm:$0xff]  }
 0x263   :  { %v6347_v28 = vld [vmem:[%s9694_s3 + $0x218] ss:$12 sps:$4 sm:$0xff]  }
 0x264   :  { %v7600_v39 = vpop.f32.mrb[40].mxu0  ;;  %v7602_v41 = vpop.f32.mrb[40].mxu1 }
 0x265   :  { %9716 = vst [vmem:[#allocation22_spill] sm:$0xff] %v7602_v41  ;;  %v3232_v45 = vpop.f32.mrb[41].mxu0  ;;  %v3920_v52 = vpop.f32.mrb[41].mxu1 }
 0x266   :  { %v7610_v40 = vpop.f32.mrb[42].mxu0  ;;  %v7612_v44 = vpop.f32.mrb[42].mxu1  ;;  %v6348_v52 = vld [vmem:[%s9694_s3 + $0x3a8] ss:$12 sps:$4 sm:$0xff]  }
 0x267   :  { %9717 = vst [vmem:[#allocation23_spill] sm:$0xff] %v7612_v44  ;;  %v3235_v31 = vpop.f32.mrb[43].mxu0  ;;  %v3923_v59 = vpop.f32.mrb[43].mxu1 }
 0x269   :  { %3445 = vmatmul.mubr.bf16.gmra.mrb[148].mxu0 %v6338_v46  ;;  %5855 = vmatmul.mubr.msk.bf16.gmra.mrb[148].mxu1 %vm2773_vm0, %v6339_v51 }
 0x26a   :  { %3452 = vmatprep.mubr.bf16.mxu0 %v6340_v36  ;;  %5858 = vmatprep.mubr.msk.bf16.mxu1 %vm2773_vm0, %v6342_v56  ;;  %v6349_v36 = vld [vmem:[%s9694_s3 + $0x230] ss:$12 sps:$4 sm:$0xff]  }
 0x26c   :  { %v7622_v1 = vpop.f32.mrb[44].mxu0  ;;  %v7624_v2 = vpop.f32.mrb[44].mxu1 }
 0x26d   :  { %9718 = vst [vmem:[#allocation24_spill] sm:$0xff] %v7624_v2  ;;  %v3240_v6 = vpop.f32.mrb[45].mxu0  ;;  %v3928_v14 = vpop.f32.mrb[45].mxu1  ;;  %v6373_v2 = vld [vmem:[%s9694_s3 + $0x420] ss:$12 sps:$4 sm:$0xff]  }
 0x26e   :  { %v7632_v42 = vpop.f32.mrb[46].mxu0  ;;  %v7634_v18 = vpop.f32.mrb[46].mxu1  ;;  %v6350_v6 = vld [vmem:[%s9694_s3 + $0x3c4] ss:$12 sps:$4 sm:$0xff]  }
 0x26f   :  { %9719 = vst [vmem:[#allocation25_spill] sm:$0xff] %v7634_v18  ;;  %v3243_v30 = vpop.f32.mrb[47].mxu0  ;;  %v3931_v32 = vpop.f32.mrb[47].mxu1  ;;  %v6368_v18 = vld [vmem:[%s9694_s3 + $0x408] ss:$12 sps:$4 sm:$0xff]  }
 0x270   :  { %v6353_v32 = vld [vmem:[%s9694_s3 + $0x3c0] ss:$12 sps:$4 sm:$0xff]  }
 0x271   :  { %3453 = vmatmul.mubr.bf16.gmra.mrb[152].mxu0 %v6343_v7  ;;  %5859 = vmatmul.mubr.msk.bf16.gmra.mrb[152].mxu1 %vm2773_vm0, %v6344_v13  ;;  %v6352_v7 = vld [vmem:[%s9694_s3 + $0x248] ss:$12 sps:$4 sm:$0xff]  }
 0x272   :  { %3460 = vmatprep.mubr.bf16.mxu0 %v6345_v27  ;;  %5862 = vmatprep.mubr.msk.bf16.mxu1 %vm2773_vm0, %v6347_v28 }
 0x274   :  { %v7644_v45 = vpop.f32.mrb[48].mxu0  ;;  %v7646_v46 = vpop.f32.mrb[48].mxu1 }
 0x275   :  { %9720 = vst [vmem:[#allocation26_spill] sm:$0xff] %v7646_v46  ;;  %v3248_v51 = vpop.f32.mrb[49].mxu0  ;;  %v3936_v56 = vpop.f32.mrb[49].mxu1 }
 0x276   :  { %v7654_v31 = vpop.f32.mrb[50].mxu0  ;;  %v7656_v59 = vpop.f32.mrb[50].mxu1  ;;  %v6354_v51 = vld [vmem:[%s9694_s3 + $0x260] ss:$12 sps:$4 sm:$0xff]  }
 0x277   :  { %9721 = vst [vmem:[#allocation27_spill] sm:$0xff] %v7656_v59  ;;  %v3251_v13 = vpop.f32.mrb[51].mxu0  ;;  %v3939_v14 = vpop.f32.mrb[51].mxu1 }
 0x279   :  { %3461 = vmatmul.mubr.bf16.gmra.mrb[156].mxu0 %v6348_v52  ;;  %5863 = vmatmul.mubr.msk.bf16.gmra.mrb[156].mxu1 %vm2773_vm0, %v6349_v36 }
 0x27a   :  { %3468 = vmatprep.mubr.bf16.mxu0 %v6350_v6  ;;  %5866 = vmatprep.mubr.msk.bf16.mxu1 %vm2773_vm0, %v6352_v7  ;;  %v6355_v6 = vld [vmem:[%s9694_s3 + $0x3dc] ss:$12 sps:$4 sm:$0xff]   ;;  %v6357_v7 = vld [vmem:[%s9694_s3 + $0x278] ss:$12 sps:$4 sm:$0xff]  }
 0x27c   :  { %v7666_v27 = vpop.f32.mrb[52].mxu0  ;;  %v7668_v28 = vpop.f32.mrb[52].mxu1 }
 0x27d   :  { %9722 = vst [vmem:[#allocation28_spill] sm:$0xff] %v7668_v28  ;;  %v3256_v30 = vpop.f32.mrb[53].mxu0  ;;  %v3944_v56 = vpop.f32.mrb[53].mxu1  ;;  %v6363_v28 = vld [vmem:[%s9694_s3 + $0x3f0] ss:$12 sps:$4 sm:$0xff]  }
 0x27e   :  { %v7676_v52 = vpop.f32.mrb[54].mxu0  ;;  %v7678_v36 = vpop.f32.mrb[54].mxu1 }
 0x27f   :  { %9723 = vst [vmem:[#allocation29_spill] sm:$0xff] %v7678_v36  ;;  %v3259_v13 = vpop.f32.mrb[55].mxu0  ;;  %v3947_v14 = vpop.f32.mrb[55].mxu1  ;;  %v6358_v36 = vld [vmem:[%s9694_s3 + $0x3d8] ss:$12 sps:$4 sm:$0xff]  }
 0x280   :  { %v6359_v13 = vld [vmem:[%s9694_s3 + $0x290] ss:$12 sps:$4 sm:$0xff]  }
 0x281   :  { %3469 = vmatmul.mubr.bf16.gmra.mrb[160].mxu0 %v6353_v32  ;;  %5867 = vmatmul.mubr.msk.bf16.gmra.mrb[160].mxu1 %vm2773_vm0, %v6354_v51 }
 0x282   :  { %3476 = vmatprep.mubr.bf16.mxu0 %v6355_v6  ;;  %5870 = vmatprep.mubr.msk.bf16.mxu1 %vm2773_vm0, %v6357_v7  ;;  %v6360_v6 = vld [vmem:[%s9694_s3 + $0x3f4] ss:$12 sps:$4 sm:$0xff]  }
 0x284   :  { %v7688_v30 = vpop.f32.mrb[56].mxu0  ;;  %v7690_v56 = vpop.f32.mrb[56].mxu1 }
 0x285   :  { %9724 = vst [vmem:[#allocation30_spill] sm:$0xff] %v7690_v56  ;;  %v3264_v59 = vpop.f32.mrb[57].mxu0  ;;  %v3952_v14 = vpop.f32.mrb[57].mxu1 }
 0x286   :  { %v7698_v32 = vpop.f32.mrb[58].mxu0  ;;  %v7700_v51 = vpop.f32.mrb[58].mxu1  ;;  %v6362_v59 = vld [vmem:[%s9694_s3 + $0x2a8] ss:$12 sps:$4 sm:$0xff]  }
 0x287   :  { %9725 = vst [vmem:[#allocation31_spill] sm:$0xff] %v7700_v51  ;;  %v3267_v7 = vpop.f32.mrb[59].mxu0  ;;  %v3955_v56 = vpop.f32.mrb[59].mxu1 }
 0x288   :  { %v6364_v7 = vld [vmem:[%s9694_s3 + $0x2c0] ss:$12 sps:$4 sm:$0xff]  }
 0x289   :  { %3477 = vmatmul.mubr.bf16.gmra.mrb[164].mxu0 %v6358_v36  ;;  %5871 = vmatmul.mubr.msk.bf16.gmra.mrb[164].mxu1 %vm2773_vm0, %v6359_v13 }
 0x28a   :  { %3484 = vmatprep.mubr.bf16.mxu0 %v6360_v6  ;;  %5874 = vmatprep.mubr.msk.bf16.mxu1 %vm2773_vm0, %v6362_v59  ;;  %v6365_v6 = vld [vmem:[%s9694_s3 + $0x40c] ss:$12 sps:$4 sm:$0xff]  }
 0x28c   :  { %v7710_v14 = vpop.f32.mrb[60].mxu0  ;;  %v7712_v46 = vpop.f32.mrb[60].mxu1 }
 0x28d   :  { %9726 = vst [vmem:[#allocation32_spill] sm:$0xff] %v7712_v46  ;;  %v3272_v51 = vpop.f32.mrb[61].mxu0  ;;  %v3960_v56 = vpop.f32.mrb[61].mxu1 }
 0x28e   :  { %v7720_v36 = vpop.f32.mrb[62].mxu0  ;;  %v7722_v13 = vpop.f32.mrb[62].mxu1  ;;  %v6367_v51 = vld [vmem:[%s9694_s3 + $0x2d8] ss:$12 sps:$4 sm:$0xff]  }
 0x28f   :  { %9727 = vst [vmem:[#allocation33_spill] sm:$0xff] %v7722_v13  ;;  %v3275_v59 = vpop.f32.mrb[63].mxu0  ;;  %v3963_v46 = vpop.f32.mrb[63].mxu1 }
 0x290   :  { %v6369_v59 = vld [vmem:[%s9694_s3 + $0x2f0] ss:$12 sps:$4 sm:$0xff]  }
 0x291   :  { %3485 = vmatmul.mubr.bf16.gmra.mrb[168].mxu0 %v6363_v28  ;;  %5875 = vmatmul.mubr.msk.bf16.gmra.mrb[168].mxu1 %vm2773_vm0, %v6364_v7 }
 0x292   :  { %3492 = vmatprep.mubr.bf16.mxu0 %v6365_v6  ;;  %5878 = vmatprep.mubr.msk.bf16.mxu1 %vm2773_vm0, %v6367_v51  ;;  %v6370_v6 = vld [vmem:[%s9694_s3 + $0x424] ss:$12 sps:$4 sm:$0xff]  }
 0x294   :  { %v7732_v56 = vpop.f32.mrb[64].mxu0  ;;  %v7734_v44 = vpop.f32.mrb[64].mxu1 }
 0x295   :  { %9728 = vst [vmem:[#allocation34_spill] sm:$0xff] %v7734_v44  ;;  %v3280_v13 = vpop.f32.mrb[65].mxu0  ;;  %v3968_v46 = vpop.f32.mrb[65].mxu1 }
 0x296   :  { %v7742_v28 = vpop.f32.mrb[66].mxu0  ;;  %v7744_v7 = vpop.f32.mrb[66].mxu1  ;;  %v6372_v13 = vld [vmem:[%s9694_s3 + $0x308] ss:$12 sps:$4 sm:$0xff]  }
 0x297   :  { %9729 = vst [vmem:[#allocation35_spill] sm:$0xff] %v7744_v7  ;;  %v3283_v51 = vpop.f32.mrb[67].mxu0  ;;  %v3971_v44 = vpop.f32.mrb[67].mxu1 }
 0x298   :  { %v6374_v51 = vld [vmem:[%s9694_s3 + $0x320] ss:$12 sps:$4 sm:$0xff]  }
 0x299   :  { %3493 = vmatmul.mubr.bf16.gmra.mrb[172].mxu0 %v6368_v18  ;;  %5879 = vmatmul.mubr.msk.bf16.gmra.mrb[172].mxu1 %vm2773_vm0, %v6369_v59 }
 0x29a   :  { %3500 = vmatprep.mubr.bf16.mxu0 %v6370_v6  ;;  %5882 = vmatprep.mubr.msk.bf16.mxu1 %vm2773_vm0, %v6372_v13  ;;  %v6375_v6 = vld [vmem:[%s9694_s3 + $0x43c] ss:$12 sps:$4 sm:$0xff]  }
 0x29c   :  { %v7754_v46 = vpop.f32.mrb[68].mxu0  ;;  %v7756_v41 = vpop.f32.mrb[68].mxu1 }
 0x29d   :  { %9730 = vst [vmem:[#allocation36_spill] sm:$0xff] %v7756_v41  ;;  %v3288_v7 = vpop.f32.mrb[69].mxu0  ;;  %v3976_v44 = vpop.f32.mrb[69].mxu1 }
 0x29e   :  { %v7764_v18 = vpop.f32.mrb[70].mxu0  ;;  %v7766_v59 = vpop.f32.mrb[70].mxu1  ;;  %v6377_v7 = vld [vmem:[%s9694_s3 + $0x338] ss:$12 sps:$4 sm:$0xff]  }
 0x29f   :  { %9731 = vst [vmem:[#allocation37_spill] sm:$0xff] %v7766_v59  ;;  %v3291_v13 = vpop.f32.mrb[71].mxu0  ;;  %v3979_v41 = vpop.f32.mrb[71].mxu1 }
 0x2a0   :  { %v6379_v13 = vld [vmem:[%s9694_s3 + $0x350] ss:$12 sps:$4 sm:$0xff]  }
 0x2a1   :  { %3501 = vmatmul.mubr.bf16.gmra.mrb[176].mxu0 %v6373_v2  ;;  %5883 = vmatmul.mubr.msk.bf16.gmra.mrb[176].mxu1 %vm2773_vm0, %v6374_v51 }
 0x2a2   :  { %3508 = vmatprep.mubr.bf16.mxu0 %v6375_v6  ;;  %5886 = vmatprep.mubr.msk.bf16.mxu1 %vm2773_vm0, %v6377_v7  ;;  %v6380_v6 = vld [vmem:[%s9694_s3 + $0x454] ss:$12 sps:$4 sm:$0xff]  }
 0x2a4   :  { %v7776_v44 = vpop.f32.mrb[72].mxu0  ;;  %v7778_v61 = vpop.f32.mrb[72].mxu1 }
 0x2a5   :  { %9732 = vst [vmem:[#allocation38_spill] sm:$0xff] %v7778_v61  ;;  %v3296_v59 = vpop.f32.mrb[73].mxu0  ;;  %v3984_v41 = vpop.f32.mrb[73].mxu1 }
 0x2a6   :  { %v7786_v2 = vpop.f32.mrb[74].mxu0  ;;  %v7788_v51 = vpop.f32.mrb[74].mxu1  ;;  %v6382_v59 = vld [vmem:[%s9694_s3 + $0x368] ss:$12 sps:$4 sm:$0xff]  }
 0x2a7   :  { %9733 = vst [vmem:[#allocation39_spill] sm:$0xff] %v7788_v51  ;;  %v3299_v7 = vpop.f32.mrb[75].mxu0  ;;  %v3987_v61 = vpop.f32.mrb[75].mxu1 }
 0x2a8   :  { %v6384_v7 = vld [vmem:[%s9694_s3 + $0x380] ss:$12 sps:$4 sm:$0xff]  }
 0x2a9   :  { %3509 = vmatmul.mubr.bf16.gmra.mrb[180].mxu0 %v6378_v21  ;;  %5887 = vmatmul.mubr.msk.bf16.gmra.mrb[180].mxu1 %vm2773_vm0, %v6379_v13 }
 0x2aa   :  { %3516 = vmatprep.mubr.bf16.mxu0 %v6380_v6  ;;  %5890 = vmatprep.mubr.msk.bf16.mxu1 %vm2773_vm0, %v6382_v59  ;;  %v6385_v6 = vld [vmem:[%s9694_s3 + $0x46c] ss:$12 sps:$4 sm:$0xff]  }
 0x2ac   :  { %v7798_v41 = vpop.f32.mrb[76].mxu0  ;;  %v7800_v0 = vpop.f32.mrb[76].mxu1 }
 0x2ad   :  { %9734 = vst [vmem:[#allocation40_spill] sm:$0xff] %v7800_v0  ;;  %v3304_v51 = vpop.f32.mrb[77].mxu0  ;;  %v3992_v61 = vpop.f32.mrb[77].mxu1 }
 0x2ae   :  { %v7808_v21 = vpop.f32.mrb[78].mxu0  ;;  %v7810_v13 = vpop.f32.mrb[78].mxu1  ;;  %v6387_v51 = vld [vmem:[%s9694_s3 + $0x398] ss:$12 sps:$4 sm:$0xff]  }
 0x2af   :  { %9735 = vst [vmem:[#allocation41_spill] sm:$0xff] %v7810_v13  ;;  %v3307_v59 = vpop.f32.mrb[79].mxu0  ;;  %v3995_v0 = vpop.f32.mrb[79].mxu1 }
 0x2b0   :  { %v6389_v59 = vld [vmem:[%s9694_s3 + $0x3b0] ss:$12 sps:$4 sm:$0xff]  }
 0x2b1   :  { %3517 = vmatmul.mubr.bf16.gmra.mrb[184].mxu0 %v6383_v12  ;;  %5891 = vmatmul.mubr.msk.bf16.gmra.mrb[184].mxu1 %vm2773_vm0, %v6384_v7 }
 0x2b2   :  { %3524 = vmatprep.mubr.bf16.mxu0 %v6385_v6  ;;  %5894 = vmatprep.mubr.msk.bf16.mxu1 %vm2773_vm0, %v6387_v51  ;;  %v6390_v6 = vld [vmem:[%s9694_s3 + $0x484] ss:$12 sps:$4 sm:$0xff]  }
 0x2b4   :  { %v7820_v61 = vpop.f32.mrb[80].mxu0  ;;  %v7822_v23 = vpop.f32.mrb[80].mxu1 }
 0x2b5   :  { %9736 = vst [vmem:[#allocation42_spill] sm:$0xff] %v7822_v23  ;;  %v3312_v13 = vpop.f32.mrb[81].mxu0  ;;  %v4000_v0 = vpop.f32.mrb[81].mxu1 }
 0x2b6   :  { %v7830_v12 = vpop.f32.mrb[82].mxu0  ;;  %v7832_v7 = vpop.f32.mrb[82].mxu1  ;;  %v6392_v13 = vld [vmem:[%s9694_s3 + $0x3c8] ss:$12 sps:$4 sm:$0xff]  }
 0x2b7   :  { %9737 = vst [vmem:[#allocation43_spill] sm:$0xff] %v7832_v7  ;;  %v3315_v51 = vpop.f32.mrb[83].mxu0  ;;  %v4003_v23 = vpop.f32.mrb[83].mxu1 }
 0x2b8   :  { %v6394_v51 = vld [vmem:[%s9694_s3 + $0x3e0] ss:$12 sps:$4 sm:$0xff]  }
 0x2b9   :  { %3525 = vmatmul.mubr.bf16.gmra.mrb[188].mxu0 %v6388_v49  ;;  %5895 = vmatmul.mubr.msk.bf16.gmra.mrb[188].mxu1 %vm2773_vm0, %v6389_v59 }
 0x2ba   :  { %3532 = vmatprep.mubr.bf16.mxu0 %v6390_v6  ;;  %5898 = vmatprep.mubr.msk.bf16.mxu1 %vm2773_vm0, %v6392_v13  ;;  %v6395_v6 = vld [vmem:[%s9694_s3 + $0x49c] ss:$12 sps:$4 sm:$0xff]  }
 0x2bc   :  { %v7842_v0 = vpop.f32.mrb[84].mxu0  ;;  %v7844_v17 = vpop.f32.mrb[84].mxu1 }
 0x2bd   :  { %9738 = vst [vmem:[#allocation44_spill] sm:$0xff] %v7844_v17  ;;  %v3320_v7 = vpop.f32.mrb[85].mxu0  ;;  %v4008_v23 = vpop.f32.mrb[85].mxu1 }
 0x2be   :  { %v7852_v49 = vpop.f32.mrb[86].mxu0  ;;  %v7854_v59 = vpop.f32.mrb[86].mxu1  ;;  %v6397_v7 = vld [vmem:[%s9694_s3 + $0x3f8] ss:$12 sps:$4 sm:$0xff]  }
 0x2bf   :  { %9739 = vst [vmem:[#allocation45_spill] sm:$0xff] %v7854_v59  ;;  %v3323_v13 = vpop.f32.mrb[87].mxu0  ;;  %v4011_v17 = vpop.f32.mrb[87].mxu1 }
 0x2c0   :  { %v6399_v13 = vld [vmem:[%s9694_s3 + $0x410] ss:$12 sps:$4 sm:$0xff]  }
 0x2c1   :  { %3533 = vmatmul.mubr.bf16.gmra.mrb[192].mxu0 %v6393_v38  ;;  %5899 = vmatmul.mubr.msk.bf16.gmra.mrb[192].mxu1 %vm2773_vm0, %v6394_v51 }
 0x2c2   :  { %3540 = vmatprep.mubr.bf16.mxu0 %v6395_v6  ;;  %5902 = vmatprep.mubr.msk.bf16.mxu1 %vm2773_vm0, %v6397_v7  ;;  %v6400_v6 = vld [vmem:[%s9694_s3 + $0x4b4] ss:$12 sps:$4 sm:$0xff]  }
 0x2c4   :  { %v7864_v23 = vpop.f32.mrb[88].mxu0  ;;  %v7866_v58 = vpop.f32.mrb[88].mxu1 }
 0x2c5   :  { %9740 = vst [vmem:[#allocation46_spill] sm:$0xff] %v7866_v58  ;;  %v3328_v59 = vpop.f32.mrb[89].mxu0  ;;  %v4016_v17 = vpop.f32.mrb[89].mxu1 }
 0x2c6   :  { %v7874_v38 = vpop.f32.mrb[90].mxu0  ;;  %v7876_v51 = vpop.f32.mrb[90].mxu1  ;;  %v6402_v59 = vld [vmem:[%s9694_s3 + $0x428] ss:$12 sps:$4 sm:$0xff]  }
 0x2c7   :  { %9741 = vst [vmem:[#allocation47_spill] sm:$0xff] %v7876_v51  ;;  %v3331_v7 = vpop.f32.mrb[91].mxu0  ;;  %v4019_v58 = vpop.f32.mrb[91].mxu1 }
 0x2c8   :  { %v6404_v7 = vld [vmem:[%s9694_s3 + $0x440] ss:$12 sps:$4 sm:$0xff]  }
 0x2c9   :  { %3541 = vmatmul.mubr.bf16.gmra.mrb[196].mxu0 %v6398_v9  ;;  %5903 = vmatmul.mubr.msk.bf16.gmra.mrb[196].mxu1 %vm2773_vm0, %v6399_v13 }
 0x2ca   :  { %3548 = vmatprep.mubr.bf16.mxu0 %v6400_v6  ;;  %5906 = vmatprep.mubr.msk.bf16.mxu1 %vm2773_vm0, %v6402_v59  ;;  %v6405_v6 = vld [vmem:[%s9694_s3 + $0x4cc] ss:$12 sps:$4 sm:$0xff]  }
 0x2cc   :  { %v7886_v17 = vpop.f32.mrb[92].mxu0  ;;  %v7888_v54 = vpop.f32.mrb[92].mxu1 }
 0x2cd   :  { %9742 = vst [vmem:[#allocation48_spill] sm:$0xff] %v7888_v54  ;;  %v3336_v51 = vpop.f32.mrb[93].mxu0  ;;  %v4024_v58 = vpop.f32.mrb[93].mxu1 }
 0x2ce   :  { %v7896_v9 = vpop.f32.mrb[94].mxu0  ;;  %v7898_v13 = vpop.f32.mrb[94].mxu1  ;;  %v6407_v51 = vld [vmem:[%s9694_s3 + $0x458] ss:$12 sps:$4 sm:$0xff]  }
 0x2cf   :  { %9743 = vst [vmem:[#allocation49_spill] sm:$0xff] %v7898_v13  ;;  %v3339_v59 = vpop.f32.mrb[95].mxu0  ;;  %v4027_v54 = vpop.f32.mrb[95].mxu1 }
 0x2d0   :  { %v6409_v59 = vld [vmem:[%s9694_s3 + $0x470] ss:$12 sps:$4 sm:$0xff]  }
 0x2d1   :  { %3549 = vmatmul.mubr.bf16.gmra.mrb[200].mxu0 %v6403_v63  ;;  %5907 = vmatmul.mubr.msk.bf16.gmra.mrb[200].mxu1 %vm2773_vm0, %v6404_v7 }
 0x2d2   :  { %3556 = vmatprep.mubr.bf16.mxu0 %v6405_v6  ;;  %5910 = vmatprep.mubr.msk.bf16.mxu1 %vm2773_vm0, %v6407_v51  ;;  %v6410_v6 = vld [vmem:[%s9694_s3 + $0x4e4] ss:$12 sps:$4 sm:$0xff]  }
 0x2d4   :  { %v7908_v58 = vpop.f32.mrb[96].mxu0  ;;  %v7910_v34 = vpop.f32.mrb[96].mxu1 }
 0x2d5   :  { %9744 = vst [vmem:[#allocation50_spill] sm:$0xff] %v7910_v34  ;;  %v3344_v13 = vpop.f32.mrb[97].mxu0  ;;  %v4032_v54 = vpop.f32.mrb[97].mxu1 }
 0x2d6   :  { %v7918_v63 = vpop.f32.mrb[98].mxu0  ;;  %v7920_v7 = vpop.f32.mrb[98].mxu1  ;;  %v6412_v13 = vld [vmem:[%s9694_s3 + $0x488] ss:$12 sps:$4 sm:$0xff]  }
 0x2d7   :  { %9745 = vst [vmem:[#allocation51_spill] sm:$0xff] %v7920_v7  ;;  %v3347_v51 = vpop.f32.mrb[99].mxu0  ;;  %v4035_v34 = vpop.f32.mrb[99].mxu1 }
 0x2d8   :  { %v6414_v51 = vld [vmem:[%s9694_s3 + $0x4a0] ss:$12 sps:$4 sm:$0xff]  }
 0x2d9   :  { %3557 = vmatmul.mubr.bf16.gmra.mrb[204].mxu0 %v6408_v50  ;;  %5911 = vmatmul.mubr.msk.bf16.gmra.mrb[204].mxu1 %vm2773_vm0, %v6409_v59 }
 0x2da   :  { %3564 = vmatprep.mubr.bf16.mxu0 %v6410_v6  ;;  %5914 = vmatprep.mubr.msk.bf16.mxu1 %vm2773_vm0, %v6412_v13  ;;  %v6415_v6 = vld [vmem:[%s9694_s3 + $0x4fc] ss:$12 sps:$4 sm:$0xff]  }
 0x2dc   :  { %v7930_v54 = vpop.f32.mrb[100].mxu0  ;;  %v7932_v26 = vpop.f32.mrb[100].mxu1 }
 0x2dd   :  { %9746 = vst [vmem:[#allocation52_spill] sm:$0xff] %v7932_v26  ;;  %v3352_v7 = vpop.f32.mrb[101].mxu0  ;;  %v4040_v34 = vpop.f32.mrb[101].mxu1 }
 0x2de   :  { %v7940_v50 = vpop.f32.mrb[102].mxu0  ;;  %v7942_v59 = vpop.f32.mrb[102].mxu1  ;;  %v6417_v7 = vld [vmem:[%s9694_s3 + $0x4b8] ss:$12 sps:$4 sm:$0xff]  }
 0x2df   :  { %9747 = vst [vmem:[#allocation53_spill] sm:$0xff] %v7942_v59  ;;  %v3355_v13 = vpop.f32.mrb[103].mxu0  ;;  %v4043_v26 = vpop.f32.mrb[103].mxu1 }
 0x2e0   :  { %v6419_v13 = vld [vmem:[%s9694_s3 + $0x4d0] ss:$12 sps:$4 sm:$0xff]  }
 0x2e1   :  { %3565 = vmatmul.mubr.bf16.gmra.mrb[208].mxu0 %v6413_v43  ;;  %5915 = vmatmul.mubr.msk.bf16.gmra.mrb[208].mxu1 %vm2773_vm0, %v6414_v51 }
 0x2e2   :  { %3572 = vmatprep.mubr.bf16.mxu0 %v6415_v6  ;;  %5918 = vmatprep.mubr.msk.bf16.mxu1 %vm2773_vm0, %v6417_v7  ;;  %v6420_v6 = vld [vmem:[%s9694_s3 + $0x514] ss:$12 sps:$4 sm:$0xff]  }
 0x2e4   :  { %v7952_v34 = vpop.f32.mrb[104].mxu0  ;;  %v7954_v37 = vpop.f32.mrb[104].mxu1 }
 0x2e5   :  { %9748 = vst [vmem:[#allocation54_spill] sm:$0xff] %v7952_v34  ;;  %9749 = vst [vmem:[#allocation55_spill] sm:$0xff] %v7954_v37  ;;  %v3360_v59 = vpop.f32.mrb[105].mxu0  ;;  %v4048_v26 = vpop.f32.mrb[105].mxu1 }
 0x2e6   :  { %v7962_v43 = vpop.f32.mrb[106].mxu0  ;;  %v7964_v51 = vpop.f32.mrb[106].mxu1  ;;  %v6422_v59 = vld [vmem:[%s9694_s3 + $0x4e8] ss:$12 sps:$4 sm:$0xff]  }
 0x2e7   :  { %9750 = vst [vmem:[#allocation56_spill] sm:$0xff] %v7962_v43  ;;  %9751 = vst [vmem:[#allocation57_spill] sm:$0xff] %v7964_v51  ;;  %v3363_v7 = vpop.f32.mrb[107].mxu0  ;;  %v4051_v37 = vpop.f32.mrb[107].mxu1 }
 0x2e8   :  { %v6424_v37 = vld [vmem:[%s9694_s3 + $0x500] ss:$12 sps:$4 sm:$0xff]  }
 0x2e9   :  { %3573 = vmatmul.mubr.bf16.gmra.mrb[212].mxu0 %v6418_v20  ;;  %5919 = vmatmul.mubr.msk.bf16.gmra.mrb[212].mxu1 %vm2773_vm0, %v6419_v13 }
 0x2ea   :  { %3580 = vmatprep.mubr.bf16.mxu0 %v6420_v6  ;;  %5922 = vmatprep.mubr.msk.bf16.mxu1 %vm2773_vm0, %v6422_v59  ;;  %v6425_v6 = vld [vmem:[%s9694_s3 + $0x52c] ss:$12 sps:$4 sm:$0xff]  }
 0x2ec   :  { %v7974_v26 = vpop.f32.mrb[108].mxu0  ;;  %v7976_v4 = vpop.f32.mrb[108].mxu1 }
 0x2ed   :  { %9752 = vst [vmem:[#allocation58_spill] sm:$0xff] %v7974_v26  ;;  %9753 = vst [vmem:[#allocation59_spill] sm:$0xff] %v7976_v4  ;;  %v3368_v51 = vpop.f32.mrb[109].mxu0  ;;  %v4056_v43 = vpop.f32.mrb[109].mxu1  ;;  %v6428_v26 = vld [vmem:[%s9694_s3 + $0x528] ss:$12 sps:$4 sm:$0xff]  }
 0x2ee   :  { %v7984_v20 = vpop.f32.mrb[110].mxu0  ;;  %v7986_v13 = vpop.f32.mrb[110].mxu1  ;;  %v6427_v51 = vld [vmem:[%s9694_s3 + $0x518] ss:$12 sps:$4 sm:$0xff]  }
 0x2ef   :  { %9754 = vst [vmem:[#allocation60_spill] sm:$0xff] %v7984_v20  ;;  %9755 = vst [vmem:[#allocation61_spill] sm:$0xff] %v7986_v13  ;;  %v3371_v59 = vpop.f32.mrb[111].mxu0  ;;  %v4059_v7 = vpop.f32.mrb[111].mxu1 }
 0x2f0   :  { %v6430_v59 = vld [vmem:[%s9694_s3 + $0x544] ss:$12 sps:$4 sm:$0xff]  }
 0x2f1   :  { %3581 = vmatmul.mubr.bf16.gmra.mrb[216].mxu0 %v6423_v15  ;;  %5923 = vmatmul.mubr.msk.bf16.gmra.mrb[216].mxu1 %vm2773_vm0, %v6424_v37  ;;  %v6429_v15 = vld [vmem:[%s9694_s3 + $0x530] ss:$12 sps:$4 sm:$0xff]  }
 0x2f2   :  { %3588 = vmatprep.mubr.bf16.mxu0 %v6425_v6  ;;  %5926 = vmatprep.mubr.msk.bf16.mxu1 %vm2773_vm0, %v6427_v51 }
 0x2f4   :  { %v5820_v43 = vpop.f32.mrb[112].mxu1  ;;  %v7996_v4 = vpop.f32.mrb[112].mxu0 }
 0x2f5   :  { %v4104_v13 = vadd.f32 %v5820_v43, %v7402_v47  ;;  %v4095_v20 = vpop.f32.mrb[113].mxu1  ;;  %v3376_v34 = vpop.f32.mrb[113].mxu0  ;;  %v6432_v47 = vld [vmem:[%s9694_s3 + $0x548] ss:$12 sps:$4 sm:$0xff]  }
 0x2f6   :  { %v4096_v37 = vadd.f32 %v4095_v20, %v7381_v3  ;;  %v5821_v6 = vpop.f32.mrb[114].mxu1  ;;  %v8006_v51 = vpop.f32.mrb[114].mxu0 }
 0x2f7   :  { %5009 = vst.msk [vmem:[%s9695_s4 + $0x10] sm:$0xff] %vm5006_vm1, %v4104_v13  ;;  %v4107_v34 = vadd.f32 %v5821_v6, %v7412_v19  ;;  %v4098_v7 = vpop.f32.mrb[115].mxu1  ;;  %v3379_v3 = vpop.f32.mrb[115].mxu0 }
 0x2f8   :  { %5007 = vst.msk [vmem:[%s9695_s4] sm:$0xff] %vm5006_vm1, %v4096_v37  ;;  %v4099_v20 = vadd.f32 %v4098_v7, %v7391_v10 }
 0x2f9   :  { %5010 = vst.msk [vmem:[%s9695_s4 + $0x18] sm:$0xff] %vm5006_vm1, %v4107_v34  ;;  %3589 = vmatmul.mubr.bf16.gmra.mrb[220].mxu0 %v6428_v26  ;;  %5927 = vmatmul.mubr.msk.bf16.gmra.mrb[220].mxu1 %vm2773_vm0, %v6429_v15  ;;  %v6433_v26 = vld [vmem:[%s9694_s3 + $0x540] ss:$12 sps:$4 sm:$0xff]  }
 0x2fa   :  { %5008 = vst.msk [vmem:[%s9695_s4 + $0x8] sm:$0xff] %vm5006_vm1, %v4099_v20  ;;  %3596 = vmatprep.mubr.bf16.mxu0 %v6430_v59  ;;  %5930 = vmatprep.mubr.msk.bf16.mxu1 %vm2773_vm0, %v6432_v47  ;;  %v6434_v15 = vld [vmem:[%s9694_s3 + $0x560] ss:$12 sps:$4 sm:$0xff]   ;;  %v6435_v47 = vld [vmem:[%s9694_s3 + $0x55c] ss:$12 sps:$4 sm:$0xff]  }
 0x2fc   :  { %v5824_v19 = vpop.f32.mrb[116].mxu1  ;;  %v8034_v13 = vpop.f32.mrb[116].mxu0 }
 0x2fd   :  { %v4120_v10 = vadd.f32 %v5824_v19, %v7446_v24  ;;  %v4111_v43 = vpop.f32.mrb[117].mxu1  ;;  %v3384_v37 = vpop.f32.mrb[117].mxu0  ;;  %v6437_v24 = vld [vmem:[%s9694_s3 + $0x578] ss:$12 sps:$4 sm:$0xff]  }
 0x2fe   :  { %v4112_v6 = vadd.f32 %v4111_v43, %v7424_v25  ;;  %v5825_v59 = vpop.f32.mrb[118].mxu1  ;;  %v8044_v34 = vpop.f32.mrb[118].mxu0  ;;  %v6438_v37 = vld [vmem:[%s9694_s3 + $0x558] ss:$12 sps:$4 sm:$0xff]  }
 0x2ff   :  { %5013 = vst.msk [vmem:[%s9695_s4 + $0x30] sm:$0xff] %vm5006_vm1, %v4120_v10  ;;  %v4123_v7 = vadd.f32 %v5825_v59, %v7456_v5  ;;  %v4114_v3 = vpop.f32.mrb[119].mxu1  ;;  %v3387_v25 = vpop.f32.mrb[119].mxu0 }
 0x300   :  { %5011 = vst.msk [vmem:[%s9695_s4 + $0x20] sm:$0xff] %vm5006_vm1, %v4112_v6  ;;  %v4115_v20 = vadd.f32 %v4114_v3, %v7434_v33 }
 0x301   :  { %5014 = vst.msk [vmem:[%s9695_s4 + $0x38] sm:$0xff] %vm5006_vm1, %v4123_v7  ;;  %3597 = vmatmul.mubr.bf16.gmra.mrb[224].mxu0 %v6433_v26  ;;  %5931 = vmatmul.mubr.msk.bf16.gmra.mrb[224].mxu1 %vm2773_vm0, %v6434_v15  ;;  %v6439_v26 = vld [vmem:[%s9694_s3 + $0x590] ss:$12 sps:$4 sm:$0xff]  }
 0x302   :  { %5012 = vst.msk [vmem:[%s9695_s4 + $0x28] sm:$0xff] %vm5006_vm1, %v4115_v20  ;;  %3604 = vmatprep.mubr.bf16.mxu0 %v6435_v47  ;;  %5934 = vmatprep.mubr.msk.bf16.mxu1 %vm2773_vm0, %v6437_v24  ;;  %v6440_v47 = vld [vmem:[%s9694_s3 + $0x574] ss:$12 sps:$4 sm:$0xff]  }
 0x304   :  { %v5828_v5 = vpop.f32.mrb[120].mxu1  ;;  %v8072_v19 = vpop.f32.mrb[120].mxu0 }
 0x305   :  { %v4136_v33 = vadd.f32 %v5828_v5, %v7490_v62  ;;  %v4127_v10 = vpop.f32.mrb[121].mxu1  ;;  %v3392_v43 = vpop.f32.mrb[121].mxu0  ;;  %v6442_v62 = vld [vmem:[%s9694_s3 + $0x5a8] ss:$12 sps:$4 sm:$0xff]  }
 0x306   :  { %v4128_v15 = vadd.f32 %v4127_v10, %v7468_v53  ;;  %v5829_v6 = vpop.f32.mrb[122].mxu1  ;;  %v8082_v59 = vpop.f32.mrb[122].mxu0  ;;  %v6444_v10 = vld [vmem:[%s9694_s3 + $0x5c0] ss:$12 sps:$4 sm:$0xff]  }
 0x307   :  { %5017 = vst.msk [vmem:[%s9695_s4 + $0x50] sm:$0xff] %vm5006_vm1, %v4136_v33  ;;  %v4139_v24 = vadd.f32 %v5829_v6, %v7500_v8  ;;  %v4130_v7 = vpop.f32.mrb[123].mxu1  ;;  %v3395_v53 = vpop.f32.mrb[123].mxu0  ;;  %v6443_v33 = vld [vmem:[%s9694_s3 + $0x570] ss:$12 sps:$4 sm:$0xff]  }
 0x308   :  { %5015 = vst.msk [vmem:[%s9695_s4 + $0x40] sm:$0xff] %vm5006_vm1, %v4128_v15  ;;  %v4131_v3 = vadd.f32 %v4130_v7, %v7478_v57  ;;  %v6445_v15 = vld [vmem:[%s9694_s3 + $0x58c] ss:$12 sps:$4 sm:$0xff]  }
 0x309   :  { %5018 = vst.msk [vmem:[%s9695_s4 + $0x58] sm:$0xff] %vm5006_vm1, %v4139_v24  ;;  %3605 = vmatmul.mubr.bf16.gmra.mrb[228].mxu0 %v6438_v37  ;;  %5935 = vmatmul.mubr.msk.bf16.gmra.mrb[228].mxu1 %vm2773_vm0, %v6439_v26 }
 0x30a   :  { %5016 = vst.msk [vmem:[%s9695_s4 + $0x48] sm:$0xff] %vm5006_vm1, %v4131_v3  ;;  %3612 = vmatprep.mubr.bf16.mxu0 %v6440_v47  ;;  %5938 = vmatprep.mubr.msk.bf16.mxu1 %vm2773_vm0, %v6442_v62  ;;  %v6448_v3 = vld [vmem:[%s9694_s3 + $0x588] ss:$12 sps:$4 sm:$0xff]  }
 0x30c   :  { %v5832_v8 = vpop.f32.mrb[124].mxu1  ;;  %v8110_v25 = vpop.f32.mrb[124].mxu0 }
 0x30d   :  { %v4152_v57 = vadd.f32 %v5832_v8, %v7534_v35  ;;  %v4143_v20 = vpop.f32.mrb[125].mxu1  ;;  %v3400_v5 = vpop.f32.mrb[125].mxu0  ;;  %v6447_v35 = vld [vmem:[%s9694_s3 + $0x5d8] ss:$12 sps:$4 sm:$0xff]   ;;  %v6449_v8 = vld [vmem:[%s9694_s3 + $0x5f0] ss:$12 sps:$4 sm:$0xff]  }
 0x30e   :  { %v4144_v43 = vadd.f32 %v4143_v20, %v7512_v16  ;;  %v5833_v37 = vpop.f32.mrb[126].mxu1  ;;  %v8120_v26 = vpop.f32.mrb[126].mxu0 }
 0x30f   :  { %5021 = vst.msk [vmem:[%s9695_s4 + $0x70] sm:$0xff] %vm5006_vm1, %v4152_v57  ;;  %v4155_v6 = vadd.f32 %v5833_v37, %v7544_v48  ;;  %v4146_v47 = vpop.f32.mrb[127].mxu1  ;;  %v3403_v16 = vpop.f32.mrb[127].mxu0 }
 0x310   :  { %5019 = vst.msk [vmem:[%s9695_s4 + $0x60] sm:$0xff] %vm5006_vm1, %v4144_v43  ;;  %v4147_v62 = vadd.f32 %v4146_v47, %v7522_v22  ;;  %v6453_v47 = vld [vmem:[%s9694_s3 + $0x5a0] ss:$12 sps:$4 sm:$0xff]  }
 0x311   :  { %5022 = vst.msk [vmem:[%s9695_s4 + $0x78] sm:$0xff] %vm5006_vm1, %v4155_v6  ;;  %3613 = vmatmul.mubr.bf16.gmra.mrb[232].mxu0 %v6443_v33  ;;  %5939 = vmatmul.mubr.msk.bf16.gmra.mrb[232].mxu1 %vm2773_vm0, %v6444_v10  ;;  %v6450_v33 = vld [vmem:[%s9694_s3 + $0x5a4] ss:$12 sps:$4 sm:$0xff]   ;;  %v6454_v16 = vld [vmem:[%s9694_s3 + $0x620] ss:$12 sps:$4 sm:$0xff]  }
 0x312   :  { %5020 = vst.msk [vmem:[%s9695_s4 + $0x68] sm:$0xff] %vm5006_vm1, %v4147_v62  ;;  %3620 = vmatprep.mubr.bf16.mxu0 %v6445_v15  ;;  %5942 = vmatprep.mubr.msk.bf16.mxu1 %vm2773_vm0, %v6447_v35 }
 0x314   :  { %v5836_v48 = vpop.f32.mrb[128].mxu1  ;;  %v8148_v24 = vpop.f32.mrb[128].mxu0 }
 0x315   :  { %v4168_v22 = vadd.f32 %v5836_v48, %v7578_v11  ;;  %v4159_v7 = vpop.f32.mrb[129].mxu1  ;;  %v3408_v53 = vpop.f32.mrb[129].mxu0  ;;  %v6452_v11 = vld [vmem:[%s9694_s3 + $0x608] ss:$12 sps:$4 sm:$0xff]  }
 0x316   :  { %v4160_v57 = vadd.f32 %v4159_v7, %v7556_v55  ;;  %v5837_v20 = vpop.f32.mrb[130].mxu1  ;;  %v8158_v5 = vpop.f32.mrb[130].mxu0  ;;  %v6455_v7 = vld [vmem:[%s9694_s3 + $0x5bc] ss:$12 sps:$4 sm:$0xff]  }
 0x317   :  { %5025 = vst.msk [vmem:[%s9695_s4 + $0x90] sm:$0xff] %vm5006_vm1, %v4168_v22  ;;  %v4171_v10 = vadd.f32 %v5837_v20, %v7588_v29  ;;  %v4162_v43 = vpop.f32.mrb[131].mxu1  ;;  %v3411_v55 = vpop.f32.mrb[131].mxu0 }
 0x318   :  { %5023 = vst.msk [vmem:[%s9695_s4 + $0x80] sm:$0xff] %vm5006_vm1, %v4160_v57  ;;  %v4163_v37 = vadd.f32 %v4162_v43, %v7566_v60 }
 0x319   :  { %5026 = vst.msk [vmem:[%s9695_s4 + $0x98] sm:$0xff] %vm5006_vm1, %v4171_v10  ;;  %3621 = vmatmul.mubr.bf16.gmra.mrb[236].mxu0 %v6448_v3  ;;  %5943 = vmatmul.mubr.msk.bf16.gmra.mrb[236].mxu1 %vm2773_vm0, %v6449_v8  ;;  %v6459_v10 = vld [vmem:[%s9694_s3 + $0x650] ss:$12 sps:$4 sm:$0xff]  }
 0x31a   :  { %5024 = vst.msk [vmem:[%s9695_s4 + $0x88] sm:$0xff] %vm5006_vm1, %v4163_v37  ;;  %3628 = vmatprep.mubr.bf16.mxu0 %v6450_v33  ;;  %5946 = vmatprep.mubr.msk.bf16.mxu1 %vm2773_vm0, %v6452_v11  ;;  %v6458_v11 = vld [vmem:[%s9694_s3 + $0x5b8] ss:$12 sps:$4 sm:$0xff]  }
 0x31c   :  { %v5840_v29 = vpop.f32.mrb[132].mxu1  ;;  %v8186_v15 = vpop.f32.mrb[132].mxu0 }
 0x31d   :  { %v4184_v60 = vadd.f32 %v5840_v29, %v7622_v1  ;;  %v4175_v35 = vpop.f32.mrb[133].mxu1  ;;  %v3416_v6 = vpop.f32.mrb[133].mxu0  ;;  %v6457_v1 = vld [vmem:[%s9694_s3 + $0x638] ss:$12 sps:$4 sm:$0xff]   ;;  %v6460_v29 = vld [vmem:[%s9694_s3 + $0x5d4] ss:$12 sps:$4 sm:$0xff]  }
 0x31e   :  { %v4176_v62 = vadd.f32 %v4175_v35, %v7600_v39  ;;  %v5841_v48 = vpop.f32.mrb[134].mxu1  ;;  %v8196_v22 = vpop.f32.mrb[134].mxu0 }
 0x31f   :  { %5029 = vst.msk [vmem:[%s9695_s4 + $0xb0] sm:$0xff] %vm5006_vm1, %v4184_v60  ;;  %v4187_v53 = vadd.f32 %v5841_v48, %v7632_v42  ;;  %v4178_v3 = vpop.f32.mrb[135].mxu1  ;;  %v3419_v39 = vpop.f32.mrb[135].mxu0  ;;  %v6463_v48 = vld [vmem:[%s9694_s3 + $0x5d0] ss:$12 sps:$4 sm:$0xff]  }
 0x320   :  { %5027 = vst.msk [vmem:[%s9695_s4 + $0xa0] sm:$0xff] %vm5006_vm1, %v4176_v62  ;;  %v4179_v8 = vadd.f32 %v4178_v3, %v7610_v40  ;;  %v6465_v39 = vld [vmem:[%s9694_s3 + $0x5ec] ss:$12 sps:$4 sm:$0xff]  }
 0x321   :  { %5030 = vst.msk [vmem:[%s9695_s4 + $0xb8] sm:$0xff] %vm5006_vm1, %v4187_v53  ;;  %3629 = vmatmul.mubr.bf16.gmra.mrb[240].mxu0 %v6453_v47  ;;  %5947 = vmatmul.mubr.msk.bf16.gmra.mrb[240].mxu1 %vm2773_vm0, %v6454_v16 }
 0x322   :  { %5028 = vst.msk [vmem:[%s9695_s4 + $0xa8] sm:$0xff] %vm5006_vm1, %v4179_v8  ;;  %3636 = vmatprep.mubr.bf16.mxu0 %v6455_v7  ;;  %5950 = vmatprep.mubr.msk.bf16.mxu1 %vm2773_vm0, %v6457_v1  ;;  %v6464_v7 = vld [vmem:[%s9694_s3 + $0x680] ss:$12 sps:$4 sm:$0xff]  }
 0x324   :  { %v5844_v42 = vpop.f32.mrb[136].mxu1  ;;  %v8224_v57 = vpop.f32.mrb[136].mxu0 }
 0x325   :  { %v4200_v40 = vadd.f32 %v5844_v42, %v7666_v27  ;;  %v4191_v20 = vpop.f32.mrb[137].mxu1  ;;  %v3424_v33 = vpop.f32.mrb[137].mxu0  ;;  %v6462_v27 = vld [vmem:[%s9694_s3 + $0x668] ss:$12 sps:$4 sm:$0xff]  }
 0x326   :  { %v4192_v43 = vadd.f32 %v4191_v20, %v7644_v45  ;;  %v5845_v55 = vpop.f32.mrb[138].mxu1  ;;  %v8234_v37 = vpop.f32.mrb[138].mxu0 }
 0x327   :  { %5033 = vst.msk [vmem:[%s9695_s4 + $0xd0] sm:$0xff] %vm5006_vm1, %v4200_v40  ;;  %v4203_v60 = vadd.f32 %v5845_v55, %v7676_v52  ;;  %v4194_v35 = vpop.f32.mrb[139].mxu1  ;;  %v3427_v45 = vpop.f32.mrb[139].mxu0 }
 0x328   :  { %5031 = vst.msk [vmem:[%s9695_s4 + $0xc0] sm:$0xff] %vm5006_vm1, %v4192_v43  ;;  %v4195_v6 = vadd.f32 %v4194_v35, %v7654_v31  ;;  %v6469_v43 = vld [vmem:[%s9694_s3 + $0x6b0] ss:$12 sps:$4 sm:$0xff]  }
 0x329   :  { %5034 = vst.msk [vmem:[%s9695_s4 + $0xd8] sm:$0xff] %vm5006_vm1, %v4203_v60  ;;  %3637 = vmatmul.mubr.bf16.gmra.mrb[244].mxu0 %v6458_v11  ;;  %5951 = vmatmul.mubr.msk.bf16.gmra.mrb[244].mxu1 %vm2773_vm0, %v6459_v10  ;;  %v6468_v10 = vld [vmem:[%s9694_s3 + $0x5e8] ss:$12 sps:$4 sm:$0xff]   ;;  %v6472_v60 = vld [vmem:[%s9694_s3 + $0x604] ss:$12 sps:$4 sm:$0xff]  }
 0x32a   :  { %5032 = vst.msk [vmem:[%s9695_s4 + $0xc8] sm:$0xff] %vm5006_vm1, %v4195_v6  ;;  %3644 = vmatprep.mubr.bf16.mxu0 %v6460_v29  ;;  %5954 = vmatprep.mubr.msk.bf16.mxu1 %vm2773_vm0, %v6462_v27 }
 0x32c   :  { %v5848_v52 = vpop.f32.mrb[140].mxu1  ;;  %v8262_v47 = vpop.f32.mrb[140].mxu0 }
 0x32d   :  { %v4216_v31 = vadd.f32 %v5848_v52, %v7710_v14  ;;  %v4207_v16 = vpop.f32.mrb[141].mxu1  ;;  %v3432_v62 = vpop.f32.mrb[141].mxu0  ;;  %v6467_v14 = vld [vmem:[%s9694_s3 + $0x698] ss:$12 sps:$4 sm:$0xff]  }
 0x32e   :  { %v4208_v1 = vadd.f32 %v4207_v16, %v7688_v30  ;;  %v5849_v53 = vpop.f32.mrb[142].mxu1  ;;  %v8272_v3 = vpop.f32.mrb[142].mxu0  ;;  %v6470_v62 = vld [vmem:[%s9694_s3 + $0x600] ss:$12 sps:$4 sm:$0xff]  }
 0x32f   :  { %5037 = vst.msk [vmem:[%s9695_s4 + $0xf0] sm:$0xff] %vm5006_vm1, %v4216_v31  ;;  %v4219_v8 = vadd.f32 %v5849_v53, %v7720_v36  ;;  %v4210_v42 = vpop.f32.mrb[143].mxu1  ;;  %v3435_v30 = vpop.f32.mrb[143].mxu0 }
 0x330   :  { %5035 = vst.msk [vmem:[%s9695_s4 + $0xe0] sm:$0xff] %vm5006_vm1, %v4208_v1  ;;  %v4211_v40 = vadd.f32 %v4210_v42, %v7698_v32 }
 0x331   :  { %5038 = vst.msk [vmem:[%s9695_s4 + $0xf8] sm:$0xff] %vm5006_vm1, %v4219_v8  ;;  %3645 = vmatmul.mubr.bf16.gmra.mrb[248].mxu0 %v6463_v48  ;;  %5955 = vmatmul.mubr.msk.bf16.gmra.mrb[248].mxu1 %vm2773_vm0, %v6464_v7  ;;  %v6474_v48 = vld [vmem:[%s9694_s3 + $0x6e0] ss:$12 sps:$4 sm:$0xff]  }
 0x332   :  { %5036 = vst.msk [vmem:[%s9695_s4 + $0xe8] sm:$0xff] %vm5006_vm1, %v4211_v40  ;;  %3652 = vmatprep.mubr.bf16.mxu0 %v6465_v39  ;;  %5958 = vmatprep.mubr.msk.bf16.mxu1 %vm2773_vm0, %v6467_v14  ;;  %v6477_v39 = vld [vmem:[%s9694_s3 + $0x61c] ss:$12 sps:$4 sm:$0xff]  }
 0x334   :  { %v5852_v36 = vpop.f32.mrb[144].mxu1  ;;  %v8300_v20 = vpop.f32.mrb[144].mxu0 }
 0x335   :  { %v4232_v32 = vadd.f32 %v5852_v36, %v7754_v46  ;;  %v4223_v33 = vpop.f32.mrb[145].mxu1  ;;  %v3440_v11 = vpop.f32.mrb[145].mxu0  ;;  %v6473_v46 = vld [vmem:[%s9694_s3 + $0x6c8] ss:$12 sps:$4 sm:$0xff]  }
 0x336   :  { %v4224_v55 = vadd.f32 %v4223_v33, %v7732_v56  ;;  %v5853_v29 = vpop.f32.mrb[146].mxu1  ;;  %v8310_v27 = vpop.f32.mrb[146].mxu0  ;;  %v6479_v33 = vld [vmem:[%s9694_s3 + $0x710] ss:$12 sps:$4 sm:$0xff]  }
 0x337   :  { %5041 = vst.msk [vmem:[%s9695_s4 + $0x110] sm:$0xff] %vm5006_vm1, %v4232_v32  ;;  %v4235_v35 = vadd.f32 %v5853_v29, %v7764_v18  ;;  %v4226_v45 = vpop.f32.mrb[147].mxu1  ;;  %v3443_v56 = vpop.f32.mrb[147].mxu0  ;;  %v6475_v32 = vld [vmem:[%s9694_s3 + $0x618] ss:$12 sps:$4 sm:$0xff]  }
 0x338   :  { %5039 = vst.msk [vmem:[%s9695_s4 + $0x100] sm:$0xff] %vm5006_vm1, %v4224_v55  ;;  %v4227_v6 = vadd.f32 %v4226_v45, %v7742_v28  ;;  %v6482_v55 = vld [vmem:[%s9694_s3 + $0x634] ss:$12 sps:$4 sm:$0xff]  }
 0x339   :  { %5042 = vst.msk [vmem:[%s9695_s4 + $0x118] sm:$0xff] %vm5006_vm1, %v4235_v35  ;;  %3653 = vmatmul.mubr.bf16.gmra.mrb[252].mxu0 %v6468_v10  ;;  %5959 = vmatmul.mubr.msk.bf16.gmra.mrb[252].mxu1 %vm2773_vm0, %v6469_v43 }
 0x33a   :  { %5040 = vst.msk [vmem:[%s9695_s4 + $0x108] sm:$0xff] %vm5006_vm1, %v4227_v6  ;;  %3660 = vmatprep.mubr.bf16.mxu0 %v6472_v60  ;;  %5962 = vmatprep.mubr.msk.bf16.mxu1 %vm2773_vm0, %v6473_v46  ;;  %v6480_v6 = vld [vmem:[%s9694_s3 + $0x630] ss:$12 sps:$4 sm:$0xff]  }
 0x33c   :  { %v5856_v18 = vpop.f32.mrb[148].mxu1  ;;  %v8338_v52 = vpop.f32.mrb[148].mxu0 }
 0x33d   :  { %v4248_v28 = vadd.f32 %v5856_v18, %v7798_v41  ;;  %v4239_v31 = vpop.f32.mrb[149].mxu1  ;;  %v3448_v16 = vpop.f32.mrb[149].mxu0  ;;  %v6478_v41 = vld [vmem:[%s9694_s3 + $0x6f8] ss:$12 sps:$4 sm:$0xff]   ;;  %v6484_v18 = vld [vmem:[%s9694_s3 + $0x740] ss:$12 sps:$4 sm:$0xff]  }
 0x33e   :  { %v4240_v7 = vadd.f32 %v4239_v31, %v7776_v44  ;;  %v5857_v1 = vpop.f32.mrb[150].mxu1  ;;  %v8348_v53 = vpop.f32.mrb[150].mxu0 }
 0x33f   :  { %5045 = vst.msk [vmem:[%s9695_s4 + $0x130] sm:$0xff] %vm5006_vm1, %v4248_v28  ;;  %v4251_v14 = vadd.f32 %v5857_v1, %v7808_v21  ;;  %v4242_v8 = vpop.f32.mrb[151].mxu1  ;;  %v3451_v44 = vpop.f32.mrb[151].mxu0 }
 0x340   :  { %5043 = vst.msk [vmem:[%s9695_s4 + $0x120] sm:$0xff] %vm5006_vm1, %v4240_v7  ;;  %v4243_v42 = vadd.f32 %v4242_v8, %v7786_v2  ;;  %v6485_v8 = vld [vmem:[%s9694_s3 + $0x648] ss:$12 sps:$4 sm:$0xff]   ;;  %v6489_v44 = vld [vmem:[%s9694_s3 + $0x770] ss:$12 sps:$4 sm:$0xff]  }
 0x341   :  { %5046 = vst.msk [vmem:[%s9695_s4 + $0x138] sm:$0xff] %vm5006_vm1, %v4251_v14  ;;  %3661 = vmatmul.mubr.bf16.gmra.mrb[0].mxu0 %v6470_v62  ;;  %5963 = vmatmul.mubr.msk.bf16.gmra.mrb[0].mxu1 %vm2773_vm0, %v6474_v48  ;;  %v6487_v62 = vld [vmem:[%s9694_s3 + $0x64c] ss:$12 sps:$4 sm:$0xff]  }
 0x342   :  { %5044 = vst.msk [vmem:[%s9695_s4 + $0x128] sm:$0xff] %vm5006_vm1, %v4243_v42  ;;  %3668 = vmatprep.mubr.bf16.mxu0 %v6477_v39  ;;  %5966 = vmatprep.mubr.msk.bf16.mxu1 %vm2773_vm0, %v6478_v41 }
 0x344   :  { %v5860_v21 = vpop.f32.mrb[152].mxu1  ;;  %v8376_v30 = vpop.f32.mrb[152].mxu0 }
 0x345   :  { %v4264_v2 = vadd.f32 %v5860_v21, %v7842_v0  ;;  %v4255_v40 = vpop.f32.mrb[153].mxu1  ;;  %v3456_v36 = vpop.f32.mrb[153].mxu0  ;;  %v6483_v0 = vld [vmem:[%s9694_s3 + $0x728] ss:$12 sps:$4 sm:$0xff]  }
 0x346   :  { %v4256_v11 = vadd.f32 %v4255_v40, %v7820_v61  ;;  %v5861_v10 = vpop.f32.mrb[154].mxu1  ;;  %v8386_v43 = vpop.f32.mrb[154].mxu0  ;;  %v6492_v40 = vld [vmem:[%s9694_s3 + $0x664] ss:$12 sps:$4 sm:$0xff]  }
 0x347   :  { %5049 = vst.msk [vmem:[%s9695_s4 + $0x150] sm:$0xff] %vm5006_vm1, %v4264_v2  ;;  %v4267_v29 = vadd.f32 %v5861_v10, %v7852_v49  ;;  %v4258_v60 = vpop.f32.mrb[155].mxu1  ;;  %v3459_v61 = vpop.f32.mrb[155].mxu0 }
 0x348   :  { %5047 = vst.msk [vmem:[%s9695_s4 + $0x140] sm:$0xff] %vm5006_vm1, %v4256_v11  ;;  %v4259_v46 = vadd.f32 %v4258_v60, %v7830_v12  ;;  %v6494_v60 = vld [vmem:[%s9694_s3 + $0x7a0] ss:$12 sps:$4 sm:$0xff]  }
 0x349   :  { %5050 = vst.msk [vmem:[%s9695_s4 + $0x158] sm:$0xff] %vm5006_vm1, %v4267_v29  ;;  %3669 = vmatmul.mubr.bf16.gmra.mrb[4].mxu0 %v6475_v32  ;;  %5967 = vmatmul.mubr.msk.bf16.gmra.mrb[4].mxu1 %vm2773_vm0, %v6479_v33  ;;  %v6490_v29 = vld [vmem:[%s9694_s3 + $0x660] ss:$12 sps:$4 sm:$0xff]  }
 0x34a   :  { %5048 = vst.msk [vmem:[%s9695_s4 + $0x148] sm:$0xff] %vm5006_vm1, %v4259_v46  ;;  %3676 = vmatprep.mubr.bf16.mxu0 %v6482_v55  ;;  %5970 = vmatprep.mubr.msk.bf16.mxu1 %vm2773_vm0, %v6483_v0  ;;  %v9757_v61 = vld [vmem:[#allocation54_spill] sm:$0xff] }
 0x34c   :  { %v5864_v49 = vpop.f32.mrb[156].mxu1  ;;  %v8414_v35 = vpop.f32.mrb[156].mxu0 }
 0x34d   :  { %v4280_v12 = vadd.f32 %v5864_v49, %v7886_v17  ;;  %v4271_v45 = vpop.f32.mrb[157].mxu1  ;;  %v3464_v56 = vpop.f32.mrb[157].mxu0  ;;  %v6488_v17 = vld [vmem:[%s9694_s3 + $0x758] ss:$12 sps:$4 sm:$0xff]  }
 0x34e   :  { %v4272_v28 = vadd.f32 %v4271_v45, %v7864_v23  ;;  %v5865_v31 = vpop.f32.mrb[158].mxu1  ;;  %v8424_v16 = vpop.f32.mrb[158].mxu0  ;;  %v6497_v45 = vld [vmem:[%s9694_s3 + $0x67c] ss:$12 sps:$4 sm:$0xff]   ;;  %v6498_v56 = vld [vmem:[%s9694_s3 + $0x7b8] ss:$12 sps:$4 sm:$0xff]  }
 0x34f   :  { %5053 = vst.msk [vmem:[%s9695_s4 + $0x170] sm:$0xff] %vm5006_vm1, %v4280_v12  ;;  %v4283_v48 = vadd.f32 %v5865_v31, %v7896_v9  ;;  %v4274_v7 = vpop.f32.mrb[159].mxu1  ;;  %v3467_v23 = vpop.f32.mrb[159].mxu0 }
 0x350   :  { %5051 = vst.msk [vmem:[%s9695_s4 + $0x160] sm:$0xff] %vm5006_vm1, %v4272_v28  ;;  %v4275_v1 = vadd.f32 %v4274_v7, %v7874_v38 }
 0x351   :  { %5054 = vst.msk [vmem:[%s9695_s4 + $0x178] sm:$0xff] %vm5006_vm1, %v4283_v48  ;;  %3677 = vmatmul.mubr.bf16.gmra.mrb[8].mxu0 %v6480_v6  ;;  %5971 = vmatmul.mubr.msk.bf16.gmra.mrb[8].mxu1 %vm2773_vm0, %v6484_v18  ;;  %v9758_v6 = vld [vmem:[#allocation60_spill] sm:$0xff] }
 0x352   :  { %5052 = vst.msk [vmem:[%s9695_s4 + $0x168] sm:$0xff] %vm5006_vm1, %v4275_v1  ;;  %3684 = vmatprep.mubr.bf16.mxu0 %v6487_v62  ;;  %5974 = vmatprep.mubr.msk.bf16.mxu1 %vm2773_vm0, %v6488_v17  ;;  %v9759_v62 = vld [vmem:[#allocation56_spill] sm:$0xff] }
 0x354   :  { %v5868_v9 = vpop.f32.mrb[160].mxu1  ;;  %v8452_v39 = vpop.f32.mrb[160].mxu0 }
 0x355   :  { %v4296_v38 = vadd.f32 %v5868_v9, %v7930_v54  ;;  %v4287_v41 = vpop.f32.mrb[161].mxu1  ;;  %v3472_v14 = vpop.f32.mrb[161].mxu0  ;;  %v6493_v54 = vld [vmem:[%s9694_s3 + $0x788] ss:$12 sps:$4 sm:$0xff]  }
 0x356   :  { %v4288_v42 = vadd.f32 %v4287_v41, %v7908_v58  ;;  %v5869_v21 = vpop.f32.mrb[162].mxu1  ;;  %v8462_v2 = vpop.f32.mrb[162].mxu0  ;;  %v6499_v41 = vld [vmem:[%s9694_s3 + $0x7d0] ss:$12 sps:$4 sm:$0xff]  }
 0x357   :  { %5057 = vst.msk [vmem:[%s9695_s4 + $0x190] sm:$0xff] %vm5006_vm1, %v4296_v38  ;;  %v4299_v36 = vadd.f32 %v5869_v21, %v7940_v50  ;;  %v4290_v32 = vpop.f32.mrb[163].mxu1  ;;  %v3475_v58 = vpop.f32.mrb[163].mxu0  ;;  %v6495_v38 = vld [vmem:[%s9694_s3 + $0x678] ss:$12 sps:$4 sm:$0xff]  }
 0x358   :  { %5055 = vst.msk [vmem:[%s9695_s4 + $0x180] sm:$0xff] %vm5006_vm1, %v4288_v42  ;;  %v4291_v33 = vadd.f32 %v4290_v32, %v7918_v63  ;;  %v9756_v63 = vld [vmem:[#allocation58_spill] sm:$0xff] }
 0x359   :  { %5058 = vst.msk [vmem:[%s9695_s4 + $0x198] sm:$0xff] %vm5006_vm1, %v4299_v36  ;;  %3685 = vmatmul.mubr.bf16.gmra.mrb[12].mxu0 %v6485_v8  ;;  %5975 = vmatmul.mubr.msk.bf16.gmra.mrb[12].mxu1 %vm2773_vm0, %v6489_v44  ;;  %v6502_v42 = vld [vmem:[%s9694_s3 + $0x694] ss:$12 sps:$4 sm:$0xff]  }
 0x35a   :  { %5056 = vst.msk [vmem:[%s9695_s4 + $0x188] sm:$0xff] %vm5006_vm1, %v4291_v33  ;;  %3692 = vmatprep.mubr.bf16.mxu0 %v6492_v40  ;;  %5978 = vmatprep.mubr.msk.bf16.mxu1 %vm2773_vm0, %v6493_v54  ;;  %v6500_v33 = vld [vmem:[%s9694_s3 + $0x690] ss:$12 sps:$4 sm:$0xff]  }
 0x35c   :  { %v5872_v50 = vpop.f32.mrb[164].mxu1  ;;  %v8490_v11 = vpop.f32.mrb[164].mxu0 }
 0x35d   :  { %v4312_v10 = vadd.f32 %v5872_v50, %v9756_v63  ;;  %v4303_v55 = vpop.f32.mrb[165].mxu1  ;;  %v3480_v0 = vpop.f32.mrb[165].mxu0  ;;  %v6504_v50 = vld [vmem:[%s9694_s3 + $0x800] ss:$12 sps:$4 sm:$0xff]  }
 0x35e   :  { %v4304_v46 = vadd.f32 %v4303_v55, %v9757_v61  ;;  %v5873_v49 = vpop.f32.mrb[166].mxu1  ;;  %v8500_v12 = vpop.f32.mrb[166].mxu0  ;;  %v6507_v0 = vld [vmem:[%s9694_s3 + $0x6ac] ss:$12 sps:$4 sm:$0xff]  }
 0x35f   :  { %5061 = vst.msk [vmem:[%s9695_s4 + $0x1b0] sm:$0xff] %vm5006_vm1, %v4312_v10  ;;  %v4315_v18 = vadd.f32 %v5873_v49, %v9758_v6  ;;  %v4306_v28 = vpop.f32.mrb[167].mxu1  ;;  %v3483_v31 = vpop.f32.mrb[167].mxu0  ;;  %v6509_v6 = vld [vmem:[%s9694_s3 + $0x830] ss:$12 sps:$4 sm:$0xff]  }
 0x360   :  { %5059 = vst.msk [vmem:[%s9695_s4 + $0x1a0] sm:$0xff] %vm5006_vm1, %v4304_v46  ;;  %v4307_v17 = vadd.f32 %v4306_v28, %v9759_v62  ;;  %v6512_v62 = vld [vmem:[%s9694_s3 + $0x6c4] ss:$12 sps:$4 sm:$0xff]  }
 0x361   :  { %5062 = vst.msk [vmem:[%s9695_s4 + $0x1b8] sm:$0xff] %vm5006_vm1, %v4315_v18  ;;  %3693 = vmatmul.mubr.bf16.gmra.mrb[16].mxu0 %v6490_v29  ;;  %5979 = vmatmul.mubr.msk.bf16.gmra.mrb[16].mxu1 %vm2773_vm0, %v6494_v60 }
 0x362   :  { %5060 = vst.msk [vmem:[%s9695_s4 + $0x1a8] sm:$0xff] %vm5006_vm1, %v4307_v17  ;;  %3700 = vmatprep.mubr.bf16.mxu0 %v6497_v45  ;;  %5982 = vmatprep.mubr.msk.bf16.mxu1 %vm2773_vm0, %v6498_v56  ;;  %v6505_v56 = vld [vmem:[%s9694_s3 + $0x6a8] ss:$12 sps:$4 sm:$0xff]  }
 0x364   :  { %v5876_v48 = vpop.f32.mrb[168].mxu1  ;;  %v8528_v7 = vpop.f32.mrb[168].mxu0 }
 0x365   :  { %v4328_v23 = vadd.f32 %v5876_v48, %v8034_v13  ;;  %v4319_v1 = vpop.f32.mrb[169].mxu1  ;;  %v3488_v9 = vpop.f32.mrb[169].mxu0  ;;  %v6503_v13 = vld [vmem:[%s9694_s3 + $0x7e8] ss:$12 sps:$4 sm:$0xff]  }
 0x366   :  { %v4320_v14 = vadd.f32 %v4319_v1, %v7996_v4  ;;  %v5877_v8 = vpop.f32.mrb[170].mxu1  ;;  %v8538_v44 = vpop.f32.mrb[170].mxu0 }
 0x367   :  { %5065 = vst.msk [vmem:[%s9695_s4 + $0x1d0] sm:$0xff] %vm5006_vm1, %v4328_v23  ;;  %v4331_v21 = vadd.f32 %v5877_v8, %v8044_v34  ;;  %v4322_v40 = vpop.f32.mrb[171].mxu1  ;;  %v3491_v4 = vpop.f32.mrb[171].mxu0 }
 0x368   :  { %5063 = vst.msk [vmem:[%s9695_s4 + $0x1c0] sm:$0xff] %vm5006_vm1, %v4320_v14  ;;  %v4323_v54 = vadd.f32 %v4322_v40, %v8006_v51  ;;  %v6514_v14 = vld [vmem:[%s9694_s3 + $0x860] ss:$12 sps:$4 sm:$0xff]  }
 0x369   :  { %5066 = vst.msk [vmem:[%s9695_s4 + $0x1d8] sm:$0xff] %vm5006_vm1, %v4331_v21  ;;  %3701 = vmatmul.mubr.bf16.gmra.mrb[20].mxu0 %v6495_v38  ;;  %5983 = vmatmul.mubr.msk.bf16.gmra.mrb[20].mxu1 %vm2773_vm0, %v6499_v41  ;;  %v6510_v41 = vld [vmem:[%s9694_s3 + $0x6c0] ss:$12 sps:$4 sm:$0xff]   ;;  %v6517_v21 = vld [vmem:[%s9694_s3 + $0x6dc] ss:$12 sps:$4 sm:$0xff]  }
 0x36a   :  { %5064 = vst.msk [vmem:[%s9695_s4 + $0x1c8] sm:$0xff] %vm5006_vm1, %v4323_v54  ;;  %3708 = vmatprep.mubr.bf16.mxu0 %v6502_v42  ;;  %5986 = vmatprep.mubr.msk.bf16.mxu1 %vm2773_vm0, %v6503_v13 }
 0x36c   :  { %v5880_v34 = vpop.f32.mrb[172].mxu1  ;;  %v8566_v36 = vpop.f32.mrb[172].mxu0 }
 0x36d   :  { %v4344_v51 = vadd.f32 %v5880_v34, %v8110_v25  ;;  %v4335_v32 = vpop.f32.mrb[173].mxu1  ;;  %v3496_v58 = vpop.f32.mrb[173].mxu0  ;;  %v6508_v25 = vld [vmem:[%s9694_s3 + $0x818] ss:$12 sps:$4 sm:$0xff]  }
 0x36e   :  { %v4336_v63 = vadd.f32 %v4335_v32, %v8072_v19  ;;  %v5881_v10 = vpop.f32.mrb[174].mxu1  ;;  %v8576_v55 = vpop.f32.mrb[174].mxu0  ;;  %v6515_v58 = vld [vmem:[%s9694_s3 + $0x6d8] ss:$12 sps:$4 sm:$0xff]  }
 0x36f   :  { %5069 = vst.msk [vmem:[%s9695_s4 + $0x1f0] sm:$0xff] %vm5006_vm1, %v4344_v51  ;;  %v4347_v29 = vadd.f32 %v5881_v10, %v8120_v26  ;;  %v4338_v60 = vpop.f32.mrb[175].mxu1  ;;  %v3499_v19 = vpop.f32.mrb[175].mxu0 }
 0x370   :  { %5067 = vst.msk [vmem:[%s9695_s4 + $0x1e0] sm:$0xff] %vm5006_vm1, %v4336_v63  ;;  %v4339_v61 = vadd.f32 %v4338_v60, %v8082_v59 }
 0x371   :  { %5070 = vst.msk [vmem:[%s9695_s4 + $0x1f8] sm:$0xff] %vm5006_vm1, %v4347_v29  ;;  %3709 = vmatmul.mubr.bf16.gmra.mrb[24].mxu0 %v6500_v33  ;;  %5987 = vmatmul.mubr.msk.bf16.gmra.mrb[24].mxu1 %vm2773_vm0, %v6504_v50  ;;  %v6519_v33 = vld [vmem:[%s9694_s3 + $0x890] ss:$12 sps:$4 sm:$0xff]  }
 0x372   :  { %5068 = vst.msk [vmem:[%s9695_s4 + $0x1e8] sm:$0xff] %vm5006_vm1, %v4339_v61  ;;  %3716 = vmatprep.mubr.bf16.mxu0 %v6507_v0  ;;  %5990 = vmatprep.mubr.msk.bf16.mxu1 %vm2773_vm0, %v6508_v25  ;;  %v6522_v0 = vld [vmem:[%s9694_s3 + $0x6f4] ss:$12 sps:$4 sm:$0xff]  }
 0x374   :  { %v5884_v26 = vpop.f32.mrb[176].mxu1  ;;  %v8604_v46 = vpop.f32.mrb[176].mxu0 }
 0x375   :  { %v4360_v59 = vadd.f32 %v5884_v26, %v8186_v15  ;;  %v4351_v49 = vpop.f32.mrb[177].mxu1  ;;  %v3504_v45 = vpop.f32.mrb[177].mxu0  ;;  %v6513_v15 = vld [vmem:[%s9694_s3 + $0x848] ss:$12 sps:$4 sm:$0xff]  }
 0x376   :  { %v4352_v18 = vadd.f32 %v4351_v49, %v8148_v24  ;;  %v5885_v28 = vpop.f32.mrb[178].mxu1  ;;  %v8614_v31 = vpop.f32.mrb[178].mxu0  ;;  %v6524_v49 = vld [vmem:[%s9694_s3 + $0x8c0] ss:$12 sps:$4 sm:$0xff]  }
 0x377   :  { %5073 = vst.msk [vmem:[%s9695_s4 + $0x210] sm:$0xff] %vm5006_vm1, %v4360_v59  ;;  %v4363_v17 = vadd.f32 %v5885_v28, %v8196_v22  ;;  %v4354_v48 = vpop.f32.mrb[179].mxu1  ;;  %v3507_v24 = vpop.f32.mrb[179].mxu0  ;;  %v6520_v59 = vld [vmem:[%s9694_s3 + $0x6f0] ss:$12 sps:$4 sm:$0xff]  }
 0x378   :  { %5071 = vst.msk [vmem:[%s9695_s4 + $0x200] sm:$0xff] %vm5006_vm1, %v4352_v18  ;;  %v4355_v23 = vadd.f32 %v4354_v48, %v8158_v5  ;;  %v6527_v18 = vld [vmem:[%s9694_s3 + $0x70c] ss:$12 sps:$4 sm:$0xff]  }
 0x379   :  { %5074 = vst.msk [vmem:[%s9695_s4 + $0x218] sm:$0xff] %vm5006_vm1, %v4363_v17  ;;  %3717 = vmatmul.mubr.bf16.gmra.mrb[28].mxu0 %v6505_v56  ;;  %5991 = vmatmul.mubr.msk.bf16.gmra.mrb[28].mxu1 %vm2773_vm0, %v6509_v6 }
 0x37a   :  { %5072 = vst.msk [vmem:[%s9695_s4 + $0x208] sm:$0xff] %vm5006_vm1, %v4355_v23  ;;  %3724 = vmatprep.mubr.bf16.mxu0 %v6512_v62  ;;  %5994 = vmatprep.mubr.msk.bf16.mxu1 %vm2773_vm0, %v6513_v15  ;;  %v6525_v23 = vld [vmem:[%s9694_s3 + $0x708] ss:$12 sps:$4 sm:$0xff]  }
 0x37c   :  { %v5888_v22 = vpop.f32.mrb[180].mxu1  ;;  %v8642_v1 = vpop.f32.mrb[180].mxu0 }
 0x37d   :  { %v4376_v5 = vadd.f32 %v5888_v22, %v8262_v47  ;;  %v4367_v9 = vpop.f32.mrb[181].mxu1  ;;  %v3512_v38 = vpop.f32.mrb[181].mxu0  ;;  %v6518_v47 = vld [vmem:[%s9694_s3 + $0x878] ss:$12 sps:$4 sm:$0xff]   ;;  %v6529_v22 = vld [vmem:[%s9694_s3 + $0x8f0] ss:$12 sps:$4 sm:$0xff]  }
 0x37e   :  { %v4368_v8 = vadd.f32 %v4367_v9, %v8224_v57  ;;  %v5889_v42 = vpop.f32.mrb[182].mxu1  ;;  %v8652_v13 = vpop.f32.mrb[182].mxu0 }
 0x37f   :  { %5077 = vst.msk [vmem:[%s9695_s4 + $0x230] sm:$0xff] %vm5006_vm1, %v4376_v5  ;;  %v4379_v40 = vadd.f32 %v5889_v42, %v8272_v3  ;;  %v4370_v4 = vpop.f32.mrb[183].mxu1  ;;  %v3515_v57 = vpop.f32.mrb[183].mxu0 }
 0x380   :  { %5075 = vst.msk [vmem:[%s9695_s4 + $0x220] sm:$0xff] %vm5006_vm1, %v4368_v8  ;;  %v4371_v54 = vadd.f32 %v4370_v4, %v8234_v37  ;;  %v6530_v4 = vld [vmem:[%s9694_s3 + $0x720] ss:$12 sps:$4 sm:$0xff]  }
 0x381   :  { %5078 = vst.msk [vmem:[%s9695_s4 + $0x238] sm:$0xff] %vm5006_vm1, %v4379_v40  ;;  %3725 = vmatmul.mubr.bf16.gmra.mrb[32].mxu0 %v6510_v41  ;;  %5995 = vmatmul.mubr.msk.bf16.gmra.mrb[32].mxu1 %vm2773_vm0, %v6514_v14  ;;  %v6532_v41 = vld [vmem:[%s9694_s3 + $0x724] ss:$12 sps:$4 sm:$0xff]   ;;  %v6534_v57 = vld [vmem:[%s9694_s3 + $0x920] ss:$12 sps:$4 sm:$0xff]  }
 0x382   :  { %5076 = vst.msk [vmem:[%s9695_s4 + $0x228] sm:$0xff] %vm5006_vm1, %v4371_v54  ;;  %3732 = vmatprep.mubr.bf16.mxu0 %v6517_v21  ;;  %5998 = vmatprep.mubr.msk.bf16.mxu1 %vm2773_vm0, %v6518_v47 }
 0x384   :  { %v5892_v3 = vpop.f32.mrb[184].mxu1  ;;  %v8680_v34 = vpop.f32.mrb[184].mxu0 }
 0x385   :  { %v4392_v37 = vadd.f32 %v5892_v3, %v8338_v52  ;;  %v4383_v51 = vpop.f32.mrb[185].mxu1  ;;  %v3520_v32 = vpop.f32.mrb[185].mxu0  ;;  %v6523_v52 = vld [vmem:[%s9694_s3 + $0x8a8] ss:$12 sps:$4 sm:$0xff]  }
 0x386   :  { %v4384_v50 = vadd.f32 %v4383_v51, %v8300_v20  ;;  %v5893_v63 = vpop.f32.mrb[186].mxu1  ;;  %v8690_v10 = vpop.f32.mrb[186].mxu0  ;;  %v6537_v51 = vld [vmem:[%s9694_s3 + $0x73c] ss:$12 sps:$4 sm:$0xff]  }
 0x387   :  { %5081 = vst.msk [vmem:[%s9695_s4 + $0x250] sm:$0xff] %vm5006_vm1, %v4392_v37  ;;  %v4395_v25 = vadd.f32 %v5893_v63, %v8348_v53  ;;  %v4386_v29 = vpop.f32.mrb[187].mxu1  ;;  %v3523_v20 = vpop.f32.mrb[187].mxu0 }
 0x388   :  { %5079 = vst.msk [vmem:[%s9695_s4 + $0x240] sm:$0xff] %vm5006_vm1, %v4384_v50  ;;  %v4387_v60 = vadd.f32 %v4386_v29, %v8310_v27 }
 0x389   :  { %5082 = vst.msk [vmem:[%s9695_s4 + $0x258] sm:$0xff] %vm5006_vm1, %v4395_v25  ;;  %3733 = vmatmul.mubr.bf16.gmra.mrb[36].mxu0 %v6515_v58  ;;  %5999 = vmatmul.mubr.msk.bf16.gmra.mrb[36].mxu1 %vm2773_vm0, %v6519_v33  ;;  %v6539_v25 = vld [vmem:[%s9694_s3 + $0x950] ss:$12 sps:$4 sm:$0xff]  }
 0x38a   :  { %5080 = vst.msk [vmem:[%s9695_s4 + $0x248] sm:$0xff] %vm5006_vm1, %v4387_v60  ;;  %3740 = vmatprep.mubr.bf16.mxu0 %v6522_v0  ;;  %6002 = vmatprep.mubr.msk.bf16.mxu1 %vm2773_vm0, %v6523_v52  ;;  %v6535_v52 = vld [vmem:[%s9694_s3 + $0x738] ss:$12 sps:$4 sm:$0xff]  }
 0x38c   :  { %v5896_v53 = vpop.f32.mrb[188].mxu1  ;;  %v8718_v19 = vpop.f32.mrb[188].mxu0 }
 0x38d   :  { %v4408_v27 = vadd.f32 %v5896_v53, %v8414_v35  ;;  %v4399_v61 = vpop.f32.mrb[189].mxu1  ;;  %v3528_v26 = vpop.f32.mrb[189].mxu0  ;;  %v6528_v35 = vld [vmem:[%s9694_s3 + $0x8d8] ss:$12 sps:$4 sm:$0xff]   ;;  %v6542_v53 = vld [vmem:[%s9694_s3 + $0x754] ss:$12 sps:$4 sm:$0xff]  }
 0x38e   :  { %v4400_v45 = vadd.f32 %v4399_v61, %v8376_v30  ;;  %v5897_v56 = vpop.f32.mrb[190].mxu1  ;;  %v8728_v6 = vpop.f32.mrb[190].mxu0 }
 0x38f   :  { %5085 = vst.msk [vmem:[%s9695_s4 + $0x270] sm:$0xff] %vm5006_vm1, %v4408_v27  ;;  %v4411_v28 = vadd.f32 %v5897_v56, %v8424_v16  ;;  %v4402_v62 = vpop.f32.mrb[191].mxu1  ;;  %v3531_v30 = vpop.f32.mrb[191].mxu0  ;;  %v6540_v56 = vld [vmem:[%s9694_s3 + $0x750] ss:$12 sps:$4 sm:$0xff]  }
 0x390   :  { %5083 = vst.msk [vmem:[%s9695_s4 + $0x260] sm:$0xff] %vm5006_vm1, %v4400_v45  ;;  %v4403_v15 = vadd.f32 %v4402_v62, %v8386_v43  ;;  %v6547_v30 = vld [vmem:[%s9694_s3 + $0x76c] ss:$12 sps:$4 sm:$0xff]  }
 0x391   :  { %5086 = vst.msk [vmem:[%s9695_s4 + $0x278] sm:$0xff] %vm5006_vm1, %v4411_v28  ;;  %3741 = vmatmul.mubr.bf16.gmra.mrb[40].mxu0 %v6520_v59  ;;  %6003 = vmatmul.mubr.msk.bf16.gmra.mrb[40].mxu1 %vm2773_vm0, %v6524_v49 }
 0x392   :  { %5084 = vst.msk [vmem:[%s9695_s4 + $0x268] sm:$0xff] %vm5006_vm1, %v4403_v15  ;;  %3748 = vmatprep.mubr.bf16.mxu0 %v6527_v18  ;;  %6006 = vmatprep.mubr.msk.bf16.mxu1 %vm2773_vm0, %v6528_v35  ;;  %v6544_v18 = vld [vmem:[%s9694_s3 + $0x980] ss:$12 sps:$4 sm:$0xff]  }
 0x394   :  { %v5900_v16 = vpop.f32.mrb[192].mxu1  ;;  %v8756_v17 = vpop.f32.mrb[192].mxu0 }
 0x395   :  { %v4424_v43 = vadd.f32 %v5900_v16, %v8490_v11  ;;  %v4415_v48 = vpop.f32.mrb[193].mxu1  ;;  %v3536_v24 = vpop.f32.mrb[193].mxu0  ;;  %v6533_v11 = vld [vmem:[%s9694_s3 + $0x908] ss:$12 sps:$4 sm:$0xff]  }
 0x396   :  { %v4416_v5 = vadd.f32 %v4415_v48, %v8452_v39  ;;  %v5901_v9 = vpop.f32.mrb[194].mxu1  ;;  %v8766_v38 = vpop.f32.mrb[194].mxu0 }
 0x397   :  { %5089 = vst.msk [vmem:[%s9695_s4 + $0x290] sm:$0xff] %vm5006_vm1, %v4424_v43  ;;  %v4427_v14 = vadd.f32 %v5901_v9, %v8500_v12  ;;  %v4418_v8 = vpop.f32.mrb[195].mxu1  ;;  %v3539_v39 = vpop.f32.mrb[195].mxu0 }
 0x398   :  { %5087 = vst.msk [vmem:[%s9695_s4 + $0x280] sm:$0xff] %vm5006_vm1, %v4416_v5  ;;  %v4419_v42 = vadd.f32 %v4418_v8, %v8462_v2  ;;  %v6549_v5 = vld [vmem:[%s9694_s3 + $0x9b0] ss:$12 sps:$4 sm:$0xff]   ;;  %v6553_v8 = vld [vmem:[%s9694_s3 + $0x9c8] ss:$12 sps:$4 sm:$0xff]  }
 0x399   :  { %5090 = vst.msk [vmem:[%s9695_s4 + $0x298] sm:$0xff] %vm5006_vm1, %v4427_v14  ;;  %3749 = vmatmul.mubr.bf16.gmra.mrb[44].mxu0 %v6525_v23  ;;  %6007 = vmatmul.mubr.msk.bf16.gmra.mrb[44].mxu1 %vm2773_vm0, %v6529_v22  ;;  %v6545_v22 = vld [vmem:[%s9694_s3 + $0x768] ss:$12 sps:$4 sm:$0xff]   ;;  %v6552_v14 = vld [vmem:[%s9694_s3 + $0x784] ss:$12 sps:$4 sm:$0xff]  }
 0x39a   :  { %5088 = vst.msk [vmem:[%s9695_s4 + $0x288] sm:$0xff] %vm5006_vm1, %v4419_v42  ;;  %3756 = vmatprep.mubr.bf16.mxu0 %v6532_v41  ;;  %6010 = vmatprep.mubr.msk.bf16.mxu1 %vm2773_vm0, %v6533_v11 }
 0x39c   :  { %v5904_v12 = vpop.f32.mrb[196].mxu1  ;;  %v8794_v21 = vpop.f32.mrb[196].mxu0 }
 0x39d   :  { %v4440_v2 = vadd.f32 %v5904_v12, %v8566_v36  ;;  %v4431_v47 = vpop.f32.mrb[197].mxu1  ;;  %v3544_v40 = vpop.f32.mrb[197].mxu0  ;;  %v6538_v36 = vld [vmem:[%s9694_s3 + $0x938] ss:$12 sps:$4 sm:$0xff]  }
 0x39e   :  { %v4432_v54 = vadd.f32 %v4431_v47, %v8528_v7  ;;  %v5905_v3 = vpop.f32.mrb[198].mxu1  ;;  %v8804_v37 = vpop.f32.mrb[198].mxu0 }
 0x39f   :  { %5093 = vst.msk [vmem:[%s9695_s4 + $0x2b0] sm:$0xff] %vm5006_vm1, %v4440_v2  ;;  %v4443_v32 = vadd.f32 %v5905_v3, %v8576_v55  ;;  %v4434_v58 = vpop.f32.mrb[199].mxu1  ;;  %v3547_v7 = vpop.f32.mrb[199].mxu0 }
 0x3a0   :  { %5091 = vst.msk [vmem:[%s9695_s4 + $0x2a0] sm:$0xff] %vm5006_vm1, %v4432_v54  ;;  %v4435_v33 = vadd.f32 %v4434_v58, %v8538_v44 }
 0x3a1   :  { %5094 = vst.msk [vmem:[%s9695_s4 + $0x2b8] sm:$0xff] %vm5006_vm1, %v4443_v32  ;;  %3757 = vmatmul.mubr.bf16.gmra.mrb[48].mxu0 %v6530_v4  ;;  %6011 = vmatmul.mubr.msk.bf16.gmra.mrb[48].mxu1 %vm2773_vm0, %v6534_v57  ;;  %v6550_v4 = vld [vmem:[%s9694_s3 + $0x780] ss:$12 sps:$4 sm:$0xff]  }
 0x3a2   :  { %5092 = vst.msk [vmem:[%s9695_s4 + $0x2a8] sm:$0xff] %vm5006_vm1, %v4435_v33  ;;  %3764 = vmatprep.mubr.bf16.mxu0 %v6537_v51  ;;  %6014 = vmatprep.mubr.msk.bf16.mxu1 %vm2773_vm0, %v6538_v36  ;;  %v6554_v57 = vld [vmem:[%s9694_s3 + $0x9e0] ss:$12 sps:$4 sm:$0xff]   ;;  %v6557_v51 = vld [vmem:[%s9694_s3 + $0x79c] ss:$12 sps:$4 sm:$0xff]  }
 0x3a3   :  { %v6558_v36 = vld [vmem:[%s9694_s3 + $0x9f8] ss:$12 sps:$4 sm:$0xff]  }
 0x3a4   :  { %v5908_v55 = vpop.f32.mrb[200].mxu1  ;;  %v8832_v50 = vpop.f32.mrb[200].mxu0 }
 0x3a5   :  { %v4456_v44 = vadd.f32 %v5908_v55, %v8642_v1  ;;  %v4447_v63 = vpop.f32.mrb[201].mxu1  ;;  %v3552_v0 = vpop.f32.mrb[201].mxu0  ;;  %v6543_v1 = vld [vmem:[%s9694_s3 + $0x968] ss:$12 sps:$4 sm:$0xff]  }
 0x3a6   :  { %v4448_v29 = vadd.f32 %v4447_v63, %v8604_v46  ;;  %v5909_v20 = vpop.f32.mrb[202].mxu1  ;;  %v8842_v60 = vpop.f32.mrb[202].mxu0 }
 0x3a7   :  { %5097 = vst.msk [vmem:[%s9695_s4 + $0x2d0] sm:$0xff] %vm5006_vm1, %v4456_v44  ;;  %v4459_v27 = vadd.f32 %v5909_v20, %v8652_v13  ;;  %v4450_v61 = vpop.f32.mrb[203].mxu1  ;;  %v3555_v46 = vpop.f32.mrb[203].mxu0 }
 0x3a8   :  { %5095 = vst.msk [vmem:[%s9695_s4 + $0x2c0] sm:$0xff] %vm5006_vm1, %v4448_v29  ;;  %v4451_v26 = vadd.f32 %v4450_v61, %v8614_v31 }
 0x3a9   :  { %5098 = vst.msk [vmem:[%s9695_s4 + $0x2d8] sm:$0xff] %vm5006_vm1, %v4459_v27  ;;  %3765 = vmatmul.mubr.bf16.gmra.mrb[52].mxu0 %v6535_v52  ;;  %6015 = vmatmul.mubr.msk.bf16.gmra.mrb[52].mxu1 %vm2773_vm0, %v6539_v25  ;;  %v6555_v52 = vld [vmem:[%s9694_s3 + $0x798] ss:$12 sps:$4 sm:$0xff]   ;;  %v6559_v25 = vld [vmem:[%s9694_s3 + $0xa10] ss:$12 sps:$4 sm:$0xff]  }
 0x3aa   :  { %5096 = vst.msk [vmem:[%s9695_s4 + $0x2c8] sm:$0xff] %vm5006_vm1, %v4451_v26  ;;  %3772 = vmatprep.mubr.bf16.mxu0 %v6542_v53  ;;  %6018 = vmatprep.mubr.msk.bf16.mxu1 %vm2773_vm0, %v6543_v1  ;;  %v6562_v53 = vld [vmem:[%s9694_s3 + $0x7b4] ss:$12 sps:$4 sm:$0xff]  }
 0x3ab   :  { %v6563_v1 = vld [vmem:[%s9694_s3 + $0xa28] ss:$12 sps:$4 sm:$0xff]  }
 0x3ac   :  { %v5912_v13 = vpop.f32.mrb[204].mxu1  ;;  %v3558_v59 = vpop.f32.mrb[204].mxu0 }
 0x3ad   :  { %v4472_v31 = vadd.f32 %v5912_v13, %v8718_v19  ;;  %v4463_v49 = vpop.f32.mrb[205].mxu1  ;;  %v3560_v45 = vpop.f32.mrb[205].mxu0  ;;  %v6548_v19 = vld [vmem:[%s9694_s3 + $0x998] ss:$12 sps:$4 sm:$0xff]  }
 0x3ae   :  { %v4464_v35 = vadd.f32 %v4463_v49, %v8680_v34  ;;  %v5913_v28 = vpop.f32.mrb[206].mxu1  ;;  %v3561_v62 = vpop.f32.mrb[206].mxu0 }
 0x3af   :  { %5101 = vst.msk [vmem:[%s9695_s4 + $0x2f0] sm:$0xff] %vm5006_vm1, %v4472_v31  ;;  %v4475_v15 = vadd.f32 %v5913_v28, %v8728_v6  ;;  %v4466_v16 = vpop.f32.mrb[207].mxu1  ;;  %v3563_v43 = vpop.f32.mrb[207].mxu0 }
 0x3b0   :  { %5099 = vst.msk [vmem:[%s9695_s4 + $0x2e0] sm:$0xff] %vm5006_vm1, %v4464_v35  ;;  %v4467_v34 = vadd.f32 %v4466_v16, %v8690_v10 }
 0x3b1   :  { %5102 = vst.msk [vmem:[%s9695_s4 + $0x2f8] sm:$0xff] %vm5006_vm1, %v4475_v15  ;;  %3773 = vmatmul.mubr.bf16.gmra.mrb[56].mxu0 %v6540_v56  ;;  %6019 = vmatmul.mubr.msk.bf16.gmra.mrb[56].mxu1 %vm2773_vm0, %v6544_v18  ;;  %v6560_v56 = vld [vmem:[%s9694_s3 + $0x7b0] ss:$12 sps:$4 sm:$0xff]   ;;  %v6564_v18 = vld [vmem:[%s9694_s3 + $0xa40] ss:$12 sps:$4 sm:$0xff]  }
 0x3b2   :  { %5100 = vst.msk [vmem:[%s9695_s4 + $0x2e8] sm:$0xff] %vm5006_vm1, %v4467_v34  ;;  %3780 = vmatprep.mubr.bf16.mxu0 %v6547_v30  ;;  %6022 = vmatprep.mubr.msk.bf16.mxu1 %vm2773_vm0, %v6548_v19  ;;  %v6567_v30 = vld [vmem:[%s9694_s3 + $0x7cc] ss:$12 sps:$4 sm:$0xff]  }
 0x3b3   :  { %v6568_v19 = vld [vmem:[%s9694_s3 + $0xa58] ss:$12 sps:$4 sm:$0xff]  }
 0x3b4   :  { %v5916_v6 = vpop.f32.mrb[208].mxu1  ;;  %v3566_v48 = vpop.f32.mrb[208].mxu0 }
 0x3b5   :  { %v4488_v10 = vadd.f32 %v5916_v6, %v8794_v21  ;;  %v4479_v24 = vpop.f32.mrb[209].mxu1  ;;  %v3568_v23 = vpop.f32.mrb[209].mxu0 }
 0x3b6   :  { %v4480_v9 = vadd.f32 %v4479_v24, %v8756_v17  ;;  %v5917_v41 = vpop.f32.mrb[210].mxu1  ;;  %v3569_v11 = vpop.f32.mrb[210].mxu0  ;;  %v6565_v23 = vld [vmem:[%s9694_s3 + $0x7c8] ss:$12 sps:$4 sm:$0xff]  }
 0x3b7   :  { %5105 = vst.msk [vmem:[%s9695_s4 + $0x310] sm:$0xff] %vm5006_vm1, %v4488_v10  ;;  %v4491_v39 = vadd.f32 %v5917_v41, %v8804_v37  ;;  %v4482_v42 = vpop.f32.mrb[211].mxu1  ;;  %v3571_v12 = vpop.f32.mrb[211].mxu0 }
 0x3b8   :  { %5103 = vst.msk [vmem:[%s9695_s4 + $0x300] sm:$0xff] %vm5006_vm1, %v4480_v9  ;;  %v4483_v17 = vadd.f32 %v4482_v42, %v8766_v38 }
 0x3b9   :  { %5106 = vst.msk [vmem:[%s9695_s4 + $0x318] sm:$0xff] %vm5006_vm1, %v4491_v39  ;;  %3781 = vmatmul.mubr.bf16.gmra.mrb[60].mxu0 %v6545_v22  ;;  %6023 = vmatmul.mubr.msk.bf16.gmra.mrb[60].mxu1 %vm2773_vm0, %v6549_v5  ;;  %v6569_v22 = vld [vmem:[%s9694_s3 + $0xa70] ss:$12 sps:$4 sm:$0xff]  }
 0x3ba   :  { %5104 = vst.msk [vmem:[%s9695_s4 + $0x308] sm:$0xff] %vm5006_vm1, %v4483_v17  ;;  %3788 = vmatprep.mubr.bf16.mxu0 %v6552_v14  ;;  %6026 = vmatprep.mubr.msk.bf16.mxu1 %vm2773_vm0, %v6553_v8  ;;  %v6573_v14 = vld [vmem:[%s9694_s3 + $0xa88] ss:$12 sps:$4 sm:$0xff]  }
 0x3bc   :  { %v5920_v21 = vpop.f32.mrb[212].mxu1  ;;  %v3574_v2 = vpop.f32.mrb[212].mxu0 }
 0x3bd   :  { %v4504_v47 = vadd.f32 %v5920_v21, %v3558_v59  ;;  %v4495_v38 = vpop.f32.mrb[213].mxu1  ;;  %v3576_v40 = vpop.f32.mrb[213].mxu0 }
 0x3be   :  { %v4496_v54 = vadd.f32 %v4495_v38, %v8832_v50  ;;  %v5921_v3 = vpop.f32.mrb[214].mxu1  ;;  %v3577_v37 = vpop.f32.mrb[214].mxu0  ;;  %v6574_v38 = vld [vmem:[%s9694_s3 + $0xaa0] ss:$12 sps:$4 sm:$0xff]  }
 0x3bf   :  { %5109 = vst.msk [vmem:[%s9695_s4 + $0x330] sm:$0xff] %vm5006_vm1, %v4504_v47  ;;  %v4507_v32 = vadd.f32 %v5921_v3, %v3561_v62  ;;  %v4498_v58 = vpop.f32.mrb[215].mxu1  ;;  %v3579_v7 = vpop.f32.mrb[215].mxu0  ;;  %v6570_v47 = vld [vmem:[%s9694_s3 + $0x7e0] ss:$12 sps:$4 sm:$0xff]  }
 0x3c0   :  { %5107 = vst.msk [vmem:[%s9695_s4 + $0x320] sm:$0xff] %vm5006_vm1, %v4496_v54  ;;  %v4499_v33 = vadd.f32 %v4498_v58, %v8842_v60  ;;  %v6577_v54 = vld [vmem:[%s9694_s3 + $0x7fc] ss:$12 sps:$4 sm:$0xff]  }
 0x3c1   :  { %5110 = vst.msk [vmem:[%s9695_s4 + $0x338] sm:$0xff] %vm5006_vm1, %v4507_v32  ;;  %3789 = vmatmul.mubr.bf16.gmra.mrb[64].mxu0 %v6550_v4  ;;  %6027 = vmatmul.mubr.msk.bf16.gmra.mrb[64].mxu1 %vm2773_vm0, %v6554_v57 }
 0x3c2   :  { %5108 = vst.msk [vmem:[%s9695_s4 + $0x328] sm:$0xff] %vm5006_vm1, %v4499_v33  ;;  %3796 = vmatprep.mubr.bf16.mxu0 %v6557_v51  ;;  %6030 = vmatprep.mubr.msk.bf16.mxu1 %vm2773_vm0, %v6558_v36  ;;  %v6575_v33 = vld [vmem:[%s9694_s3 + $0x7f8] ss:$12 sps:$4 sm:$0xff]  }
 0x3c4   :  { %v5924_v55 = vpop.f32.mrb[216].mxu1  ;;  %v3582_v50 = vpop.f32.mrb[216].mxu0 }
 0x3c5   :  { %v4520_v44 = vadd.f32 %v5924_v55, %v3574_v2  ;;  %v4511_v63 = vpop.f32.mrb[217].mxu1  ;;  %v3584_v0 = vpop.f32.mrb[217].mxu0 }
 0x3c6   :  { %v4512_v29 = vadd.f32 %v4511_v63, %v3566_v48  ;;  %v5925_v20 = vpop.f32.mrb[218].mxu1  ;;  %v3585_v60 = vpop.f32.mrb[218].mxu0 }
 0x3c7   :  { %5113 = vst.msk [vmem:[%s9695_s4 + $0x350] sm:$0xff] %vm5006_vm1, %v4520_v44  ;;  %v4523_v27 = vadd.f32 %v5925_v20, %v3577_v37  ;;  %v4514_v61 = vpop.f32.mrb[219].mxu1  ;;  %v3587_v46 = vpop.f32.mrb[219].mxu0 }
 0x3c8   :  { %5111 = vst.msk [vmem:[%s9695_s4 + $0x340] sm:$0xff] %vm5006_vm1, %v4512_v29  ;;  %v4515_v26 = vadd.f32 %v4514_v61, %v3569_v11  ;;  %v6572_v11 = vld [vmem:[%s9694_s3 + $0x7e4] ss:$12 sps:$4 sm:$0xff]  }
 0x3c9   :  { %5114 = vst.msk [vmem:[%s9695_s4 + $0x358] sm:$0xff] %vm5006_vm1, %v4523_v27  ;;  %3797 = vmatmul.mubr.bf16.gmra.mrb[68].mxu0 %v6555_v52  ;;  %6031 = vmatmul.mubr.msk.bf16.gmra.mrb[68].mxu1 %vm2773_vm0, %v6559_v25 }
 0x3ca   :  { %5112 = vst.msk [vmem:[%s9695_s4 + $0x348] sm:$0xff] %vm5006_vm1, %v4515_v26  ;;  %3804 = vmatprep.mubr.bf16.mxu0 %v6562_v53  ;;  %6034 = vmatprep.mubr.msk.bf16.mxu1 %vm2773_vm0, %v6563_v1 }
 0x3cc   :  { %v5928_v13 = vpop.f32.mrb[220].mxu1  ;;  %v3590_v59 = vpop.f32.mrb[220].mxu0 }
 0x3cd   :  { %v4527_v31 = vpop.f32.mrb[221].mxu1  ;;  %v4536_v49 = vadd.f32 %v5928_v13, %v3590_v59  ;;  %v3592_v45 = vpop.f32.mrb[221].mxu0 }
 0x3ce   :  { %v4528_v35 = vadd.f32 %v4527_v31, %v3582_v50  ;;  %v5929_v28 = vpop.f32.mrb[222].mxu1  ;;  %v3593_v62 = vpop.f32.mrb[222].mxu0 }
 0x3cf   :  { %5117 = vst.msk [vmem:[%s9695_s4 + $0x370] sm:$0xff] %vm5006_vm1, %v4536_v49  ;;  %v4530_v15 = vpop.f32.mrb[223].mxu1  ;;  %v4539_v16 = vadd.f32 %v5929_v28, %v3593_v62  ;;  %v3595_v43 = vpop.f32.mrb[223].mxu0 }
 0x3d0   :  { %5115 = vst.msk [vmem:[%s9695_s4 + $0x360] sm:$0xff] %vm5006_vm1, %v4528_v35  ;;  %v4531_v34 = vadd.f32 %v4530_v15, %v3585_v60 }
 0x3d1   :  { %5118 = vst.msk [vmem:[%s9695_s4 + $0x378] sm:$0xff] %vm5006_vm1, %v4539_v16  ;;  %3805 = vmatmul.mubr.bf16.gmra.mrb[72].mxu0 %v6560_v56  ;;  %6035 = vmatmul.mubr.msk.bf16.gmra.mrb[72].mxu1 %vm2773_vm0, %v6564_v18 }
 0x3d2   :  { %5116 = vst.msk [vmem:[%s9695_s4 + $0x368] sm:$0xff] %vm5006_vm1, %v4531_v34  ;;  %3812 = vmatprep.mubr.bf16.mxu0 %v6567_v30  ;;  %6038 = vmatprep.mubr.msk.bf16.mxu1 %vm2773_vm0, %v6568_v19 }
 0x3d4   :  { %v3598_v6 = vpop.f32.mrb[224].mxu0  ;;  %v5932_v48 = vpop.f32.mrb[224].mxu1 }
 0x3d5   :  { %v3600_v10 = vpop.f32.mrb[225].mxu0  ;;  %v4543_v24 = vpop.f32.mrb[225].mxu1 }
 0x3d6   :  { %v4544_v5 = vadd.f32 %v4543_v24, %v3598_v6  ;;  %v3601_v9 = vpop.f32.mrb[226].mxu0  ;;  %v5933_v41 = vpop.f32.mrb[226].mxu1 }
 0x3d7   :  { %v3603_v8 = vpop.f32.mrb[227].mxu0  ;;  %v4546_v39 = vpop.f32.mrb[227].mxu1 }
 0x3d8   :  { %5119 = vst.msk [vmem:[%s9695_s4 + $0x380] sm:$0xff] %vm5006_vm1, %v4544_v5  ;;  %v4547_v42 = vadd.f32 %v4546_v39, %v3601_v9 }
 0x3d9   :  { %3813 = vmatmul.mubr.bf16.gmra.mrb[76].mxu0 %v6565_v23  ;;  %6039 = vmatmul.mubr.msk.bf16.gmra.mrb[76].mxu1 %vm2773_vm0, %v6569_v22 }
 0x3da   :  { %5120 = vst.msk [vmem:[%s9695_s4 + $0x388] sm:$0xff] %vm5006_vm1, %v4547_v42  ;;  %3820 = vmatprep.mubr.bf16.mxu0 %v6572_v11  ;;  %6042 = vmatprep.mubr.msk.bf16.mxu1 %vm2773_vm0, %v6573_v14 }
 0x3dc   :  { %v3606_v12 = vpop.f32.mrb[228].mxu0  ;;  %v5936_v17 = vpop.f32.mrb[228].mxu1 }
 0x3dd   :  { %v4552_v21 = vadd.f32 %v5932_v48, %v3606_v12  ;;  %v3608_v2 = vpop.f32.mrb[229].mxu0  ;;  %v4559_v40 = vpop.f32.mrb[229].mxu1 }
 0x3de   :  { %v3609_v4 = vpop.f32.mrb[230].mxu0  ;;  %v5937_v57 = vpop.f32.mrb[230].mxu1 }
 0x3df   :  { %5121 = vst.msk [vmem:[%s9695_s4 + $0x390] sm:$0xff] %vm5006_vm1, %v4552_v21  ;;  %v4555_v3 = vadd.f32 %v5933_v41, %v3609_v4  ;;  %v3611_v37 = vpop.f32.mrb[231].mxu0  ;;  %v4562_v51 = vpop.f32.mrb[231].mxu1 }
 0x3e1   :  { %5122 = vst.msk [vmem:[%s9695_s4 + $0x398] sm:$0xff] %vm5006_vm1, %v4555_v3  ;;  %3821 = vmatmul.mubr.bf16.gmra.mrb[80].mxu0 %v6570_v47  ;;  %6043 = vmatmul.mubr.msk.bf16.gmra.mrb[80].mxu1 %vm2773_vm0, %v6574_v38 }
 0x3e2   :  { %3828 = vmatprep.mubr.bf16.mxu0 %v6577_v54 }
 0x3e4   :  { %v3614_v36 = vpop.f32.mrb[232].mxu0  ;;  %v5940_v32 = vpop.f32.mrb[232].mxu1 }
 0x3e5   :  { %v4560_v58 = vadd.f32 %v4559_v40, %v3614_v36  ;;  %v3616_v7 = vpop.f32.mrb[233].mxu0  ;;  %v4575_v55 = vpop.f32.mrb[233].mxu1 }
 0x3e6   :  { %v3617_v50 = vpop.f32.mrb[234].mxu0  ;;  %v5941_v44 = vpop.f32.mrb[234].mxu1 }
 0x3e7   :  { %5123 = vst.msk [vmem:[%s9695_s4 + $0x3a0] sm:$0xff] %vm5006_vm1, %v4560_v58  ;;  %v4563_v63 = vadd.f32 %v4562_v51, %v3617_v50  ;;  %v3619_v0 = vpop.f32.mrb[235].mxu0  ;;  %v4578_v52 = vpop.f32.mrb[235].mxu1 }
 0x3e9   :  { %5124 = vst.msk [vmem:[%s9695_s4 + $0x3a8] sm:$0xff] %vm5006_vm1, %v4563_v63  ;;  %3829 = vmatmul.mubr.bf16.gmra.mrb[84].mxu0 %v6575_v33 }
 0x3ec   :  { %v3622_v25 = vpop.f32.mrb[236].mxu0  ;;  %v5944_v29 = vpop.f32.mrb[236].mxu1 }
 0x3ed   :  { %v4568_v20 = vadd.f32 %v5936_v17, %v3622_v25  ;;  %v3624_v60 = vpop.f32.mrb[237].mxu0  ;;  %v4591_v53 = vpop.f32.mrb[237].mxu1 }
 0x3ee   :  { %v3625_v1 = vpop.f32.mrb[238].mxu0  ;;  %v5945_v27 = vpop.f32.mrb[238].mxu1 }
 0x3ef   :  { %5125 = vst.msk [vmem:[%s9695_s4 + $0x3b0] sm:$0xff] %vm5006_vm1, %v4568_v20  ;;  %v4571_v61 = vadd.f32 %v5937_v57, %v3625_v1  ;;  %v3627_v46 = vpop.f32.mrb[239].mxu0  ;;  %v4594_v26 = vpop.f32.mrb[239].mxu1 }
 0x3f1   :  { %5126 = vst.msk [vmem:[%s9695_s4 + $0x3b8] sm:$0xff] %vm5006_vm1, %v4571_v61 }
 0x3f4   :  { %v3630_v13 = vpop.f32.mrb[240].mxu0  ;;  %v5948_v59 = vpop.f32.mrb[240].mxu1 }
 0x3f5   :  { %v4576_v31 = vadd.f32 %v4575_v55, %v3630_v13  ;;  %v3632_v49 = vpop.f32.mrb[241].mxu0  ;;  %v4607_v45 = vpop.f32.mrb[241].mxu1 }
 0x3f6   :  { %v3633_v56 = vpop.f32.mrb[242].mxu0  ;;  %v5949_v18 = vpop.f32.mrb[242].mxu1 }
 0x3f7   :  { %5127 = vst.msk [vmem:[%s9695_s4 + $0x3c0] sm:$0xff] %vm5006_vm1, %v4576_v31  ;;  %v4579_v35 = vadd.f32 %v4578_v52, %v3633_v56  ;;  %v3635_v28 = vpop.f32.mrb[243].mxu0  ;;  %v4610_v62 = vpop.f32.mrb[243].mxu1 }
 0x3f9   :  { %5128 = vst.msk [vmem:[%s9695_s4 + $0x3c8] sm:$0xff] %vm5006_vm1, %v4579_v35 }
 0x3fc   :  { %v3638_v30 = vpop.f32.mrb[244].mxu0  ;;  %v9097_v19 = vpop.f32.mrb[244].mxu1 }
 0x3fd   :  { %v4584_v15 = vadd.f32 %v5940_v32, %v3638_v30  ;;  %v3640_v16 = vpop.f32.mrb[245].mxu0  ;;  %v4623_v43 = vpop.f32.mrb[245].mxu1 }
 0x3fe   :  { %v3641_v34 = vpop.f32.mrb[246].mxu0  ;;  %v9099_v6 = vpop.f32.mrb[246].mxu1 }
 0x3ff   :  { %5129 = vst.msk [vmem:[%s9695_s4 + $0x3d0] sm:$0xff] %vm5006_vm1, %v4584_v15  ;;  %v4587_v48 = vadd.f32 %v5941_v44, %v3641_v34  ;;  %v3643_v10 = vpop.f32.mrb[247].mxu0  ;;  %v4626_v24 = vpop.f32.mrb[247].mxu1 }
 0x401   :  { %5130 = vst.msk [vmem:[%s9695_s4 + $0x3d8] sm:$0xff] %vm5006_vm1, %v4587_v48 }
 0x404   :  { %v3646_v23 = vpop.f32.mrb[248].mxu0  ;;  %v9109_v22 = vpop.f32.mrb[248].mxu1 }
 0x405   :  { %v4592_v5 = vadd.f32 %v4591_v53, %v3646_v23  ;;  %v3648_v9 = vpop.f32.mrb[249].mxu0  ;;  %v9111_v41 = vpop.f32.mrb[249].mxu1 }
 0x406   :  { %v3649_v11 = vpop.f32.mrb[250].mxu0  ;;  %v9113_v14 = vpop.f32.mrb[250].mxu1 }
 0x407   :  { %5131 = vst.msk [vmem:[%s9695_s4 + $0x3e0] sm:$0xff] %vm5006_vm1, %v4592_v5  ;;  %v4595_v8 = vadd.f32 %v4594_v26, %v3649_v11  ;;  %v3651_v39 = vpop.f32.mrb[251].mxu0  ;;  %v9119_v42 = vpop.f32.mrb[251].mxu1 }
 0x409   :  { %5132 = vst.msk [vmem:[%s9695_s4 + $0x3e8] sm:$0xff] %vm5006_vm1, %v4595_v8 }
 0x40c   :  { %v3654_v12 = vpop.f32.mrb[252].mxu0  ;;  %v9125_v17 = vpop.f32.mrb[252].mxu1 }
 0x40d   :  { %v4600_v21 = vadd.f32 %v5944_v29, %v3654_v12  ;;  %v3656_v2 = vpop.f32.mrb[253].mxu0  ;;  %v9127_v47 = vpop.f32.mrb[253].mxu1 }
 0x40e   :  { %v3657_v38 = vpop.f32.mrb[254].mxu0  ;;  %v9129_v40 = vpop.f32.mrb[254].mxu1 }
 0x40f   :  { %5133 = vst.msk [vmem:[%s9695_s4 + $0x3f0] sm:$0xff] %vm5006_vm1, %v4600_v21  ;;  %v4603_v4 = vadd.f32 %v5945_v27, %v3657_v38  ;;  %v3659_v57 = vpop.f32.mrb[255].mxu0  ;;  %v9135_v54 = vpop.f32.mrb[255].mxu1 }
 0x411   :  { %5134 = vst.msk [vmem:[%s9695_s4 + $0x3f8] sm:$0xff] %vm5006_vm1, %v4603_v4 }
 0x414   :  { %v3662_v3 = vpop.f32.mrb[0].mxu0  ;;  %v9141_v37 = vpop.f32.mrb[0].mxu1 }
 0x415   :  { %v4608_v51 = vadd.f32 %v4607_v45, %v3662_v3  ;;  %v3664_v36 = vpop.f32.mrb[1].mxu0  ;;  %v9143_v32 = vpop.f32.mrb[1].mxu1 }
 0x416   :  { %v3665_v58 = vpop.f32.mrb[2].mxu0  ;;  %v9145_v7 = vpop.f32.mrb[2].mxu1 }
 0x417   :  { %5135 = vst.msk [vmem:[%s9695_s4 + $0x400] sm:$0xff] %vm5006_vm1, %v4608_v51  ;;  %v4611_v33 = vadd.f32 %v4610_v62, %v3665_v58  ;;  %v3667_v55 = vpop.f32.mrb[3].mxu0  ;;  %v9151_v50 = vpop.f32.mrb[3].mxu1 }
 0x419   :  { %5136 = vst.msk [vmem:[%s9695_s4 + $0x408] sm:$0xff] %vm5006_vm1, %v4611_v33 }
 0x41c   :  { %v3670_v44 = vpop.f32.mrb[4].mxu0  ;;  %v9157_v63 = vpop.f32.mrb[4].mxu1 }
 0x41d   :  { %v4616_v0 = vadd.f32 %v5948_v59, %v3670_v44  ;;  %v3672_v52 = vpop.f32.mrb[5].mxu0  ;;  %v9159_v25 = vpop.f32.mrb[5].mxu1 }
 0x41e   :  { %v3673_v29 = vpop.f32.mrb[6].mxu0  ;;  %v9161_v20 = vpop.f32.mrb[6].mxu1 }
 0x41f   :  { %5137 = vst.msk [vmem:[%s9695_s4 + $0x410] sm:$0xff] %vm5006_vm1, %v4616_v0  ;;  %v4619_v60 = vadd.f32 %v5949_v18, %v3673_v29  ;;  %v3675_v53 = vpop.f32.mrb[7].mxu0  ;;  %v9167_v1 = vpop.f32.mrb[7].mxu1 }
 0x421   :  { %5138 = vst.msk [vmem:[%s9695_s4 + $0x418] sm:$0xff] %vm5006_vm1, %v4619_v60 }
 0x424   :  { %v3678_v27 = vpop.f32.mrb[8].mxu0  ;;  %v9173_v61 = vpop.f32.mrb[8].mxu1 }
 0x425   :  { %v4624_v46 = vadd.f32 %v4623_v43, %v3678_v27  ;;  %v3680_v26 = vpop.f32.mrb[9].mxu0  ;;  %v9175_v13 = vpop.f32.mrb[9].mxu1  ;;  %v9760_v27 = vld [vmem:[#allocation4_spill] sm:$0xff] }
 0x426   :  { %v3681_v59 = vpop.f32.mrb[10].mxu0  ;;  %v9177_v31 = vpop.f32.mrb[10].mxu1 }
 0x427   :  { %5139 = vst.msk [vmem:[%s9695_s4 + $0x420] sm:$0xff] %vm5006_vm1, %v4624_v46  ;;  %v4627_v49 = vadd.f32 %v4626_v24, %v3681_v59  ;;  %v3683_v45 = vpop.f32.mrb[11].mxu0  ;;  %v9183_v56 = vpop.f32.mrb[11].mxu1 }
 0x429   :  { %5140 = vst.msk [vmem:[%s9695_s4 + $0x428] sm:$0xff] %vm5006_vm1, %v4627_v49  ;;  %v9761_v49 = vld [vmem:[#allocation2_spill] sm:$0xff] }
 0x42c   :  { %v3686_v18 = vpop.f32.mrb[12].mxu0  ;;  %v9189_v35 = vpop.f32.mrb[12].mxu1 }
 0x42d   :  { %v4632_v28 = vadd.f32 %v9097_v19, %v3686_v18  ;;  %v3688_v62 = vpop.f32.mrb[13].mxu0  ;;  %v9192_v30 = vpop.f32.mrb[13].mxu1 }
 0x42e   :  { %v3689_v15 = vpop.f32.mrb[14].mxu0  ;;  %v9194_v16 = vpop.f32.mrb[14].mxu1 }
 0x42f   :  { %5141 = vst.msk [vmem:[%s9695_s4 + $0x430] sm:$0xff] %vm5006_vm1, %v4632_v28  ;;  %v4635_v43 = vadd.f32 %v9099_v6, %v3689_v15  ;;  %v3691_v34 = vpop.f32.mrb[15].mxu0  ;;  %v9201_v48 = vpop.f32.mrb[15].mxu1  ;;  %v9762_v28 = vld [vmem:[#allocation5_spill] sm:$0xff] }
 0x430   :  { %v9763_v34 = vld [vmem:[#allocation3_spill] sm:$0xff] }
 0x431   :  { %5142 = vst.msk [vmem:[%s9695_s4 + $0x438] sm:$0xff] %vm5006_vm1, %v4635_v43 }
 0x434   :  { %v3694_v19 = vpop.f32.mrb[16].mxu0  ;;  %v9207_v10 = vpop.f32.mrb[16].mxu1 }
 0x435   :  { %v4640_v24 = vadd.f32 %v9111_v41, %v3694_v19  ;;  %v3696_v23 = vpop.f32.mrb[17].mxu0  ;;  %v9210_v5 = vpop.f32.mrb[17].mxu1 }
 0x436   :  { %v3697_v9 = vpop.f32.mrb[18].mxu0  ;;  %v9212_v11 = vpop.f32.mrb[18].mxu1 }
 0x437   :  { %5143 = vst.msk [vmem:[%s9695_s4 + $0x440] sm:$0xff] %vm5006_vm1, %v4640_v24  ;;  %v4643_v6 = vadd.f32 %v9119_v42, %v3697_v9  ;;  %v3699_v8 = vpop.f32.mrb[19].mxu0  ;;  %v9219_v39 = vpop.f32.mrb[19].mxu1  ;;  %v9764_v9 = vld [vmem:[#allocation8_spill] sm:$0xff] }
 0x439   :  { %5144 = vst.msk [vmem:[%s9695_s4 + $0x448] sm:$0xff] %vm5006_vm1, %v4643_v6 }
 0x43c   :  { %v3702_v41 = vpop.f32.mrb[20].mxu0  ;;  %v9225_v12 = vpop.f32.mrb[20].mxu1 }
 0x43d   :  { %v4648_v21 = vadd.f32 %v9109_v22, %v3702_v41  ;;  %v3704_v2 = vpop.f32.mrb[21].mxu0  ;;  %v9228_v38 = vpop.f32.mrb[21].mxu1 }
 0x43e   :  { %v3705_v4 = vpop.f32.mrb[22].mxu0  ;;  %v9230_v57 = vpop.f32.mrb[22].mxu1 }
 0x43f   :  { %5145 = vst.msk [vmem:[%s9695_s4 + $0x450] sm:$0xff] %vm5006_vm1, %v4648_v21  ;;  %v4651_v42 = vadd.f32 %v9113_v14, %v3705_v4  ;;  %v3707_v3 = vpop.f32.mrb[23].mxu0  ;;  %v9237_v51 = vpop.f32.mrb[23].mxu1  ;;  %v9765_v21 = vld [vmem:[#allocation6_spill] sm:$0xff] }
 0x440   :  { %v9766_v3 = vld [vmem:[#allocation9_spill] sm:$0xff] }
 0x441   :  { %5146 = vst.msk [vmem:[%s9695_s4 + $0x458] sm:$0xff] %vm5006_vm1, %v4651_v42 }
 0x444   :  { %v3710_v22 = vpop.f32.mrb[24].mxu0  ;;  %v9243_v36 = vpop.f32.mrb[24].mxu1 }
 0x445   :  { %v4656_v58 = vadd.f32 %v9127_v47, %v3710_v22  ;;  %v3712_v33 = vpop.f32.mrb[25].mxu0  ;;  %v9246_v55 = vpop.f32.mrb[25].mxu1 }
 0x446   :  { %v3713_v44 = vpop.f32.mrb[26].mxu0  ;;  %v9248_v0 = vpop.f32.mrb[26].mxu1 }
 0x447   :  { %5147 = vst.msk [vmem:[%s9695_s4 + $0x460] sm:$0xff] %vm5006_vm1, %v4656_v58  ;;  %v4659_v14 = vadd.f32 %v9135_v54, %v3713_v44  ;;  %v3715_v52 = vpop.f32.mrb[27].mxu0  ;;  %v9255_v29 = vpop.f32.mrb[27].mxu1  ;;  %v9767_v44 = vld [vmem:[#allocation7_spill] sm:$0xff] }
 0x449   :  { %5148 = vst.msk [vmem:[%s9695_s4 + $0x468] sm:$0xff] %vm5006_vm1, %v4659_v14 }
 0x44c   :  { %v3718_v47 = vpop.f32.mrb[28].mxu0  ;;  %v5992_v60 = vpop.f32.mrb[28].mxu1 }
 0x44d   :  { %v4664_v53 = vadd.f32 %v9125_v17, %v3718_v47  ;;  %v4792_v46 = vadd.f32 %v5992_v60, %v9760_v27  ;;  %v3720_v26 = vpop.f32.mrb[29].mxu0  ;;  %v4783_v59 = vpop.f32.mrb[29].mxu1  ;;  %v9768_v60 = vld [vmem:[#allocation12_spill] sm:$0xff] }
 0x44e   :  { %v4784_v45 = vadd.f32 %v4783_v59, %v9761_v49  ;;  %v3721_v18 = vpop.f32.mrb[30].mxu0  ;;  %v5993_v54 = vpop.f32.mrb[30].mxu1  ;;  %v9769_v26 = vld [vmem:[#allocation10_spill] sm:$0xff] }
 0x44f   :  { %5149 = vst.msk [vmem:[%s9695_s4 + $0x470] sm:$0xff] %vm5006_vm1, %v4664_v53  ;;  %5181 = vst.msk [vmem:[%s9695_s4 + $0x570] sm:$0xff] %vm5006_vm1, %v4792_v46  ;;  %v4667_v17 = vadd.f32 %v9129_v40, %v3721_v18  ;;  %v4795_v62 = vadd.f32 %v5993_v54, %v9762_v28  ;;  %v4786_v15 = vpop.f32.mrb[31].mxu1  ;;  %v3723_v43 = vpop.f32.mrb[31].mxu0  ;;  %v9770_v18 = vld [vmem:[#allocation13_spill] sm:$0xff] }
 0x450   :  { %5179 = vst.msk [vmem:[%s9695_s4 + $0x560] sm:$0xff] %vm5006_vm1, %v4784_v45  ;;  %v4787_v19 = vadd.f32 %v4786_v15, %v9763_v34 }
 0x451   :  { %5150 = vst.msk [vmem:[%s9695_s4 + $0x478] sm:$0xff] %vm5006_vm1, %v4667_v17  ;;  %5182 = vst.msk [vmem:[%s9695_s4 + $0x578] sm:$0xff] %vm5006_vm1, %v4795_v62  ;;  %v9771_v62 = vld [vmem:[#allocation11_spill] sm:$0xff] }
 0x452   :  { %5180 = vst.msk [vmem:[%s9695_s4 + $0x568] sm:$0xff] %vm5006_vm1, %v4787_v19  ;;  %v9772_v19 = vld [vmem:[#allocation16_spill] sm:$0xff] }
 0x454   :  { %v3726_v40 = vpop.f32.mrb[32].mxu0  ;;  %v5996_v24 = vpop.f32.mrb[32].mxu1 }
 0x455   :  { %v4672_v23 = vadd.f32 %v9143_v32, %v3726_v40  ;;  %v4808_v6 = vadd.f32 %v5996_v24, %v9764_v9  ;;  %v3728_v8 = vpop.f32.mrb[33].mxu0  ;;  %v4799_v41 = vpop.f32.mrb[33].mxu1  ;;  %v9773_v9 = vld [vmem:[#allocation14_spill] sm:$0xff] }
 0x456   :  { %v4800_v2 = vadd.f32 %v4799_v41, %v9765_v21  ;;  %v3729_v4 = vpop.f32.mrb[34].mxu0  ;;  %v5997_v42 = vpop.f32.mrb[34].mxu1  ;;  %v9774_v21 = vld [vmem:[#allocation17_spill] sm:$0xff] }
 0x457   :  { %5151 = vst.msk [vmem:[%s9695_s4 + $0x480] sm:$0xff] %vm5006_vm1, %v4672_v23  ;;  %5185 = vst.msk [vmem:[%s9695_s4 + $0x590] sm:$0xff] %vm5006_vm1, %v4808_v6  ;;  %v4675_v32 = vadd.f32 %v9151_v50, %v3729_v4  ;;  %v4811_v22 = vadd.f32 %v5997_v42, %v9766_v3  ;;  %v4802_v58 = vpop.f32.mrb[35].mxu1  ;;  %v3731_v33 = vpop.f32.mrb[35].mxu0 }
 0x458   :  { %5183 = vst.msk [vmem:[%s9695_s4 + $0x580] sm:$0xff] %vm5006_vm1, %v4800_v2  ;;  %v4803_v14 = vadd.f32 %v4802_v58, %v9767_v44  ;;  %v9776_v33 = vld [vmem:[#allocation20_spill] sm:$0xff] }
 0x459   :  { %5152 = vst.msk [vmem:[%s9695_s4 + $0x488] sm:$0xff] %vm5006_vm1, %v4675_v32  ;;  %5186 = vst.msk [vmem:[%s9695_s4 + $0x598] sm:$0xff] %vm5006_vm1, %v4811_v22  ;;  %v9775_v32 = vld [vmem:[#allocation15_spill] sm:$0xff] }
 0x45a   :  { %5184 = vst.msk [vmem:[%s9695_s4 + $0x588] sm:$0xff] %vm5006_vm1, %v4803_v14 }
 0x45c   :  { %v3734_v50 = vpop.f32.mrb[36].mxu0  ;;  %v6000_v52 = vpop.f32.mrb[36].mxu1 }
 0x45d   :  { %v4680_v47 = vadd.f32 %v9141_v37, %v3734_v50  ;;  %v4824_v53 = vadd.f32 %v6000_v52, %v9768_v60  ;;  %v3736_v27 = vpop.f32.mrb[37].mxu0  ;;  %v4815_v46 = vpop.f32.mrb[37].mxu1  ;;  %v9777_v52 = vld [vmem:[#allocation18_spill] sm:$0xff] }
 0x45e   :  { %v4816_v59 = vadd.f32 %v4815_v46, %v9769_v26  ;;  %v3737_v49 = vpop.f32.mrb[38].mxu0  ;;  %v6001_v45 = vpop.f32.mrb[38].mxu1  ;;  %v9778_v27 = vld [vmem:[#allocation21_spill] sm:$0xff] }
 0x45f   :  { %5153 = vst.msk [vmem:[%s9695_s4 + $0x490] sm:$0xff] %vm5006_vm1, %v4680_v47  ;;  %5189 = vst.msk [vmem:[%s9695_s4 + $0x5b0] sm:$0xff] %vm5006_vm1, %v4824_v53  ;;  %v4683_v37 = vadd.f32 %v9145_v7, %v3737_v49  ;;  %v4827_v54 = vadd.f32 %v6001_v45, %v9770_v18  ;;  %v4818_v17 = vpop.f32.mrb[39].mxu1  ;;  %v3739_v28 = vpop.f32.mrb[39].mxu0  ;;  %v9779_v49 = vld [vmem:[#allocation19_spill] sm:$0xff] }
 0x460   :  { %5187 = vst.msk [vmem:[%s9695_s4 + $0x5a0] sm:$0xff] %vm5006_vm1, %v4816_v59  ;;  %v4819_v15 = vadd.f32 %v4818_v17, %v9771_v62 }
 0x461   :  { %5154 = vst.msk [vmem:[%s9695_s4 + $0x498] sm:$0xff] %vm5006_vm1, %v4683_v37  ;;  %5190 = vst.msk [vmem:[%s9695_s4 + $0x5b8] sm:$0xff] %vm5006_vm1, %v4827_v54  ;;  %v9780_v54 = vld [vmem:[#allocation24_spill] sm:$0xff] }
 0x462   :  { %5188 = vst.msk [vmem:[%s9695_s4 + $0x5a8] sm:$0xff] %vm5006_vm1, %v4819_v15  ;;  %v9781_v15 = vld [vmem:[#allocation22_spill] sm:$0xff] }
 0x464   :  { %v3742_v7 = vpop.f32.mrb[40].mxu0  ;;  %v6004_v43 = vpop.f32.mrb[40].mxu1 }
 0x465   :  { %v4688_v34 = vadd.f32 %v9159_v25, %v3742_v7  ;;  %v4840_v40 = vadd.f32 %v6004_v43, %v9772_v19  ;;  %v3744_v24 = vpop.f32.mrb[41].mxu0  ;;  %v4831_v23 = vpop.f32.mrb[41].mxu1  ;;  %v9782_v19 = vld [vmem:[#allocation25_spill] sm:$0xff] }
 0x466   :  { %v4832_v6 = vadd.f32 %v4831_v23, %v9773_v9  ;;  %v3745_v8 = vpop.f32.mrb[42].mxu0  ;;  %v6005_v41 = vpop.f32.mrb[42].mxu1  ;;  %v9783_v9 = vld [vmem:[#allocation23_spill] sm:$0xff] }
 0x467   :  { %5155 = vst.msk [vmem:[%s9695_s4 + $0x4a0] sm:$0xff] %vm5006_vm1, %v4688_v34  ;;  %5193 = vst.msk [vmem:[%s9695_s4 + $0x5d0] sm:$0xff] %vm5006_vm1, %v4840_v40  ;;  %v4691_v25 = vadd.f32 %v9167_v1, %v3745_v8  ;;  %v4843_v2 = vadd.f32 %v6005_v41, %v9774_v21  ;;  %v4834_v4 = vpop.f32.mrb[43].mxu1  ;;  %v3747_v42 = vpop.f32.mrb[43].mxu0 }
 0x468   :  { %5191 = vst.msk [vmem:[%s9695_s4 + $0x5c0] sm:$0xff] %vm5006_vm1, %v4832_v6  ;;  %v4835_v3 = vadd.f32 %v4834_v4, %v9775_v32  ;;  %v9785_v42 = vld [vmem:[#allocation26_spill] sm:$0xff] }
 0x469   :  { %5156 = vst.msk [vmem:[%s9695_s4 + $0x4a8] sm:$0xff] %vm5006_vm1, %v4691_v25  ;;  %5194 = vst.msk [vmem:[%s9695_s4 + $0x5d8] sm:$0xff] %vm5006_vm1, %v4843_v2  ;;  %v9784_v25 = vld [vmem:[#allocation28_spill] sm:$0xff] }
 0x46a   :  { %5192 = vst.msk [vmem:[%s9695_s4 + $0x5c8] sm:$0xff] %vm5006_vm1, %v4835_v3 }
 0x46c   :  { %v3750_v1 = vpop.f32.mrb[44].mxu0  ;;  %v6008_v22 = vpop.f32.mrb[44].mxu1 }
 0x46d   :  { %v4696_v58 = vadd.f32 %v9157_v63, %v3750_v1  ;;  %v4856_v44 = vadd.f32 %v6008_v22, %v9776_v33  ;;  %v3752_v14 = vpop.f32.mrb[45].mxu0  ;;  %v4847_v50 = vpop.f32.mrb[45].mxu1  ;;  %v9786_v22 = vld [vmem:[#allocation29_spill] sm:$0xff] }
 0x46e   :  { %v4848_v47 = vadd.f32 %v4847_v50, %v9777_v52  ;;  %v3753_v60 = vpop.f32.mrb[46].mxu0  ;;  %v6009_v53 = vpop.f32.mrb[46].mxu1  ;;  %v9787_v14 = vld [vmem:[#allocation27_spill] sm:$0xff] }
 0x46f   :  { %5157 = vst.msk [vmem:[%s9695_s4 + $0x4b0] sm:$0xff] %vm5006_vm1, %v4696_v58  ;;  %5197 = vst.msk [vmem:[%s9695_s4 + $0x5f0] sm:$0xff] %vm5006_vm1, %v4856_v44  ;;  %v4699_v63 = vadd.f32 %v9161_v20, %v3753_v60  ;;  %v4859_v46 = vadd.f32 %v6009_v53, %v9778_v27  ;;  %v4850_v26 = vpop.f32.mrb[47].mxu1  ;;  %v3755_v59 = vpop.f32.mrb[47].mxu0  ;;  %v9788_v60 = vld [vmem:[#allocation32_spill] sm:$0xff] }
 0x470   :  { %5195 = vst.msk [vmem:[%s9695_s4 + $0x5e0] sm:$0xff] %vm5006_vm1, %v4848_v47  ;;  %v4851_v45 = vadd.f32 %v4850_v26, %v9779_v49 }
 0x471   :  { %5158 = vst.msk [vmem:[%s9695_s4 + $0x4b8] sm:$0xff] %vm5006_vm1, %v4699_v63  ;;  %5198 = vst.msk [vmem:[%s9695_s4 + $0x5f8] sm:$0xff] %vm5006_vm1, %v4859_v46  ;;  %v9789_v46 = vld [vmem:[#allocation30_spill] sm:$0xff] }
 0x472   :  { %5196 = vst.msk [vmem:[%s9695_s4 + $0x5e8] sm:$0xff] %vm5006_vm1, %v4851_v45  ;;  %v9790_v45 = vld [vmem:[#allocation33_spill] sm:$0xff] }
 0x474   :  { %v3758_v20 = vpop.f32.mrb[48].mxu0  ;;  %v6012_v37 = vpop.f32.mrb[48].mxu1 }
 0x475   :  { %v4704_v18 = vadd.f32 %v9175_v13, %v3758_v20  ;;  %v4872_v17 = vadd.f32 %v6012_v37, %v9780_v54  ;;  %v3760_v28 = vpop.f32.mrb[49].mxu0  ;;  %v4863_v62 = vpop.f32.mrb[49].mxu1  ;;  %v9791_v54 = vld [vmem:[#allocation31_spill] sm:$0xff] }
 0x476   :  { %v4864_v7 = vadd.f32 %v4863_v62, %v9781_v15  ;;  %v3761_v43 = vpop.f32.mrb[50].mxu0  ;;  %v6013_v34 = vpop.f32.mrb[50].mxu1  ;;  %v9792_v15 = vld [vmem:[#allocation36_spill] sm:$0xff] }
 0x477   :  { %5159 = vst.msk [vmem:[%s9695_s4 + $0x4c0] sm:$0xff] %vm5006_vm1, %v4704_v18  ;;  %5201 = vst.msk [vmem:[%s9695_s4 + $0x610] sm:$0xff] %vm5006_vm1, %v4872_v17  ;;  %v4707_v13 = vadd.f32 %v9183_v56, %v3761_v43  ;;  %v4875_v40 = vadd.f32 %v6013_v34, %v9782_v19  ;;  %v4866_v24 = vpop.f32.mrb[51].mxu1  ;;  %v3763_v23 = vpop.f32.mrb[51].mxu0 }
 0x478   :  { %5199 = vst.msk [vmem:[%s9695_s4 + $0x600] sm:$0xff] %vm5006_vm1, %v4864_v7  ;;  %v4867_v6 = vadd.f32 %v4866_v24, %v9783_v9  ;;  %v9794_v23 = vld [vmem:[#allocation37_spill] sm:$0xff] }
 0x479   :  { %5160 = vst.msk [vmem:[%s9695_s4 + $0x4c8] sm:$0xff] %vm5006_vm1, %v4707_v13  ;;  %5202 = vst.msk [vmem:[%s9695_s4 + $0x618] sm:$0xff] %vm5006_vm1, %v4875_v40  ;;  %v9793_v13 = vld [vmem:[#allocation34_spill] sm:$0xff] }
 0x47a   :  { %5200 = vst.msk [vmem:[%s9695_s4 + $0x608] sm:$0xff] %vm5006_vm1, %v4867_v6 }
 0x47c   :  { %v3766_v56 = vpop.f32.mrb[52].mxu0  ;;  %v6016_v8 = vpop.f32.mrb[52].mxu1 }
 0x47d   :  { %v4712_v41 = vadd.f32 %v9173_v61, %v3766_v56  ;;  %v4888_v21 = vadd.f32 %v6016_v8, %v9784_v25  ;;  %v3768_v2 = vpop.f32.mrb[53].mxu0  ;;  %v4879_v4 = vpop.f32.mrb[53].mxu1  ;;  %v9795_v8 = vld [vmem:[#allocation35_spill] sm:$0xff] }
 0x47e   :  { %v4880_v32 = vadd.f32 %v4879_v4, %v9785_v42  ;;  %v3769_v3 = vpop.f32.mrb[54].mxu0  ;;  %v6017_v1 = vpop.f32.mrb[54].mxu1  ;;  %v9796_v2 = vld [vmem:[#allocation40_spill] sm:$0xff] }
 0x47f   :  { %5161 = vst.msk [vmem:[%s9695_s4 + $0x4d0] sm:$0xff] %vm5006_vm1, %v4712_v41  ;;  %5205 = vst.msk [vmem:[%s9695_s4 + $0x630] sm:$0xff] %vm5006_vm1, %v4888_v21  ;;  %v4715_v61 = vadd.f32 %v9177_v31, %v3769_v3  ;;  %v4891_v58 = vadd.f32 %v6017_v1, %v9786_v22  ;;  %v4882_v33 = vpop.f32.mrb[55].mxu1  ;;  %v3771_v44 = vpop.f32.mrb[55].mxu0  ;;  %v9797_v3 = vld [vmem:[#allocation38_spill] sm:$0xff] }
 0x480   :  { %5203 = vst.msk [vmem:[%s9695_s4 + $0x620] sm:$0xff] %vm5006_vm1, %v4880_v32  ;;  %v4883_v50 = vadd.f32 %v4882_v33, %v9787_v14 }
 0x481   :  { %5162 = vst.msk [vmem:[%s9695_s4 + $0x4d8] sm:$0xff] %vm5006_vm1, %v4715_v61  ;;  %5206 = vst.msk [vmem:[%s9695_s4 + $0x638] sm:$0xff] %vm5006_vm1, %v4891_v58  ;;  %v9798_v58 = vld [vmem:[#allocation41_spill] sm:$0xff] }
 0x482   :  { %5204 = vst.msk [vmem:[%s9695_s4 + $0x628] sm:$0xff] %vm5006_vm1, %v4883_v50  ;;  %v9799_v50 = vld [vmem:[#allocation39_spill] sm:$0xff] }
 0x484   :  { %v3774_v31 = vpop.f32.mrb[56].mxu0  ;;  %v6020_v52 = vpop.f32.mrb[56].mxu1 }
 0x485   :  { %v4720_v47 = vadd.f32 %v9192_v30, %v3774_v31  ;;  %v4904_v53 = vadd.f32 %v6020_v52, %v9788_v60  ;;  %v3776_v63 = vpop.f32.mrb[57].mxu0  ;;  %v4895_v27 = vpop.f32.mrb[57].mxu1  ;;  %v9800_v60 = vld [vmem:[#allocation44_spill] sm:$0xff] }
 0x486   :  { %v4896_v26 = vadd.f32 %v4895_v27, %v9789_v46  ;;  %v3777_v59 = vpop.f32.mrb[58].mxu0  ;;  %v6021_v49 = vpop.f32.mrb[58].mxu1  ;;  %v9801_v46 = vld [vmem:[#allocation42_spill] sm:$0xff] }
 0x487   :  { %5163 = vst.msk [vmem:[%s9695_s4 + $0x4e0] sm:$0xff] %vm5006_vm1, %v4720_v47  ;;  %5209 = vst.msk [vmem:[%s9695_s4 + $0x650] sm:$0xff] %vm5006_vm1, %v4904_v53  ;;  %v4723_v30 = vadd.f32 %v9201_v48, %v3777_v59  ;;  %v4907_v20 = vadd.f32 %v6021_v49, %v9790_v45  ;;  %v4898_v37 = vpop.f32.mrb[59].mxu1  ;;  %v3779_v18 = vpop.f32.mrb[59].mxu0 }
 0x488   :  { %5207 = vst.msk [vmem:[%s9695_s4 + $0x640] sm:$0xff] %vm5006_vm1, %v4896_v26  ;;  %v4899_v17 = vadd.f32 %v4898_v37, %v9791_v54  ;;  %v9803_v18 = vld [vmem:[#allocation43_spill] sm:$0xff] }
 0x489   :  { %5164 = vst.msk [vmem:[%s9695_s4 + $0x4e8] sm:$0xff] %vm5006_vm1, %v4723_v30  ;;  %5210 = vst.msk [vmem:[%s9695_s4 + $0x658] sm:$0xff] %vm5006_vm1, %v4907_v20  ;;  %v9802_v30 = vld [vmem:[#allocation45_spill] sm:$0xff] }
 0x48a   :  { %5208 = vst.msk [vmem:[%s9695_s4 + $0x648] sm:$0xff] %vm5006_vm1, %v4899_v17 }
 0x48c   :  { %v3782_v48 = vpop.f32.mrb[60].mxu0  ;;  %v6024_v28 = vpop.f32.mrb[60].mxu1 }
 0x48d   :  { %v4728_v62 = vadd.f32 %v9189_v35, %v3782_v48  ;;  %v4920_v7 = vadd.f32 %v6024_v28, %v9792_v15  ;;  %v3784_v43 = vpop.f32.mrb[61].mxu0  ;;  %v4911_v34 = vpop.f32.mrb[61].mxu1  ;;  %v9804_v28 = vld [vmem:[#allocation48_spill] sm:$0xff] }
 0x48e   :  { %v4912_v19 = vadd.f32 %v4911_v34, %v9793_v13  ;;  %v3785_v40 = vpop.f32.mrb[62].mxu0  ;;  %v6025_v24 = vpop.f32.mrb[62].mxu1  ;;  %v9805_v43 = vld [vmem:[#allocation46_spill] sm:$0xff] }
 0x48f   :  { %5165 = vst.msk [vmem:[%s9695_s4 + $0x4f0] sm:$0xff] %vm5006_vm1, %v4728_v62  ;;  %5213 = vst.msk [vmem:[%s9695_s4 + $0x670] sm:$0xff] %vm5006_vm1, %v4920_v7  ;;  %v4731_v35 = vadd.f32 %v9194_v16, %v3785_v40  ;;  %v4923_v9 = vadd.f32 %v6025_v24, %v9794_v23  ;;  %v4914_v6 = vpop.f32.mrb[63].mxu1  ;;  %v3787_v56 = vpop.f32.mrb[63].mxu0  ;;  %v9806_v40 = vld [vmem:[#allocation49_spill] sm:$0xff] }
 0x490   :  { %5211 = vst.msk [vmem:[%s9695_s4 + $0x660] sm:$0xff] %vm5006_vm1, %v4912_v19  ;;  %v4915_v41 = vadd.f32 %v4914_v6, %v9795_v8 }
 0x491   :  { %5166 = vst.msk [vmem:[%s9695_s4 + $0x4f8] sm:$0xff] %vm5006_vm1, %v4731_v35  ;;  %5214 = vst.msk [vmem:[%s9695_s4 + $0x678] sm:$0xff] %vm5006_vm1, %v4923_v9  ;;  %v9807_v9 = vld [vmem:[#allocation47_spill] sm:$0xff] }
 0x492   :  { %5212 = vst.msk [vmem:[%s9695_s4 + $0x668] sm:$0xff] %vm5006_vm1, %v4915_v41  ;;  %v9808_v41 = vld [vmem:[#allocation52_spill] sm:$0xff] }
 0x494   :  { %v3790_v16 = vpop.f32.mrb[64].mxu0  ;;  %v6028_v25 = vpop.f32.mrb[64].mxu1 }
 0x495   :  { %v4736_v21 = vadd.f32 %v9210_v5, %v3790_v16  ;;  %v4936_v4 = vadd.f32 %v6028_v25, %v9796_v2  ;;  %v3792_v42 = vpop.f32.mrb[65].mxu0  ;;  %v4927_v32 = vpop.f32.mrb[65].mxu1  ;;  %v9809_v2 = vld [vmem:[#allocation50_spill] sm:$0xff] }
 0x496   :  { %v4928_v1 = vadd.f32 %v4927_v32, %v9797_v3  ;;  %v3793_v61 = vpop.f32.mrb[66].mxu0  ;;  %v6029_v22 = vpop.f32.mrb[66].mxu1  ;;  %v9810_v3 = vld [vmem:[#allocation53_spill] sm:$0xff] }
 0x497   :  { %5167 = vst.msk [vmem:[%s9695_s4 + $0x500] sm:$0xff] %vm5006_vm1, %v4736_v21  ;;  %5217 = vst.msk [vmem:[%s9695_s4 + $0x690] sm:$0xff] %vm5006_vm1, %v4936_v4  ;;  %v4739_v5 = vadd.f32 %v9219_v39, %v3793_v61  ;;  %v4939_v33 = vadd.f32 %v6029_v22, %v9798_v58  ;;  %v4930_v44 = vpop.f32.mrb[67].mxu1  ;;  %v3795_v14 = vpop.f32.mrb[67].mxu0 }
 0x498   :  { %5215 = vst.msk [vmem:[%s9695_s4 + $0x680] sm:$0xff] %vm5006_vm1, %v4928_v1  ;;  %v4931_v31 = vadd.f32 %v4930_v44, %v9799_v50  ;;  %v9812_v14 = vld [vmem:[#allocation59_spill] sm:$0xff] }
 0x499   :  { %5168 = vst.msk [vmem:[%s9695_s4 + $0x508] sm:$0xff] %vm5006_vm1, %v4739_v5  ;;  %5218 = vst.msk [vmem:[%s9695_s4 + $0x698] sm:$0xff] %vm5006_vm1, %v4939_v33  ;;  %v9811_v5 = vld [vmem:[#allocation51_spill] sm:$0xff] }
 0x49a   :  { %5216 = vst.msk [vmem:[%s9695_s4 + $0x688] sm:$0xff] %vm5006_vm1, %v4931_v31 }
 0x49c   :  { %v3798_v39 = vpop.f32.mrb[68].mxu0  ;;  %v6032_v52 = vpop.f32.mrb[68].mxu1 }
 0x49d   :  { %v4744_v47 = vadd.f32 %v9207_v10, %v3798_v39  ;;  %v4952_v53 = vadd.f32 %v6032_v52, %v9800_v60  ;;  %v3800_v63 = vpop.f32.mrb[69].mxu0  ;;  %v4943_v27 = vpop.f32.mrb[69].mxu1  ;;  %v9813_v52 = vld [vmem:[#allocation55_spill] sm:$0xff] }
 0x49e   :  { %v4944_v26 = vadd.f32 %v4943_v27, %v9801_v46  ;;  %v3801_v59 = vpop.f32.mrb[70].mxu0  ;;  %v6033_v49 = vpop.f32.mrb[70].mxu1  ;;  %v9814_v63 = vld [vmem:[#allocation61_spill] sm:$0xff] }
 0x49f   :  { %5169 = vst.msk [vmem:[%s9695_s4 + $0x510] sm:$0xff] %vm5006_vm1, %v4744_v47  ;;  %5221 = vst.msk [vmem:[%s9695_s4 + $0x6b0] sm:$0xff] %vm5006_vm1, %v4952_v53  ;;  %v4747_v10 = vadd.f32 %v9212_v11, %v3801_v59  ;;  %v4955_v45 = vadd.f32 %v6033_v49, %v9802_v30  ;;  %v4946_v20 = vpop.f32.mrb[71].mxu1  ;;  %v3803_v37 = vpop.f32.mrb[71].mxu0  ;;  %v9815_v59 = vld [vmem:[#allocation57_spill] sm:$0xff] }
 0x4a0   :  { %5219 = vst.msk [vmem:[%s9695_s4 + $0x6a0] sm:$0xff] %vm5006_vm1, %v4944_v26  ;;  %v4947_v54 = vadd.f32 %v4946_v20, %v9803_v18 }
 0x4a1   :  { %5170 = vst.msk [vmem:[%s9695_s4 + $0x518] sm:$0xff] %vm5006_vm1, %v4747_v10  ;;  %5222 = vst.msk [vmem:[%s9695_s4 + $0x6b8] sm:$0xff] %vm5006_vm1, %v4955_v45 }
 0x4a2   :  { %5220 = vst.msk [vmem:[%s9695_s4 + $0x6a8] sm:$0xff] %vm5006_vm1, %v4947_v54 }
 0x4a4   :  { %v3806_v11 = vpop.f32.mrb[72].mxu0  ;;  %v6036_v17 = vpop.f32.mrb[72].mxu1 }
 0x4a5   :  { %v4752_v48 = vadd.f32 %v9228_v38, %v3806_v11  ;;  %v4968_v62 = vadd.f32 %v6036_v17, %v9804_v28  ;;  %v3808_v15 = vpop.f32.mrb[73].mxu0  ;;  %v4959_v7 = vpop.f32.mrb[73].mxu1 }
 0x4a6   :  { %v4960_v34 = vadd.f32 %v4959_v7, %v9805_v43  ;;  %v3809_v13 = vpop.f32.mrb[74].mxu0  ;;  %v6037_v19 = vpop.f32.mrb[74].mxu1 }
 0x4a7   :  { %5171 = vst.msk [vmem:[%s9695_s4 + $0x520] sm:$0xff] %vm5006_vm1, %v4752_v48  ;;  %5225 = vst.msk [vmem:[%s9695_s4 + $0x6d0] sm:$0xff] %vm5006_vm1, %v4968_v62  ;;  %v4755_v38 = vadd.f32 %v9237_v51, %v3809_v13  ;;  %v4971_v24 = vadd.f32 %v6037_v19, %v9806_v40  ;;  %v4962_v35 = vpop.f32.mrb[75].mxu1  ;;  %v3811_v23 = vpop.f32.mrb[75].mxu0 }
 0x4a8   :  { %5223 = vst.msk [vmem:[%s9695_s4 + $0x6c0] sm:$0xff] %vm5006_vm1, %v4960_v34  ;;  %v4963_v6 = vadd.f32 %v4962_v35, %v9807_v9 }
 0x4a9   :  { %5172 = vst.msk [vmem:[%s9695_s4 + $0x528] sm:$0xff] %vm5006_vm1, %v4755_v38  ;;  %5226 = vst.msk [vmem:[%s9695_s4 + $0x6d8] sm:$0xff] %vm5006_vm1, %v4971_v24 }
 0x4aa   :  { %5224 = vst.msk [vmem:[%s9695_s4 + $0x6c8] sm:$0xff] %vm5006_vm1, %v4963_v6 }
 0x4ac   :  { %v3814_v51 = vpop.f32.mrb[76].mxu0  ;;  %v6040_v56 = vpop.f32.mrb[76].mxu1 }
 0x4ad   :  { %v4760_v8 = vadd.f32 %v9225_v12, %v3814_v51  ;;  %v4984_v16 = vadd.f32 %v6040_v56, %v9808_v41  ;;  %v3816_v25 = vpop.f32.mrb[77].mxu0  ;;  %v4975_v21 = vpop.f32.mrb[77].mxu1 }
 0x4ae   :  { %v4976_v4 = vadd.f32 %v4975_v21, %v9809_v2  ;;  %v3817_v42 = vpop.f32.mrb[78].mxu0  ;;  %v6041_v32 = vpop.f32.mrb[78].mxu1 }
 0x4af   :  { %5173 = vst.msk [vmem:[%s9695_s4 + $0x530] sm:$0xff] %vm5006_vm1, %v4760_v8  ;;  %5229 = vst.msk [vmem:[%s9695_s4 + $0x6f0] sm:$0xff] %vm5006_vm1, %v4984_v16  ;;  %v4763_v12 = vadd.f32 %v9230_v57, %v3817_v42  ;;  %v4987_v1 = vadd.f32 %v6041_v32, %v9810_v3  ;;  %v4978_v61 = vpop.f32.mrb[79].mxu1  ;;  %v3819_v22 = vpop.f32.mrb[79].mxu0 }
 0x4b0   :  { %5227 = vst.msk [vmem:[%s9695_s4 + $0x6e0] sm:$0xff] %vm5006_vm1, %v4976_v4  ;;  %v4979_v58 = vadd.f32 %v4978_v61, %v9811_v5 }
 0x4b1   :  { %5174 = vst.msk [vmem:[%s9695_s4 + $0x538] sm:$0xff] %vm5006_vm1, %v4763_v12  ;;  %5230 = vst.msk [vmem:[%s9695_s4 + $0x6f8] sm:$0xff] %vm5006_vm1, %v4987_v1 }
 0x4b2   :  { %5228 = vst.msk [vmem:[%s9695_s4 + $0x6e8] sm:$0xff] %vm5006_vm1, %v4979_v58 }
 0x4b4   :  { %v3822_v57 = vpop.f32.mrb[80].mxu0  ;;  %v6044_v33 = vpop.f32.mrb[80].mxu1 }
 0x4b5   :  { %v4768_v44 = vadd.f32 %v9246_v55, %v3822_v57  ;;  %v5000_v50 = vadd.f32 %v6044_v33, %v9812_v14  ;;  %v3824_v31 = vpop.f32.mrb[81].mxu0  ;;  %v4991_v39 = vpop.f32.mrb[81].mxu1 }
 0x4b6   :  { %v4992_v47 = vadd.f32 %v4991_v39, %v9813_v52  ;;  %v3825_v60 = vpop.f32.mrb[82].mxu0  ;;  %v6045_v53 = vpop.f32.mrb[82].mxu1 }
 0x4b7   :  { %5175 = vst.msk [vmem:[%s9695_s4 + $0x540] sm:$0xff] %vm5006_vm1, %v4768_v44  ;;  %5233 = vst.msk [vmem:[%s9695_s4 + $0x710] sm:$0xff] %vm5006_vm1, %v5000_v50  ;;  %v4771_v55 = vadd.f32 %v9255_v29, %v3825_v60  ;;  %v5003_v27 = vadd.f32 %v6045_v53, %v9814_v63  ;;  %v4994_v46 = vpop.f32.mrb[83].mxu1  ;;  %v3827_v26 = vpop.f32.mrb[83].mxu0 }
 0x4b8   :  { %5231 = vst.msk [vmem:[%s9695_s4 + $0x700] sm:$0xff] %vm5006_vm1, %v4992_v47  ;;  %v4995_v49 = vadd.f32 %v4994_v46, %v9815_v59 }
 0x4b9   :  { %5176 = vst.msk [vmem:[%s9695_s4 + $0x548] sm:$0xff] %vm5006_vm1, %v4771_v55  ;;  %5234 = vst.msk [vmem:[%s9695_s4 + $0x718] sm:$0xff] %vm5006_vm1, %v5003_v27 }
 0x4ba   :  { %5232 = vst.msk [vmem:[%s9695_s4 + $0x708] sm:$0xff] %vm5006_vm1, %v4995_v49 }
 0x4bc   :  { %v3830_v29 = vpop.f32.mrb[84].mxu0 }
 0x4bd   :  { %v4776_v10 = vadd.f32 %v9243_v36, %v3830_v29  ;;  %v3832_v30 = vpop.f32.mrb[85].mxu0 }
 0x4be   :  { %v3833_v45 = vpop.f32.mrb[86].mxu0 }
 0x4bf   :  { %5177 = vst.msk [vmem:[%s9695_s4 + $0x550] sm:$0xff] %vm5006_vm1, %v4776_v10  ;;  %v4779_v20 = vadd.f32 %v9248_v0, %v3833_v45  ;;  %v3835_v37 = vpop.f32.mrb[87].mxu0 }
 0x4c1   :  { %5178 = vst.msk [vmem:[%s9695_s4 + $0x558] sm:$0xff] %vm5006_vm1, %v4779_v20 }

</bundles_post_ra>
